<compile_context>
chip_gen: v7x
topology: tpu7x:2x2x1
jax: 0.10.0
libtpu: 0.0.40
codegen_flags: <defaults>
</compile_context>

<pallas_src>
import math

import jax
import jax.numpy as jnp
from jax.experimental import pallas as pl
from jax.experimental.pallas import tpu as pltpu

# ----------------------------- configuration --------------------------------
IMG = 16            # cropped-face size (512 in the real model)
C_IN = 3
C_ENC1 = 8          # encoder mid channels
C_LAT = 16          # latent / codebook embedding dim (256 in the real model)
DIM = 32            # dim_embd (512 in the real model)
N_HEAD = 4          # n_head (8)
HEAD_DIM = DIM // N_HEAD
FFN = 2 * DIM       # dim_mlp
N_LAYERS = 2        # n_layers (9)
CODEBOOK = 64       # codebook_size (1024)
LAT_HW = IMG // 4   # latent spatial (16 in the real model)
SEQ = LAT_HW * LAT_HW


# ----------------------- generic fused GEMM (conv-as-GEMM) --------------------
def _gemm_kernel(two_inputs, add_w, pre, act, post):
    """y = act((x [+ add_w*x2]) [*pre_s + pre_b] @ W + b) [clamp/affine epilogue]."""
    def kernel(*refs):
        if two_inputs:
            x_ref, y_ref, w_ref, b_ref, o_ref = refs
            x = x_ref[...] + add_w * y_ref[...]
        else:
            x_ref, w_ref, b_ref, o_ref = refs
            x = x_ref[...]
        if pre is not None:
            x = x * pre[0] + pre[1]
        y = jnp.dot(x.astype(jnp.bfloat16), w_ref[...],
                    preferred_element_type=jnp.float32) + b_ref[...]
        if act == "leaky":
            y = jnp.where(y >= 0.0, y, 0.2 * y)
        if post is not None:
            lo, hi, sc, sh = post
            y = jnp.clip(y, lo, hi) * sc + sh
        o_ref[...] = y
    return kernel


def gemm(x, w, b, *, act="none", pre=None, post=None, x2=None, add_w=None, tm=128):
    M, K = x.shape
    N = w.shape[1]
    tm = M if M <= tm else tm
    assert M % tm == 0, (M, tm)
    xspec = pl.BlockSpec((tm, K), lambda i: (i, 0))
    wspec = pl.BlockSpec((K, N), lambda i: (0, 0))
    bspec = pl.BlockSpec((1, N), lambda i: (0, 0))
    ospec = pl.BlockSpec((tm, N), lambda i: (i, 0))
    args = [x] if x2 is None else [x, x2]
    in_specs = [xspec] * len(args) + [wspec, bspec]
    return pl.pallas_call(
        _gemm_kernel(x2 is not None, add_w, pre, act, post),
        out_shape=jax.ShapeDtypeStruct((M, N), jnp.float32),
        grid=(M // tm,),
        in_specs=in_specs,
        out_specs=ospec,
        compiler_params=pltpu.CompilerParams(dimension_semantics=("parallel",)),
    )(*args, w.astype(jnp.bfloat16), b.reshape(1, N))


# ------------- fused encoder stage-2 + feat_emb (two outputs, one launch) ------
def _enc2_kernel(col_ref, w2_ref, b2_ref, wf_ref, bf_ref, lq_ref, feat_ref):
    col = col_ref[...].astype(jnp.bfloat16)
    lq = jnp.dot(col, w2_ref[...], preferred_element_type=jnp.float32) + b2_ref[...]
    lq = jnp.where(lq >= 0.0, lq, 0.2 * lq)                      # leaky relu
    lq_ref[...] = lq
    feat_ref[...] = jnp.dot(lq.astype(jnp.bfloat16), wf_ref[...],
                            preferred_element_type=jnp.float32) + bf_ref[...]


def enc2_and_embed(col, p):
    M, K = col.shape
    return pl.pallas_call(
        _enc2_kernel,
        out_shape=(jax.ShapeDtypeStruct((M, C_LAT), jnp.float32),
                   jax.ShapeDtypeStruct((M, DIM), jnp.float32)),
        grid=(1,),
        in_specs=[pl.BlockSpec((M, K), lambda i: (0, 0)),
                  pl.BlockSpec((K, C_LAT), lambda i: (0, 0)),
                  pl.BlockSpec((1, C_LAT), lambda i: (0, 0)),
                  pl.BlockSpec((C_LAT, DIM), lambda i: (0, 0)),
                  pl.BlockSpec((1, DIM), lambda i: (0, 0))],
        out_specs=[pl.BlockSpec((M, C_LAT), lambda i: (0, 0)),
                   pl.BlockSpec((M, DIM), lambda i: (0, 0))],
        compiler_params=pltpu.CompilerParams(dimension_semantics=("arbitrary",)),
    )(col, p["enc2_w"].astype(jnp.bfloat16), p["enc2_b"].reshape(1, C_LAT),
      p["feat_emb_w"].astype(jnp.bfloat16), p["feat_emb_b"].reshape(1, DIM))


# ---- fused transformer STACK + head (all layers + codebook lookup + AdaIN) ----
def _tf_stack_kernel(q_ref, lq_ref, pos_ref, ln_ref, wqkvo_ref, bqkvo_ref,
                     w1_ref, b1_ref, w2_ref, b2_ref,
                     idxln_ref, idxw_ref, cb_ref, o_ref):
    x = q_ref[0]                      # (SEQ, DIM) f32
    pos = pos_ref[...]                # (SEQ, DIM)
    scale = 1.0 / math.sqrt(HEAD_DIM)

    def layernorm(v, g, b):
        mu = jnp.mean(v, axis=-1, keepdims=True)
        var = jnp.mean((v - mu) ** 2, axis=-1, keepdims=True)
        return (v - mu) * jax.lax.rsqrt(var + 1e-5) * g + b

    # static unroll over layers: activations stay in vregs/VMEM for whole stack
    for l in range(N_LAYERS):
        ln = ln_ref[l]                # (4, DIM): ln1_g, ln1_b, ln2_g, ln2_b
        wqkvo = wqkvo_ref[l]          # (DIM, 4*DIM) bf16, lane-dense packed
        bqkvo = bqkvo_ref[l]          # (1, 4*DIM) f32

        # ---- pre-norm 1
        x2 = layernorm(x, ln[0:1], ln[1:2])

        # ---- self-attention: q = k = x2 + pos, value = x2 (TransformerSALayer)
        qk_in = (x2 + pos).astype(jnp.bfloat16)
        v_in = x2.astype(jnp.bfloat16)
        q = jnp.dot(qk_in, wqkvo[:, 0:DIM],
                    preferred_element_type=jnp.float32) + bqkvo[:, 0:DIM]
        k = jnp.dot(qk_in, wqkvo[:, DIM:2 * DIM],
                    preferred_element_type=jnp.float32) + bqkvo[:, DIM:2 * DIM]
        v = jnp.dot(v_in, wqkvo[:, 2 * DIM:3 * DIM],
                    preferred_element_type=jnp.float32) + bqkvo[:, 2 * DIM:3 * DIM]

        heads = []
        for h in range(N_HEAD):       # static unroll; all heads in one launch
            sl = slice(h * HEAD_DIM, (h + 1) * HEAD_DIM)
            qh = q[:, sl].astype(jnp.bfloat16)
            kh = k[:, sl].astype(jnp.bfloat16)
            vh = v[:, sl].astype(jnp.bfloat16)
            # contract on the last dim (no explicit transpose)
            s = jax.lax.dot_general(qh, kh, (((1,), (1,)), ((), ())),
                                    preferred_element_type=jnp.float32) * scale
            s = s - jnp.max(s, axis=-1, keepdims=True)
            p = jnp.exp(s)
            p = p * pl.reciprocal(jnp.sum(p, axis=-1, keepdims=True), approx=True)
            heads.append(jnp.dot(p.astype(jnp.bfloat16), vh,
                                 preferred_element_type=jnp.float32))
        a = jnp.concatenate(heads, axis=-1)                   # (SEQ, DIM)
        a = jnp.dot(a.astype(jnp.bfloat16), wqkvo[:, 3 * DIM:4 * DIM],
                    preferred_element_type=jnp.float32) + bqkvo[:, 3 * DIM:4 * DIM]
        x = x + a                                             # residual (dropout=0 at eval)

        # ---- pre-norm 2 + FFN
        x2 = layernorm(x, ln[2:3], ln[3:4])
        h1 = jnp.dot(x2.astype(jnp.bfloat16), w1_ref[l],
                     preferred_element_type=jnp.float32) + b1_ref[l]
        # TODO(synk): torch nn.GELU is exact erf; tanh approximation used here.
        h1 = jax.nn.gelu(h1)
        h2 = jnp.dot(h1.astype(jnp.bfloat16), w2_ref[l],
                     preferred_element_type=jnp.float32) + b2_ref[l]
        x = x + h2

    # ---- head: idx LayerNorm -> Linear(bias=False) logits -> top-1 lookup
    idxln = idxln_ref[...]            # (2, DIM): gamma, beta
    q2 = layernorm(x, idxln[0:1], idxln[1:2])
    # argmax taken on raw logits (softmax dropped: argmax(softmax(x)) == argmax(x))
    logits = jnp.dot(q2.astype(jnp.bfloat16), idxw_ref[...],
                     preferred_element_type=jnp.float32)
    m = jnp.max(logits, axis=-1, keepdims=True)
    iota = jax.lax.broadcasted_iota(jnp.int32, logits.shape, 1)
    first = jnp.min(jnp.where(logits == m, iota, CODEBOOK), axis=-1, keepdims=True)
    onehot = (iota == first).astype(jnp.float32)
    quant = jnp.dot(onehot, cb_ref[...], preferred_element_type=jnp.float32)

    # ---- AdaIN (content = quant_feat, style = lq_feat), unbiased var like torch.var
    st = lq_ref[0]
    n = quant.shape[0]
    c_mean = jnp.mean(quant, axis=0, keepdims=True)
    c_var = jnp.sum((quant - c_mean) ** 2, axis=0, keepdims=True) / (n - 1)
    s_mean = jnp.mean(st, axis=0, keepdims=True)
    s_var = jnp.sum((st - s_mean) ** 2, axis=0, keepdims=True) / (n - 1)
    o_ref[0] = (quant - c_mean) * jax.lax.rsqrt(c_var + 1e-5) * jnp.sqrt(s_var + 1e-5) + s_mean


def transformer_stack(query, lq_feat, p):
    B, S, D = query.shape
    L = N_LAYERS

    def full(shape):
        return pl.BlockSpec(shape, lambda b: (0,) * len(shape))

    return pl.pallas_call(
        _tf_stack_kernel,
        out_shape=jax.ShapeDtypeStruct((B, S, C_LAT), jnp.float32),
        grid=(B,),
        in_specs=[pl.BlockSpec((1, S, D), lambda b: (b, 0, 0)),       # query
                  pl.BlockSpec((1, S, C_LAT), lambda b: (b, 0, 0)),   # lq_feat (AdaIN style)
                  full((S, D)),                                       # pos_emb
                  full((L, 4, D)),                                    # per-layer LN params
                  full((L, D, 4 * D)),                                # packed Wq|Wk|Wv|Wo
                  full((L, 1, 4 * D)),
                  full((L, D, FFN)),
                  full((L, 1, FFN)),
                  full((L, FFN, D)),
                  full((L, 1, D)),
                  full((2, D)),                                       # idx LayerNorm
                  full((D, CODEBOOK)),                                # idx Linear (no bias)
                  full((CODEBOOK, C_LAT))],                           # codebook
        out_specs=pl.BlockSpec((1, S, C_LAT), lambda b: (b, 0, 0)),
        compiler_params=pltpu.CompilerParams(dimension_semantics=("parallel",)),
    )(query, lq_feat, p["pos_emb"],
      p["tf_ln"], p["tf_wqkvo"].astype(jnp.bfloat16), p["tf_bqkvo"],
      p["tf_w1"].astype(jnp.bfloat16), p["tf_b1"],
      p["tf_w2"].astype(jnp.bfloat16), p["tf_b2"],
      p["idx_ln"], p["idx_w"].astype(jnp.bfloat16), p["codebook"])


# ----------------------------- JAX glue helpers -------------------------------
# TODO(synk): im2col / upsample2 are pure data movement left to XLA (fused into
#             neighbouring ops under jit); an in-kernel shifted-slice conv would
#             remove the HBM patch matrix at real scale.
def im2col(x, ksize=3, stride=1, pad=1, pad_value=0.0):
    """x: (B, H, W, C) NHWC -> (B*Ho*Wo, ksize*ksize*C) patch matrix."""
    B, H, W, C = x.shape
    xp = jnp.pad(x, ((0, 0), (pad, pad), (pad, pad), (0, 0)),
                 constant_values=pad_value)
    Ho = (H + 2 * pad - ksize) // stride + 1
    Wo = (W + 2 * pad - ksize) // stride + 1
    cols = []
    for di in range(ksize):
        for dj in range(ksize):
            cols.append(xp[:, di:di + stride * Ho:stride, dj:dj + stride * Wo:stride, :])
    col = jnp.concatenate(cols, axis=-1)
    return col.reshape(B * Ho * Wo, ksize * ksize * C), (B, Ho, Wo)


def upsample2(x):
    return jnp.repeat(jnp.repeat(x, 2, axis=1), 2, axis=2)


# ----------------------------- parameter init ---------------------------------
def init_params(key):
    keys = iter(jax.random.split(key, 64))

    def nrm(shape, scale=0.1):
        return (scale * jax.random.normal(next(keys), shape)).astype(jnp.float32)

    z = lambda n: jnp.zeros((n,), jnp.float32)
    o = lambda n: jnp.ones((n,), jnp.float32)

    p = {
        "enc1_w": nrm((3 * 3 * C_IN, C_ENC1)), "enc1_b": z(C_ENC1),
        "enc2_w": nrm((3 * 3 * C_ENC1, C_LAT)), "enc2_b": z(C_LAT),
        "feat_emb_w": nrm((C_LAT, DIM)), "feat_emb_b": z(DIM),
        "pos_emb": nrm((SEQ, DIM), 0.02),
        "idx_ln": jnp.stack([o(DIM), z(DIM)]),            # LayerNorm gamma, beta
        "idx_w": nrm((DIM, CODEBOOK)),                    # Linear(bias=False)
        "codebook": nrm((CODEBOOK, C_LAT), 1.0),
        "gen1_w": nrm((3 * 3 * C_LAT, C_ENC1)), "gen1_b": z(C_ENC1),
        "gen2_w": nrm((3 * 3 * C_ENC1, C_ENC1)), "gen2_b": z(C_ENC1),
        "gen3_w": nrm((3 * 3 * C_ENC1, C_IN)), "gen3_b": z(C_IN),
    }
    # per-layer transformer params, stacked along a leading layer axis so the
    # whole stack is one pallas_call
    ln, wqkvo, bqkvo, w1, b1, w2, b2 = [], [], [], [], [], [], []
    for _ in range(N_LAYERS):
        ln.append(jnp.stack([o(DIM), z(DIM), o(DIM), z(DIM)]))      # ln1_g, ln1_b, ln2_g, ln2_b
        wqkvo.append(nrm((DIM, 4 * DIM)))                           # packed Wq|Wk|Wv|Wo (32,128)
        bqkvo.append(jnp.zeros((1, 4 * DIM), jnp.float32))
        w1.append(nrm((DIM, FFN)))
        b1.append(jnp.zeros((1, FFN), jnp.float32))
        w2.append(nrm((FFN, DIM)))
        b2.append(jnp.zeros((1, DIM), jnp.float32))
    p["tf_ln"] = jnp.stack(ln)          # (L, 4, DIM)
    p["tf_wqkvo"] = jnp.stack(wqkvo)    # (L, DIM, 4*DIM)
    p["tf_bqkvo"] = jnp.stack(bqkvo)    # (L, 1, 4*DIM)
    p["tf_w1"] = jnp.stack(w1)          # (L, DIM, FFN)
    p["tf_b1"] = jnp.stack(b1)          # (L, 1, FFN)
    p["tf_w2"] = jnp.stack(w2)          # (L, FFN, DIM)
    p["tf_b2"] = jnp.stack(b2)          # (L, 1, DIM)
    return p


# ------------------------------- forward pass ----------------------------------
def codeformer_forward(img01_nchw, params, fidelity_weight=0.5):
    """img01_nchw: (B, 3, H, W) float32 in [0,1] (already-cropped aligned face).
    Returns restored image (B, 3, H, W) float32 in [0,1]."""
    B = img01_nchw.shape[0]
    x01 = jnp.transpose(img01_nchw, (0, 2, 3, 1))           # NCHW -> NHWC, still [0,1]

    # --- encoder conv1 (stride 2) with fused normalize(0.5,0.5) prologue:
    #     im2col pads with 0.5 so padded pixels map to 0 after 2x-1 (semantics of
    #     normalizing first, then zero-padded conv).
    col, (_, h, w_) = im2col(x01, stride=2, pad_value=0.5)   # 16 -> 8
    e1 = gemm(col, params["enc1_w"], params["enc1_b"],
              act="leaky", pre=(2.0, -1.0)).reshape(B, h, w_, C_ENC1)

    # --- encoder conv2 (stride 2) + feat_emb linear fused into one launch ---
    col, _ = im2col(e1, stride=2)                            # 8 -> 4
    lq2d, feat2d = enc2_and_embed(col, params)
    lq_feat = lq2d.reshape(B, SEQ, C_LAT)
    query = feat2d.reshape(B, SEQ, DIM)

    # --- transformer stack + head in ONE fused kernel (per-batch grid):
    #     N_LAYERS pre-norm blocks, then LayerNorm + Linear(bias=False) logits
    #     -> top-1 codebook lookup -> AdaIN against lq_feat (adain=True) ---
    quant = transformer_stack(query, lq_feat, params)
    xg = quant.reshape(B, LAT_HW, LAT_HW, C_LAT)

    # --- generator (simplified VQGAN decoder) with w-weighted fusion ---
    col, _ = im2col(xg, stride=1)
    g1 = gemm(col, params["gen1_w"], params["gen1_b"],
              act="leaky").reshape(B, LAT_HW, LAT_HW, C_ENC1)
    g1u = upsample2(g1)                                      # 4 -> 8
    # TODO(synk): real Fuse_sft_block predicts SFT scale/shift with convs;
    #             simplified to a w-weighted residual fuse, folded into the gen2
    #             GEMM prologue via linearity of im2col.
    col_x, _ = im2col(g1u, stride=1)
    col_e, _ = im2col(e1, stride=1)
    g2 = gemm(col_x, params["gen2_w"], params["gen2_b"], act="leaky",
              x2=col_e, add_w=float(fidelity_weight)).reshape(B, 2 * LAT_HW, 2 * LAT_HW, C_ENC1)
    g2u = upsample2(g2)                                      # 8 -> 16
    # --- gen3 with fused tensor2img(min_max=(-1,1)) epilogue: clamp -> [0,1] ---
    col, _ = im2col(g2u, stride=1)
    out = gemm(col, params["gen3_w"], params["gen3_b"],
               post=(-1.0, 1.0, 0.5, 0.5)).reshape(B, IMG, IMG, C_IN)
    return jnp.transpose(out, (0, 3, 1, 2))                  # NHWC -> NCHW


# ---------------------------------- main ---------------------------------------
if __name__ == "__main__":
    key = jax.random.PRNGKey(0)
    k_img, k_par = jax.random.split(key)
    # synthetic "cropped aligned face" batch, RGB, [0,1], NCHW (PyTorch convention)
    img = jax.random.uniform(k_img, (2, C_IN, IMG, IMG), dtype=jnp.float32)
    params = init_params(k_par)

    forward = jax.jit(codeformer_forward, static_argnames=("fidelity_weight",))
    out01 = forward(img, params, fidelity_weight=0.5)
    restored_uint8 = jnp.round(out01 * 255.0).astype(jnp.uint8)   # tensor2img -> uint8 face
    jax.block_until_ready(restored_uint8)
    assert restored_uint8.shape == (2, C_IN, IMG, IMG)
    print("KERNEL_OK")
</pallas_src>

<mosaic_0001>
module attributes {stable_mosaic.version = 11 : i64} {
  func.func @kernel(%arg0: i32, %arg1: memref<128x27xf32, #tpu.memory_space<vmem>>, %arg2: memref<27x8xbf16, #tpu.memory_space<vmem>>, %arg3: memref<1x8xf32, #tpu.memory_space<vmem>>, %arg4: memref<128x8xf32, #tpu.memory_space<vmem>>) attributes {dimension_semantics = [#tpu.dimension_semantics<parallel>], iteration_bounds = array<i64: 1>, scalar_prefetch = 0 : i64, scratch_operands = 0 : i64, tpu.core_type = #tpu.core_type<tc>, window_params = [{transform_indices = @transform_0, window_bounds = array<i64: 128, 27>}, {pipeline_mode = #tpu.pipeline_mode<synchronous>, transform_indices = @transform_1, window_bounds = array<i64: 27, 8>}, {pipeline_mode = #tpu.pipeline_mode<synchronous>, transform_indices = @transform_2, window_bounds = array<i64: 1, 8>}, {transform_indices = @transform_3, window_bounds = array<i64: 128, 8>}]} {
    %c0 = arith.constant 0 : index
    %c0_0 = arith.constant 0 : index
    %0 = vector.load %arg1[%c0, %c0_0] : memref<128x27xf32, #tpu.memory_space<vmem>>, vector<128x27xf32>
    %cst = arith.constant 2.000000e+00 : f32
    %1 = vector.broadcast %cst : f32 to vector<128x27xf32>
    %2 = arith.mulf %0, %1 : vector<128x27xf32>
    %cst_1 = arith.constant -1.000000e+00 : f32
    %3 = vector.broadcast %cst_1 : f32 to vector<128x27xf32>
    %4 = arith.addf %2, %3 : vector<128x27xf32>
    %5 = arith.truncf %4 : vector<128x27xf32> to vector<128x27xbf16>
    %c0_2 = arith.constant 0 : index
    %c0_3 = arith.constant 0 : index
    %6 = vector.load %arg2[%c0_2, %c0_3] : memref<27x8xbf16, #tpu.memory_space<vmem>>, vector<27x8xbf16>
    %cst_4 = arith.constant dense<0.000000e+00> : vector<128x8xf32>
    %7 = tpu.matmul %5, %6, %cst_4 {dimension_numbers = #tpu.dot_dimension_numbers<[1], [0], [0], [1], [0, 0, 1, 1], [], []>} : vector<128x27xbf16>, vector<27x8xbf16>, vector<128x8xf32> -> vector<128x8xf32>
    %c0_5 = arith.constant 0 : index
    %c0_6 = arith.constant 0 : index
    %8 = vector.load %arg3[%c0_5, %c0_6] : memref<1x8xf32, #tpu.memory_space<vmem>>, vector<1x8xf32>
    %9 = vector.broadcast %8 : vector<1x8xf32> to vector<128x8xf32>
    %10 = arith.addf %7, %9 : vector<128x8xf32>
    %cst_7 = arith.constant 0.000000e+00 : f32
    %11 = vector.broadcast %cst_7 : f32 to vector<128x8xf32>
    %12 = arith.cmpf oge, %10, %11 : vector<128x8xf32>
    %cst_8 = arith.constant 2.000000e-01 : f32
    %13 = vector.broadcast %cst_8 : f32 to vector<128x8xf32>
    %14 = arith.mulf %13, %10 : vector<128x8xf32>
    %15 = arith.select %12, %10, %14 : vector<128x8xi1>, vector<128x8xf32>
    %c0_9 = arith.constant 0 : index
    %c0_10 = arith.constant 0 : index
    %16 = vector.load %arg4[%c0_9, %c0_10] : memref<128x8xf32, #tpu.memory_space<vmem>>, vector<128x8xf32>
    tpu.vector_store %arg4[%c0_9, %c0_10], %15 {strides = array<i32>} : memref<128x8xf32, #tpu.memory_space<vmem>>, vector<128x8xf32>,
    return
  }
  func.func @transform_0(%arg0: i32) -> (i32, i32) {
    %c0_i32 = arith.constant 0 : i32
    %c0_i32_0 = arith.constant 0 : i32
    return %arg0, %c0_i32 : i32, i32
  }
  func.func @transform_1(%arg0: i32) -> (i32, i32) {
    %c0_i32 = arith.constant 0 : i32
    %c0_i32_0 = arith.constant 0 : i32
    %c0_i32_1 = arith.constant 0 : i32
    return %c0_i32, %c0_i32_0 : i32, i32
  }
  func.func @transform_2(%arg0: i32) -> (i32, i32) {
    %c0_i32 = arith.constant 0 : i32
    %c0_i32_0 = arith.constant 0 : i32
    %c0_i32_1 = arith.constant 0 : i32
    return %c0_i32, %c0_i32_0 : i32, i32
  }
  func.func @transform_3(%arg0: i32) -> (i32, i32) {
    %c0_i32 = arith.constant 0 : i32
    %c0_i32_0 = arith.constant 0 : i32
    return %arg0, %c0_i32 : i32, i32
  }
}

module attributes {stable_mosaic.version = 11 : i64} {
  func.func @_enc2_kernel(%arg0: i32, %arg1: memref<32x72xf32, #tpu.memory_space<vmem>>, %arg2: memref<72x16xbf16, #tpu.memory_space<vmem>>, %arg3: memref<1x16xf32, #tpu.memory_space<vmem>>, %arg4: memref<16x32xbf16, #tpu.memory_space<vmem>>, %arg5: memref<1x32xf32, #tpu.memory_space<vmem>>, %arg6: memref<32x16xf32, #tpu.memory_space<vmem>>, %arg7: memref<32x32xf32, #tpu.memory_space<vmem>>) attributes {dimension_semantics = [#tpu.dimension_semantics<arbitrary>], iteration_bounds = array<i64: 1>, scalar_prefetch = 0 : i64, scratch_operands = 0 : i64, tpu.core_type = #tpu.core_type<tc>, window_params = [{pipeline_mode = #tpu.pipeline_mode<synchronous>, transform_indices = @transform_0, window_bounds = array<i64: 32, 72>}, {pipeline_mode = #tpu.pipeline_mode<synchronous>, transform_indices = @transform_1, window_bounds = array<i64: 72, 16>}, {pipeline_mode = #tpu.pipeline_mode<synchronous>, transform_indices = @transform_2, window_bounds = array<i64: 1, 16>}, {pipeline_mode = #tpu.pipeline_mode<synchronous>, transform_indices = @transform_3, window_bounds = array<i64: 16, 32>}, {pipeline_mode = #tpu.pipeline_mode<synchronous>, transform_indices = @transform_4, window_bounds = array<i64: 1, 32>}, {pipeline_mode = #tpu.pipeline_mode<synchronous>, transform_indices = @transform_5, window_bounds = array<i64: 32, 16>}, {pipeline_mode = #tpu.pipeline_mode<synchronous>, transform_indices = @transform_6, window_bounds = array<i64: 32, 32>}]} {
    %c0 = arith.constant 0 : index
    %c0_0 = arith.constant 0 : index
    %0 = vector.load %arg1[%c0, %c0_0] : memref<32x72xf32, #tpu.memory_space<vmem>>, vector<32x72xf32>
    %1 = arith.truncf %0 : vector<32x72xf32> to vector<32x72xbf16>
    %c0_1 = arith.constant 0 : index
    %c0_2 = arith.constant 0 : index
    %2 = vector.load %arg2[%c0_1, %c0_2] : memref<72x16xbf16, #tpu.memory_space<vmem>>, vector<72x16xbf16>
    %cst = arith.constant dense<0.000000e+00> : vector<32x16xf32>
    %3 = tpu.matmul %1, %2, %cst {dimension_numbers = #tpu.dot_dimension_numbers<[1], [0], [0], [1], [0, 0, 1, 1], [], []>} : vector<32x72xbf16>, vector<72x16xbf16>, vector<32x16xf32> -> vector<32x16xf32>
    %c0_3 = arith.constant 0 : index
    %c0_4 = arith.constant 0 : index
    %4 = vector.load %arg3[%c0_3, %c0_4] : memref<1x16xf32, #tpu.memory_space<vmem>>, vector<1x16xf32>
    %5 = vector.broadcast %4 : vector<1x16xf32> to vector<32x16xf32>
    %6 = arith.addf %3, %5 : vector<32x16xf32>
    %cst_5 = arith.constant 0.000000e+00 : f32
    %7 = vector.broadcast %cst_5 : f32 to vector<32x16xf32>
    %8 = arith.cmpf oge, %6, %7 : vector<32x16xf32>
    %cst_6 = arith.constant 2.000000e-01 : f32
    %9 = vector.broadcast %cst_6 : f32 to vector<32x16xf32>
    %10 = arith.mulf %9, %6 : vector<32x16xf32>
    %11 = arith.select %8, %6, %10 : vector<32x16xi1>, vector<32x16xf32>
    %c0_7 = arith.constant 0 : index
    %c0_8 = arith.constant 0 : index
    %12 = vector.load %arg6[%c0_7, %c0_8] : memref<32x16xf32, #tpu.memory_space<vmem>>, vector<32x16xf32>
    tpu.vector_store %arg6[%c0_7, %c0_8], %11 {strides = array<i32>} : memref<32x16xf32, #tpu.memory_space<vmem>>, vector<32x16xf32>,
    %13 = arith.truncf %11 : vector<32x16xf32> to vector<32x16xbf16>
    %c0_9 = arith.constant 0 : index
    %c0_10 = arith.constant 0 : index
    %14 = vector.load %arg4[%c0_9, %c0_10] : memref<16x32xbf16, #tpu.memory_space<vmem>>, vector<16x32xbf16>
    %cst_11 = arith.constant dense<0.000000e+00> : vector<32x32xf32>
    %15 = tpu.matmul %13, %14, %cst_11 {dimension_numbers = #tpu.dot_dimension_numbers<[1], [0], [0], [1], [0, 0, 1, 1], [], []>} : vector<32x16xbf16>, vector<16x32xbf16>, vector<32x32xf32> -> vector<32x32xf32>
    %c0_12 = arith.constant 0 : index
    %c0_13 = arith.constant 0 : index
    %16 = vector.load %arg5[%c0_12, %c0_13] : memref<1x32xf32, #tpu.memory_space<vmem>>, vector<1x32xf32>
    %17 = vector.broadcast %16 : vector<1x32xf32> to vector<32x32xf32>
    %18 = arith.addf %15, %17 : vector<32x32xf32>
    %c0_14 = arith.constant 0 : index
    %c0_15 = arith.constant 0 : index
    %19 = vector.load %arg7[%c0_14, %c0_15] : memref<32x32xf32, #tpu.memory_space<vmem>>, vector<32x32xf32>
    tpu.vector_store %arg7[%c0_14, %c0_15], %18 {strides = array<i32>} : memref<32x32xf32, #tpu.memory_space<vmem>>, vector<32x32xf32>,
    return
  }
  func.func @transform_0(%arg0: i32) -> (i32, i32) {
    %c0_i32 = arith.constant 0 : i32
    %c0_i32_0 = arith.constant 0 : i32
    %c0_i32_1 = arith.constant 0 : i32
    return %c0_i32, %c0_i32_0 : i32, i32
  }
  func.func @transform_1(%arg0: i32) -> (i32, i32) {
    %c0_i32 = arith.constant 0 : i32
    %c0_i32_0 = arith.constant 0 : i32
    %c0_i32_1 = arith.constant 0 : i32
    return %c0_i32, %c0_i32_0 : i32, i32
  }
  func.func @transform_2(%arg0: i32) -> (i32, i32) {
    %c0_i32 = arith.constant 0 : i32
    %c0_i32_0 = arith.constant 0 : i32
    %c0_i32_1 = arith.constant 0 : i32
    return %c0_i32, %c0_i32_0 : i32, i32
  }
  func.func @transform_3(%arg0: i32) -> (i32, i32) {
    %c0_i32 = arith.constant 0 : i32
    %c0_i32_0 = arith.constant 0 : i32
    %c0_i32_1 = arith.constant 0 : i32
    return %c0_i32, %c0_i32_0 : i32, i32
  }
  func.func @transform_4(%arg0: i32) -> (i32, i32) {
    %c0_i32 = arith.constant 0 : i32
    %c0_i32_0 = arith.constant 0 : i32
    %c0_i32_1 = arith.constant 0 : i32
    return %c0_i32, %c0_i32_0 : i32, i32
  }
  func.func @transform_5(%arg0: i32) -> (i32, i32) {
    %c0_i32 = arith.constant 0 : i32
    %c0_i32_0 = arith.constant 0 : i32
    %c0_i32_1 = arith.constant 0 : i32
    return %c0_i32, %c0_i32_0 : i32, i32
  }
  func.func @transform_6(%arg0: i32) -> (i32, i32) {
    %c0_i32 = arith.constant 0 : i32
    %c0_i32_0 = arith.constant 0 : i32
    %c0_i32_1 = arith.constant 0 : i32
    return %c0_i32, %c0_i32_0 : i32, i32
  }
}

module attributes {stable_mosaic.version = 11 : i64} {
  func.func @_tf_stack_kernel(%arg0: i32, %arg1: memref<1x16x32xf32, #tpu.memory_space<vmem>>, %arg2: memref<1x16x16xf32, #tpu.memory_space<vmem>>, %arg3: memref<16x32xf32, #tpu.memory_space<vmem>>, %arg4: memref<2x4x32xf32, #tpu.memory_space<vmem>>, %arg5: memref<2x32x128xbf16, #tpu.memory_space<vmem>>, %arg6: memref<2x1x128xf32, #tpu.memory_space<vmem>>, %arg7: memref<2x32x64xbf16, #tpu.memory_space<vmem>>, %arg8: memref<2x1x64xf32, #tpu.memory_space<vmem>>, %arg9: memref<2x64x32xbf16, #tpu.memory_space<vmem>>, %arg10: memref<2x1x32xf32, #tpu.memory_space<vmem>>, %arg11: memref<2x32xf32, #tpu.memory_space<vmem>>, %arg12: memref<32x64xbf16, #tpu.memory_space<vmem>>, %arg13: memref<64x16xf32, #tpu.memory_space<vmem>>, %arg14: memref<1x16x16xf32, #tpu.memory_space<vmem>>) attributes {dimension_semantics = [#tpu.dimension_semantics<parallel>], iteration_bounds = array<i64: 2>, scalar_prefetch = 0 : i64, scratch_operands = 0 : i64, tpu.core_type = #tpu.core_type<tc>, window_params = [{transform_indices = @transform_0, window_bounds = array<i64: 1, 16, 32>}, {transform_indices = @transform_1, window_bounds = array<i64: 1, 16, 16>}, {pipeline_mode = #tpu.pipeline_mode<synchronous>, transform_indices = @transform_2, window_bounds = array<i64: 16, 32>}, {pipeline_mode = #tpu.pipeline_mode<synchronous>, transform_indices = @transform_3, window_bounds = array<i64: 2, 4, 32>}, {pipeline_mode = #tpu.pipeline_mode<synchronous>, transform_indices = @transform_4, window_bounds = array<i64: 2, 32, 128>}, {pipeline_mode = #tpu.pipeline_mode<synchronous>, transform_indices = @transform_5, window_bounds = array<i64: 2, 1, 128>}, {pipeline_mode = #tpu.pipeline_mode<synchronous>, transform_indices = @transform_6, window_bounds = array<i64: 2, 32, 64>}, {pipeline_mode = #tpu.pipeline_mode<synchronous>, transform_indices = @transform_7, window_bounds = array<i64: 2, 1, 64>}, {pipeline_mode = #tpu.pipeline_mode<synchronous>, transform_indices = @transform_8, window_bounds = array<i64: 2, 64, 32>}, {pipeline_mode = #tpu.pipeline_mode<synchronous>, transform_indices = @transform_9, window_bounds = array<i64: 2, 1, 32>}, {pipeline_mode = #tpu.pipeline_mode<synchronous>, transform_indices = @transform_10, window_bounds = array<i64: 2, 32>}, {pipeline_mode = #tpu.pipeline_mode<synchronous>, transform_indices = @transform_11, window_bounds = array<i64: 32, 64>}, {pipeline_mode = #tpu.pipeline_mode<synchronous>, transform_indices = @transform_12, window_bounds = array<i64: 64, 16>}, {transform_indices = @transform_13, window_bounds = array<i64: 1, 16, 16>}]} {
    %c0 = arith.constant 0 : index
    %c0_0 = arith.constant 0 : index
    %c0_1 = arith.constant 0 : index
    %0 = vector.load %arg1[%c0, %c0_0, %c0_1] : memref<1x16x32xf32, #tpu.memory_space<vmem>>, vector<1x16x32xf32>
    %1 = vector.shape_cast %0 : vector<1x16x32xf32> to vector<16x32xf32>
    %c0_2 = arith.constant 0 : index
    %c0_3 = arith.constant 0 : index
    %2 = vector.load %arg3[%c0_2, %c0_3] : memref<16x32xf32, #tpu.memory_space<vmem>>, vector<16x32xf32>
    %c0_4 = arith.constant 0 : index
    %c0_5 = arith.constant 0 : index
    %c0_6 = arith.constant 0 : index
    %3 = vector.load %arg4[%c0_4, %c0_5, %c0_6] : memref<2x4x32xf32, #tpu.memory_space<vmem>>, vector<1x4x32xf32>
    %4 = vector.shape_cast %3 : vector<1x4x32xf32> to vector<4x32xf32>
    %c0_7 = arith.constant 0 : index
    %c0_8 = arith.constant 0 : index
    %c0_9 = arith.constant 0 : index
    %5 = vector.load %arg5[%c0_7, %c0_8, %c0_9] : memref<2x32x128xbf16, #tpu.memory_space<vmem>>, vector<1x32x128xbf16>
    %6 = vector.shape_cast %5 : vector<1x32x128xbf16> to vector<32x128xbf16>
    %c0_10 = arith.constant 0 : index
    %c0_11 = arith.constant 0 : index
    %c0_12 = arith.constant 0 : index
    %7 = vector.load %arg6[%c0_10, %c0_11, %c0_12] : memref<2x1x128xf32, #tpu.memory_space<vmem>>, vector<1x1x128xf32>
    %8 = vector.shape_cast %7 : vector<1x1x128xf32> to vector<1x128xf32>
    %9 = vector.extract_strided_slice %4 {offsets = [0, 0], sizes = [1, 32], strides = [1, 1]} : vector<4x32xf32> to vector<1x32xf32>
    %10 = vector.extract_strided_slice %4 {offsets = [1, 0], sizes = [1, 32], strides = [1, 1]} : vector<4x32xf32> to vector<1x32xf32>
    %cst = arith.constant dense<0.000000e+00> : vector<16xf32>
    %11 = vector.multi_reduction <add>, %1, %cst [1] : vector<16x32xf32> to vector<16xf32>
    %12 = vector.shape_cast %11 : vector<16xf32> to vector<16x1xf32>
    %cst_13 = arith.constant 3.200000e+01 : f32
    %13 = vector.broadcast %cst_13 : f32 to vector<16x1xf32>
    %14 = arith.divf %12, %13 : vector<16x1xf32>
    %15 = vector.broadcast %14 : vector<16x1xf32> to vector<16x32xf32>
    %16 = arith.subf %1, %15 : vector<16x32xf32>
    %17 = arith.mulf %16, %16 : vector<16x32xf32>
    %cst_14 = arith.constant dense<0.000000e+00> : vector<16xf32>
    %18 = vector.multi_reduction <add>, %17, %cst_14 [1] : vector<16x32xf32> to vector<16xf32>
    %19 = vector.shape_cast %18 : vector<16xf32> to vector<16x1xf32>
    %cst_15 = arith.constant 3.200000e+01 : f32
    %20 = vector.broadcast %cst_15 : f32 to vector<16x1xf32>
    %21 = arith.divf %19, %20 : vector<16x1xf32>
    %22 = vector.broadcast %14 : vector<16x1xf32> to vector<16x32xf32>
    %23 = arith.subf %1, %22 : vector<16x32xf32>
    %cst_16 = arith.constant 9.99999974E-6 : f32
    %24 = vector.broadcast %cst_16 : f32 to vector<16x1xf32>
    %25 = arith.addf %21, %24 : vector<16x1xf32>
    %26 = math.rsqrt %25 : vector<16x1xf32>
    %27 = vector.broadcast %26 : vector<16x1xf32> to vector<16x32xf32>
    %28 = arith.mulf %23, %27 : vector<16x32xf32>
    %29 = vector.broadcast %9 : vector<1x32xf32> to vector<16x32xf32>
    %30 = arith.mulf %28, %29 : vector<16x32xf32>
    %31 = vector.broadcast %10 : vector<1x32xf32> to vector<16x32xf32>
    %32 = arith.addf %30, %31 : vector<16x32xf32>
    %33 = arith.addf %32, %2 : vector<16x32xf32>
    %34 = arith.truncf %33 : vector<16x32xf32> to vector<16x32xbf16>
    %35 = arith.truncf %32 : vector<16x32xf32> to vector<16x32xbf16>
    %36 = vector.extract_strided_slice %6 {offsets = [0, 0], sizes = [32, 32], strides = [1, 1]} : vector<32x128xbf16> to vector<32x32xbf16>
    %cst_17 = arith.constant dense<0.000000e+00> : vector<16x32xf32>
    %37 = tpu.matmul %34, %36, %cst_17 {dimension_numbers = #tpu.dot_dimension_numbers<[1], [0], [0], [1], [0, 0, 1, 1], [], []>} : vector<16x32xbf16>, vector<32x32xbf16>, vector<16x32xf32> -> vector<16x32xf32>
    %38 = vector.extract_strided_slice %8 {offsets = [0, 0], sizes = [1, 32], strides = [1, 1]} : vector<1x128xf32> to vector<1x32xf32>
    %39 = vector.broadcast %38 : vector<1x32xf32> to vector<16x32xf32>
    %40 = arith.addf %37, %39 : vector<16x32xf32>
    %41 = vector.extract_strided_slice %6 {offsets = [0, 32], sizes = [32, 32], strides = [1, 1]} : vector<32x128xbf16> to vector<32x32xbf16>
    %cst_18 = arith.constant dense<0.000000e+00> : vector<16x32xf32>
    %42 = tpu.matmul %34, %41, %cst_18 {dimension_numbers = #tpu.dot_dimension_numbers<[1], [0], [0], [1], [0, 0, 1, 1], [], []>} : vector<16x32xbf16>, vector<32x32xbf16>, vector<16x32xf32> -> vector<16x32xf32>
    %43 = vector.extract_strided_slice %8 {offsets = [0, 32], sizes = [1, 32], strides = [1, 1]} : vector<1x128xf32> to vector<1x32xf32>
    %44 = vector.broadcast %43 : vector<1x32xf32> to vector<16x32xf32>
    %45 = arith.addf %42, %44 : vector<16x32xf32>
    %46 = vector.extract_strided_slice %6 {offsets = [0, 64], sizes = [32, 32], strides = [1, 1]} : vector<32x128xbf16> to vector<32x32xbf16>
    %cst_19 = arith.constant dense<0.000000e+00> : vector<16x32xf32>
    %47 = tpu.matmul %35, %46, %cst_19 {dimension_numbers = #tpu.dot_dimension_numbers<[1], [0], [0], [1], [0, 0, 1, 1], [], []>} : vector<16x32xbf16>, vector<32x32xbf16>, vector<16x32xf32> -> vector<16x32xf32>
    %48 = vector.extract_strided_slice %8 {offsets = [0, 64], sizes = [1, 32], strides = [1, 1]} : vector<1x128xf32> to vector<1x32xf32>
    %49 = vector.broadcast %48 : vector<1x32xf32> to vector<16x32xf32>
    %50 = arith.addf %47, %49 : vector<16x32xf32>
    %51 = vector.extract_strided_slice %40 {offsets = [0, 0], sizes = [16, 8], strides = [1, 1]} : vector<16x32xf32> to vector<16x8xf32>
    %52 = arith.truncf %51 : vector<16x8xf32> to vector<16x8xbf16>
    %53 = vector.extract_strided_slice %45 {offsets = [0, 0], sizes = [16, 8], strides = [1, 1]} : vector<16x32xf32> to vector<16x8xf32>
    %54 = arith.truncf %53 : vector<16x8xf32> to vector<16x8xbf16>
    %55 = vector.extract_strided_slice %50 {offsets = [0, 0], sizes = [16, 8], strides = [1, 1]} : vector<16x32xf32> to vector<16x8xf32>
    %56 = arith.truncf %55 : vector<16x8xf32> to vector<16x8xbf16>
    %cst_20 = arith.constant dense<0.000000e+00> : vector<16x16xf32>
    %57 = tpu.matmul %52, %54, %cst_20 {dimension_numbers = #tpu.dot_dimension_numbers<[1], [1], [0], [0], [0, 0, 1, 0], [], []>} : vector<16x8xbf16>, vector<16x8xbf16>, vector<16x16xf32> -> vector<16x16xf32>
    %cst_21 = arith.constant 0.353553385 : f32
    %58 = vector.broadcast %cst_21 : f32 to vector<16x16xf32>
    %59 = arith.mulf %57, %58 : vector<16x16xf32>
    %cst_22 = arith.constant dense<0xFF800000> : vector<16xf32>
    %60 = vector.multi_reduction <maximumf>, %59, %cst_22 [1] : vector<16x16xf32> to vector<16xf32>
    %61 = vector.shape_cast %60 : vector<16xf32> to vector<16x1xf32>
    %62 = vector.broadcast %61 : vector<16x1xf32> to vector<16x16xf32>
    %63 = arith.subf %59, %62 : vector<16x16xf32>
    %64 = math.exp %63 : vector<16x16xf32>
    %cst_23 = arith.constant dense<0.000000e+00> : vector<16xf32>
    %65 = vector.multi_reduction <add>, %64, %cst_23 [1] : vector<16x16xf32> to vector<16xf32>
    %66 = vector.shape_cast %65 : vector<16xf32> to vector<16x1xf32>
    %67 = tpu.reciprocal %66 {approx = true} : vector<16x1xf32> -> vector<16x1xf32>
    %68 = vector.broadcast %67 : vector<16x1xf32> to vector<16x16xf32>
    %69 = arith.mulf %64, %68 : vector<16x16xf32>
    %70 = arith.truncf %69 : vector<16x16xf32> to vector<16x16xbf16>
    %cst_24 = arith.constant dense<0.000000e+00> : vector<16x8xf32>
    %71 = tpu.matmul %70, %56, %cst_24 {dimension_numbers = #tpu.dot_dimension_numbers<[1], [0], [0], [1], [0, 0, 1, 1], [], []>} : vector<16x16xbf16>, vector<16x8xbf16>, vector<16x8xf32> -> vector<16x8xf32>
    %72 = vector.extract_strided_slice %40 {offsets = [0, 8], sizes = [16, 8], strides = [1, 1]} : vector<16x32xf32> to vector<16x8xf32>
    %73 = arith.truncf %72 : vector<16x8xf32> to vector<16x8xbf16>
    %74 = vector.extract_strided_slice %45 {offsets = [0, 8], sizes = [16, 8], strides = [1, 1]} : vector<16x32xf32> to vector<16x8xf32>
    %75 = arith.truncf %74 : vector<16x8xf32> to vector<16x8xbf16>
    %76 = vector.extract_strided_slice %50 {offsets = [0, 8], sizes = [16, 8], strides = [1, 1]} : vector<16x32xf32> to vector<16x8xf32>
    %77 = arith.truncf %76 : vector<16x8xf32> to vector<16x8xbf16>
    %cst_25 = arith.constant dense<0.000000e+00> : vector<16x16xf32>
    %78 = tpu.matmul %73, %75, %cst_25 {dimension_numbers = #tpu.dot_dimension_numbers<[1], [1], [0], [0], [0, 0, 1, 0], [], []>} : vector<16x8xbf16>, vector<16x8xbf16>, vector<16x16xf32> -> vector<16x16xf32>
    %cst_26 = arith.constant 0.353553385 : f32
    %79 = vector.broadcast %cst_26 : f32 to vector<16x16xf32>
    %80 = arith.mulf %78, %79 : vector<16x16xf32>
    %cst_27 = arith.constant dense<0xFF800000> : vector<16xf32>
    %81 = vector.multi_reduction <maximumf>, %80, %cst_27 [1] : vector<16x16xf32> to vector<16xf32>
    %82 = vector.shape_cast %81 : vector<16xf32> to vector<16x1xf32>
    %83 = vector.broadcast %82 : vector<16x1xf32> to vector<16x16xf32>
    %84 = arith.subf %80, %83 : vector<16x16xf32>
    %85 = math.exp %84 : vector<16x16xf32>
    %cst_28 = arith.constant dense<0.000000e+00> : vector<16xf32>
    %86 = vector.multi_reduction <add>, %85, %cst_28 [1] : vector<16x16xf32> to vector<16xf32>
    %87 = vector.shape_cast %86 : vector<16xf32> to vector<16x1xf32>
    %88 = tpu.reciprocal %87 {approx = true} : vector<16x1xf32> -> vector<16x1xf32>
    %89 = vector.broadcast %88 : vector<16x1xf32> to vector<16x16xf32>
    %90 = arith.mulf %85, %89 : vector<16x16xf32>
    %91 = arith.truncf %90 : vector<16x16xf32> to vector<16x16xbf16>
    %cst_29 = arith.constant dense<0.000000e+00> : vector<16x8xf32>
    %92 = tpu.matmul %91, %77, %cst_29 {dimension_numbers = #tpu.dot_dimension_numbers<[1], [0], [0], [1], [0, 0, 1, 1], [], []>} : vector<16x16xbf16>, vector<16x8xbf16>, vector<16x8xf32> -> vector<16x8xf32>
    %93 = vector.extract_strided_slice %40 {offsets = [0, 16], sizes = [16, 8], strides = [1, 1]} : vector<16x32xf32> to vector<16x8xf32>
    %94 = arith.truncf %93 : vector<16x8xf32> to vector<16x8xbf16>
    %95 = vector.extract_strided_slice %45 {offsets = [0, 16], sizes = [16, 8], strides = [1, 1]} : vector<16x32xf32> to vector<16x8xf32>
    %96 = arith.truncf %95 : vector<16x8xf32> to vector<16x8xbf16>
    %97 = vector.extract_strided_slice %50 {offsets = [0, 16], sizes = [16, 8], strides = [1, 1]} : vector<16x32xf32> to vector<16x8xf32>
    %98 = arith.truncf %97 : vector<16x8xf32> to vector<16x8xbf16>
    %cst_30 = arith.constant dense<0.000000e+00> : vector<16x16xf32>
    %99 = tpu.matmul %94, %96, %cst_30 {dimension_numbers = #tpu.dot_dimension_numbers<[1], [1], [0], [0], [0, 0, 1, 0], [], []>} : vector<16x8xbf16>, vector<16x8xbf16>, vector<16x16xf32> -> vector<16x16xf32>
    %cst_31 = arith.constant 0.353553385 : f32
    %100 = vector.broadcast %cst_31 : f32 to vector<16x16xf32>
    %101 = arith.mulf %99, %100 : vector<16x16xf32>
    %cst_32 = arith.constant dense<0xFF800000> : vector<16xf32>
    %102 = vector.multi_reduction <maximumf>, %101, %cst_32 [1] : vector<16x16xf32> to vector<16xf32>
    %103 = vector.shape_cast %102 : vector<16xf32> to vector<16x1xf32>
    %104 = vector.broadcast %103 : vector<16x1xf32> to vector<16x16xf32>
    %105 = arith.subf %101, %104 : vector<16x16xf32>
    %106 = math.exp %105 : vector<16x16xf32>
    %cst_33 = arith.constant dense<0.000000e+00> : vector<16xf32>
    %107 = vector.multi_reduction <add>, %106, %cst_33 [1] : vector<16x16xf32> to vector<16xf32>
    %108 = vector.shape_cast %107 : vector<16xf32> to vector<16x1xf32>
    %109 = tpu.reciprocal %108 {approx = true} : vector<16x1xf32> -> vector<16x1xf32>
    %110 = vector.broadcast %109 : vector<16x1xf32> to vector<16x16xf32>
    %111 = arith.mulf %106, %110 : vector<16x16xf32>
    %112 = arith.truncf %111 : vector<16x16xf32> to vector<16x16xbf16>
    %cst_34 = arith.constant dense<0.000000e+00> : vector<16x8xf32>
    %113 = tpu.matmul %112, %98, %cst_34 {dimension_numbers = #tpu.dot_dimension_numbers<[1], [0], [0], [1], [0, 0, 1, 1], [], []>} : vector<16x16xbf16>, vector<16x8xbf16>, vector<16x8xf32> -> vector<16x8xf32>
    %114 = vector.extract_strided_slice %40 {offsets = [0, 24], sizes = [16, 8], strides = [1, 1]} : vector<16x32xf32> to vector<16x8xf32>
    %115 = arith.truncf %114 : vector<16x8xf32> to vector<16x8xbf16>
    %116 = vector.extract_strided_slice %45 {offsets = [0, 24], sizes = [16, 8], strides = [1, 1]} : vector<16x32xf32> to vector<16x8xf32>
    %117 = arith.truncf %116 : vector<16x8xf32> to vector<16x8xbf16>
    %118 = vector.extract_strided_slice %50 {offsets = [0, 24], sizes = [16, 8], strides = [1, 1]} : vector<16x32xf32> to vector<16x8xf32>
    %119 = arith.truncf %118 : vector<16x8xf32> to vector<16x8xbf16>
    %cst_35 = arith.constant dense<0.000000e+00> : vector<16x16xf32>
    %120 = tpu.matmul %115, %117, %cst_35 {dimension_numbers = #tpu.dot_dimension_numbers<[1], [1], [0], [0], [0, 0, 1, 0], [], []>} : vector<16x8xbf16>, vector<16x8xbf16>, vector<16x16xf32> -> vector<16x16xf32>
    %cst_36 = arith.constant 0.353553385 : f32
    %121 = vector.broadcast %cst_36 : f32 to vector<16x16xf32>
    %122 = arith.mulf %120, %121 : vector<16x16xf32>
    %cst_37 = arith.constant dense<0xFF800000> : vector<16xf32>
    %123 = vector.multi_reduction <maximumf>, %122, %cst_37 [1] : vector<16x16xf32> to vector<16xf32>
    %124 = vector.shape_cast %123 : vector<16xf32> to vector<16x1xf32>
    %125 = vector.broadcast %124 : vector<16x1xf32> to vector<16x16xf32>
    %126 = arith.subf %122, %125 : vector<16x16xf32>
    %127 = math.exp %126 : vector<16x16xf32>
    %cst_38 = arith.constant dense<0.000000e+00> : vector<16xf32>
    %128 = vector.multi_reduction <add>, %127, %cst_38 [1] : vector<16x16xf32> to vector<16xf32>
    %129 = vector.shape_cast %128 : vector<16xf32> to vector<16x1xf32>
    %130 = tpu.reciprocal %129 {approx = true} : vector<16x1xf32> -> vector<16x1xf32>
    %131 = vector.broadcast %130 : vector<16x1xf32> to vector<16x16xf32>
    %132 = arith.mulf %127, %131 : vector<16x16xf32>
    %133 = arith.truncf %132 : vector<16x16xf32> to vector<16x16xbf16>
    %cst_39 = arith.constant dense<0.000000e+00> : vector<16x8xf32>
    %134 = tpu.matmul %133, %119, %cst_39 {dimension_numbers = #tpu.dot_dimension_numbers<[1], [0], [0], [1], [0, 0, 1, 1], [], []>} : vector<16x16xbf16>, vector<16x8xbf16>, vector<16x8xf32> -> vector<16x8xf32>
    %135 = tpu.concatenate %71, %92, %113, %134 in 1 : vector<16x8xf32>, vector<16x8xf32>, vector<16x8xf32>, vector<16x8xf32> -> vector<16x32xf32>
    %136 = arith.truncf %135 : vector<16x32xf32> to vector<16x32xbf16>
    %137 = vector.extract_strided_slice %6 {offsets = [0, 96], sizes = [32, 32], strides = [1, 1]} : vector<32x128xbf16> to vector<32x32xbf16>
    %cst_40 = arith.constant dense<0.000000e+00> : vector<16x32xf32>
    %138 = tpu.matmul %136, %137, %cst_40 {dimension_numbers = #tpu.dot_dimension_numbers<[1], [0], [0], [1], [0, 0, 1, 1], [], []>} : vector<16x32xbf16>, vector<32x32xbf16>, vector<16x32xf32> -> vector<16x32xf32>
    %139 = vector.extract_strided_slice %8 {offsets = [0, 96], sizes = [1, 32], strides = [1, 1]} : vector<1x128xf32> to vector<1x32xf32>
    %140 = vector.broadcast %139 : vector<1x32xf32> to vector<16x32xf32>
    %141 = arith.addf %138, %140 : vector<16x32xf32>
    %142 = arith.addf %1, %141 : vector<16x32xf32>
    %143 = vector.extract_strided_slice %4 {offsets = [2, 0], sizes = [1, 32], strides = [1, 1]} : vector<4x32xf32> to vector<1x32xf32>
    %144 = vector.extract_strided_slice %4 {offsets = [3, 0], sizes = [1, 32], strides = [1, 1]} : vector<4x32xf32> to vector<1x32xf32>
    %cst_41 = arith.constant dense<0.000000e+00> : vector<16xf32>
    %145 = vector.multi_reduction <add>, %142, %cst_41 [1] : vector<16x32xf32> to vector<16xf32>
    %146 = vector.shape_cast %145 : vector<16xf32> to vector<16x1xf32>
    %cst_42 = arith.constant 3.200000e+01 : f32
    %147 = vector.broadcast %cst_42 : f32 to vector<16x1xf32>
    %148 = arith.divf %146, %147 : vector<16x1xf32>
    %149 = vector.broadcast %148 : vector<16x1xf32> to vector<16x32xf32>
    %150 = arith.subf %142, %149 : vector<16x32xf32>
    %151 = arith.mulf %150, %150 : vector<16x32xf32>
    %cst_43 = arith.constant dense<0.000000e+00> : vector<16xf32>
    %152 = vector.multi_reduction <add>, %151, %cst_43 [1] : vector<16x32xf32> to vector<16xf32>
    %153 = vector.shape_cast %152 : vector<16xf32> to vector<16x1xf32>
    %cst_44 = arith.constant 3.200000e+01 : f32
    %154 = vector.broadcast %cst_44 : f32 to vector<16x1xf32>
    %155 = arith.divf %153, %154 : vector<16x1xf32>
    %156 = vector.broadcast %148 : vector<16x1xf32> to vector<16x32xf32>
    %157 = arith.subf %142, %156 : vector<16x32xf32>
    %cst_45 = arith.constant 9.99999974E-6 : f32
    %158 = vector.broadcast %cst_45 : f32 to vector<16x1xf32>
    %159 = arith.addf %155, %158 : vector<16x1xf32>
    %160 = math.rsqrt %159 : vector<16x1xf32>
    %161 = vector.broadcast %160 : vector<16x1xf32> to vector<16x32xf32>
    %162 = arith.mulf %157, %161 : vector<16x32xf32>
    %163 = vector.broadcast %143 : vector<1x32xf32> to vector<16x32xf32>
    %164 = arith.mulf %162, %163 : vector<16x32xf32>
    %165 = vector.broadcast %144 : vector<1x32xf32> to vector<16x32xf32>
    %166 = arith.addf %164, %165 : vector<16x32xf32>
    %167 = arith.truncf %166 : vector<16x32xf32> to vector<16x32xbf16>
    %c0_46 = arith.constant 0 : index
    %c0_47 = arith.constant 0 : index
    %c0_48 = arith.constant 0 : index
    %168 = vector.load %arg7[%c0_46, %c0_47, %c0_48] : memref<2x32x64xbf16, #tpu.memory_space<vmem>>, vector<1x32x64xbf16>
    %169 = vector.shape_cast %168 : vector<1x32x64xbf16> to vector<32x64xbf16>
    %cst_49 = arith.constant dense<0.000000e+00> : vector<16x64xf32>
    %170 = tpu.matmul %167, %169, %cst_49 {dimension_numbers = #tpu.dot_dimension_numbers<[1], [0], [0], [1], [0, 0, 1, 1], [], []>} : vector<16x32xbf16>, vector<32x64xbf16>, vector<16x64xf32> -> vector<16x64xf32>
    %c0_50 = arith.constant 0 : index
    %c0_51 = arith.constant 0 : index
    %c0_52 = arith.constant 0 : index
    %171 = vector.load %arg8[%c0_50, %c0_51, %c0_52] : memref<2x1x64xf32, #tpu.memory_space<vmem>>, vector<1x1x64xf32>
    %172 = vector.shape_cast %171 : vector<1x1x64xf32> to vector<1x64xf32>
    %173 = vector.broadcast %172 : vector<1x64xf32> to vector<16x64xf32>
    %174 = arith.addf %170, %173 : vector<16x64xf32>
    %175 = arith.mulf %174, %174 : vector<16x64xf32>
    %176 = arith.mulf %174, %175 : vector<16x64xf32>
    %cst_53 = arith.constant 4.471500e-02 : f32
    %177 = vector.broadcast %cst_53 : f32 to vector<16x64xf32>
    %178 = arith.mulf %177, %176 : vector<16x64xf32>
    %179 = arith.addf %174, %178 : vector<16x64xf32>
    %cst_54 = arith.constant 0.797884583 : f32
    %180 = vector.broadcast %cst_54 : f32 to vector<16x64xf32>
    %181 = arith.mulf %180, %179 : vector<16x64xf32>
    %182 = math.tanh %181 : vector<16x64xf32>
    %cst_55 = arith.constant 1.000000e+00 : f32
    %183 = vector.broadcast %cst_55 : f32 to vector<16x64xf32>
    %184 = arith.addf %183, %182 : vector<16x64xf32>
    %cst_56 = arith.constant 5.000000e-01 : f32
    %185 = vector.broadcast %cst_56 : f32 to vector<16x64xf32>
    %186 = arith.mulf %185, %184 : vector<16x64xf32>
    %187 = arith.mulf %174, %186 : vector<16x64xf32>
    %188 = arith.truncf %187 : vector<16x64xf32> to vector<16x64xbf16>
    %c0_57 = arith.constant 0 : index
    %c0_58 = arith.constant 0 : index
    %c0_59 = arith.constant 0 : index
    %189 = vector.load %arg9[%c0_57, %c0_58, %c0_59] : memref<2x64x32xbf16, #tpu.memory_space<vmem>>, vector<1x64x32xbf16>
    %190 = vector.shape_cast %189 : vector<1x64x32xbf16> to vector<64x32xbf16>
    %cst_60 = arith.constant dense<0.000000e+00> : vector<16x32xf32>
    %191 = tpu.matmul %188, %190, %cst_60 {dimension_numbers = #tpu.dot_dimension_numbers<[1], [0], [0], [1], [0, 0, 1, 1], [], []>} : vector<16x64xbf16>, vector<64x32xbf16>, vector<16x32xf32> -> vector<16x32xf32>
    %c0_61 = arith.constant 0 : index
    %c0_62 = arith.constant 0 : index
    %c0_63 = arith.constant 0 : index
    %192 = vector.load %arg10[%c0_61, %c0_62, %c0_63] : memref<2x1x32xf32, #tpu.memory_space<vmem>>, vector<1x1x32xf32>
    %193 = vector.shape_cast %192 : vector<1x1x32xf32> to vector<1x32xf32>
    %194 = vector.broadcast %193 : vector<1x32xf32> to vector<16x32xf32>
    %195 = arith.addf %191, %194 : vector<16x32xf32>
    %196 = arith.addf %142, %195 : vector<16x32xf32>
    %c1 = arith.constant 1 : index
    %c0_64 = arith.constant 0 : index
    %c0_65 = arith.constant 0 : index
    %197 = vector.load %arg4[%c1, %c0_64, %c0_65] : memref<2x4x32xf32, #tpu.memory_space<vmem>>, vector<1x4x32xf32>
    %198 = vector.shape_cast %197 : vector<1x4x32xf32> to vector<4x32xf32>
    %c1_66 = arith.constant 1 : index
    %c0_67 = arith.constant 0 : index
    %c0_68 = arith.constant 0 : index
    %199 = vector.load %arg5[%c1_66, %c0_67, %c0_68] : memref<2x32x128xbf16, #tpu.memory_space<vmem>>, vector<1x32x128xbf16>
    %200 = vector.shape_cast %199 : vector<1x32x128xbf16> to vector<32x128xbf16>
    %c1_69 = arith.constant 1 : index
    %c0_70 = arith.constant 0 : index
    %c0_71 = arith.constant 0 : index
    %201 = vector.load %arg6[%c1_69, %c0_70, %c0_71] : memref<2x1x128xf32, #tpu.memory_space<vmem>>, vector<1x1x128xf32>
    %202 = vector.shape_cast %201 : vector<1x1x128xf32> to vector<1x128xf32>
    %203 = vector.extract_strided_slice %198 {offsets = [0, 0], sizes = [1, 32], strides = [1, 1]} : vector<4x32xf32> to vector<1x32xf32>
    %204 = vector.extract_strided_slice %198 {offsets = [1, 0], sizes = [1, 32], strides = [1, 1]} : vector<4x32xf32> to vector<1x32xf32>
    %cst_72 = arith.constant dense<0.000000e+00> : vector<16xf32>
    %205 = vector.multi_reduction <add>, %196, %cst_72 [1] : vector<16x32xf32> to vector<16xf32>
    %206 = vector.shape_cast %205 : vector<16xf32> to vector<16x1xf32>
    %cst_73 = arith.constant 3.200000e+01 : f32
    %207 = vector.broadcast %cst_73 : f32 to vector<16x1xf32>
    %208 = arith.divf %206, %207 : vector<16x1xf32>
    %209 = vector.broadcast %208 : vector<16x1xf32> to vector<16x32xf32>
    %210 = arith.subf %196, %209 : vector<16x32xf32>
    %211 = arith.mulf %210, %210 : vector<16x32xf32>
    %cst_74 = arith.constant dense<0.000000e+00> : vector<16xf32>
    %212 = vector.multi_reduction <add>, %211, %cst_74 [1] : vector<16x32xf32> to vector<16xf32>
    %213 = vector.shape_cast %212 : vector<16xf32> to vector<16x1xf32>
    %cst_75 = arith.constant 3.200000e+01 : f32
    %214 = vector.broadcast %cst_75 : f32 to vector<16x1xf32>
    %215 = arith.divf %213, %214 : vector<16x1xf32>
    %216 = vector.broadcast %208 : vector<16x1xf32> to vector<16x32xf32>
    %217 = arith.subf %196, %216 : vector<16x32xf32>
    %cst_76 = arith.constant 9.99999974E-6 : f32
    %218 = vector.broadcast %cst_76 : f32 to vector<16x1xf32>
    %219 = arith.addf %215, %218 : vector<16x1xf32>
    %220 = math.rsqrt %219 : vector<16x1xf32>
    %221 = vector.broadcast %220 : vector<16x1xf32> to vector<16x32xf32>
    %222 = arith.mulf %217, %221 : vector<16x32xf32>
    %223 = vector.broadcast %203 : vector<1x32xf32> to vector<16x32xf32>
    %224 = arith.mulf %222, %223 : vector<16x32xf32>
    %225 = vector.broadcast %204 : vector<1x32xf32> to vector<16x32xf32>
    %226 = arith.addf %224, %225 : vector<16x32xf32>
    %227 = arith.addf %226, %2 : vector<16x32xf32>
    %228 = arith.truncf %227 : vector<16x32xf32> to vector<16x32xbf16>
    %229 = arith.truncf %226 : vector<16x32xf32> to vector<16x32xbf16>
    %230 = vector.extract_strided_slice %200 {offsets = [0, 0], sizes = [32, 32], strides = [1, 1]} : vector<32x128xbf16> to vector<32x32xbf16>
    %cst_77 = arith.constant dense<0.000000e+00> : vector<16x32xf32>
    %231 = tpu.matmul %228, %230, %cst_77 {dimension_numbers = #tpu.dot_dimension_numbers<[1], [0], [0], [1], [0, 0, 1, 1], [], []>} : vector<16x32xbf16>, vector<32x32xbf16>, vector<16x32xf32> -> vector<16x32xf32>
    %232 = vector.extract_strided_slice %202 {offsets = [0, 0], sizes = [1, 32], strides = [1, 1]} : vector<1x128xf32> to vector<1x32xf32>
    %233 = vector.broadcast %232 : vector<1x32xf32> to vector<16x32xf32>
    %234 = arith.addf %231, %233 : vector<16x32xf32>
    %235 = vector.extract_strided_slice %200 {offsets = [0, 32], sizes = [32, 32], strides = [1, 1]} : vector<32x128xbf16> to vector<32x32xbf16>
    %cst_78 = arith.constant dense<0.000000e+00> : vector<16x32xf32>
    %236 = tpu.matmul %228, %235, %cst_78 {dimension_numbers = #tpu.dot_dimension_numbers<[1], [0], [0], [1], [0, 0, 1, 1], [], []>} : vector<16x32xbf16>, vector<32x32xbf16>, vector<16x32xf32> -> vector<16x32xf32>
    %237 = vector.extract_strided_slice %202 {offsets = [0, 32], sizes = [1, 32], strides = [1, 1]} : vector<1x128xf32> to vector<1x32xf32>
    %238 = vector.broadcast %237 : vector<1x32xf32> to vector<16x32xf32>
    %239 = arith.addf %236, %238 : vector<16x32xf32>
    %240 = vector.extract_strided_slice %200 {offsets = [0, 64], sizes = [32, 32], strides = [1, 1]} : vector<32x128xbf16> to vector<32x32xbf16>
    %cst_79 = arith.constant dense<0.000000e+00> : vector<16x32xf32>
    %241 = tpu.matmul %229, %240, %cst_79 {dimension_numbers = #tpu.dot_dimension_numbers<[1], [0], [0], [1], [0, 0, 1, 1], [], []>} : vector<16x32xbf16>, vector<32x32xbf16>, vector<16x32xf32> -> vector<16x32xf32>
    %242 = vector.extract_strided_slice %202 {offsets = [0, 64], sizes = [1, 32], strides = [1, 1]} : vector<1x128xf32> to vector<1x32xf32>
    %243 = vector.broadcast %242 : vector<1x32xf32> to vector<16x32xf32>
    %244 = arith.addf %241, %243 : vector<16x32xf32>
    %245 = vector.extract_strided_slice %234 {offsets = [0, 0], sizes = [16, 8], strides = [1, 1]} : vector<16x32xf32> to vector<16x8xf32>
    %246 = arith.truncf %245 : vector<16x8xf32> to vector<16x8xbf16>
    %247 = vector.extract_strided_slice %239 {offsets = [0, 0], sizes = [16, 8], strides = [1, 1]} : vector<16x32xf32> to vector<16x8xf32>
    %248 = arith.truncf %247 : vector<16x8xf32> to vector<16x8xbf16>
    %249 = vector.extract_strided_slice %244 {offsets = [0, 0], sizes = [16, 8], strides = [1, 1]} : vector<16x32xf32> to vector<16x8xf32>
    %250 = arith.truncf %249 : vector<16x8xf32> to vector<16x8xbf16>
    %cst_80 = arith.constant dense<0.000000e+00> : vector<16x16xf32>
    %251 = tpu.matmul %246, %248, %cst_80 {dimension_numbers = #tpu.dot_dimension_numbers<[1], [1], [0], [0], [0, 0, 1, 0], [], []>} : vector<16x8xbf16>, vector<16x8xbf16>, vector<16x16xf32> -> vector<16x16xf32>
    %cst_81 = arith.constant 0.353553385 : f32
    %252 = vector.broadcast %cst_81 : f32 to vector<16x16xf32>
    %253 = arith.mulf %251, %252 : vector<16x16xf32>
    %cst_82 = arith.constant dense<0xFF800000> : vector<16xf32>
    %254 = vector.multi_reduction <maximumf>, %253, %cst_82 [1] : vector<16x16xf32> to vector<16xf32>
    %255 = vector.shape_cast %254 : vector<16xf32> to vector<16x1xf32>
    %256 = vector.broadcast %255 : vector<16x1xf32> to vector<16x16xf32>
    %257 = arith.subf %253, %256 : vector<16x16xf32>
    %258 = math.exp %257 : vector<16x16xf32>
    %cst_83 = arith.constant dense<0.000000e+00> : vector<16xf32>
    %259 = vector.multi_reduction <add>, %258, %cst_83 [1] : vector<16x16xf32> to vector<16xf32>
    %260 = vector.shape_cast %259 : vector<16xf32> to vector<16x1xf32>
    %261 = tpu.reciprocal %260 {approx = true} : vector<16x1xf32> -> vector<16x1xf32>
    %262 = vector.broadcast %261 : vector<16x1xf32> to vector<16x16xf32>
    %263 = arith.mulf %258, %262 : vector<16x16xf32>
    %264 = arith.truncf %263 : vector<16x16xf32> to vector<16x16xbf16>
    %cst_84 = arith.constant dense<0.000000e+00> : vector<16x8xf32>
    %265 = tpu.matmul %264, %250, %cst_84 {dimension_numbers = #tpu.dot_dimension_numbers<[1], [0], [0], [1], [0, 0, 1, 1], [], []>} : vector<16x16xbf16>, vector<16x8xbf16>, vector<16x8xf32> -> vector<16x8xf32>
    %266 = vector.extract_strided_slice %234 {offsets = [0, 8], sizes = [16, 8], strides = [1, 1]} : vector<16x32xf32> to vector<16x8xf32>
    %267 = arith.truncf %266 : vector<16x8xf32> to vector<16x8xbf16>
    %268 = vector.extract_strided_slice %239 {offsets = [0, 8], sizes = [16, 8], strides = [1, 1]} : vector<16x32xf32> to vector<16x8xf32>
    %269 = arith.truncf %268 : vector<16x8xf32> to vector<16x8xbf16>
    %270 = vector.extract_strided_slice %244 {offsets = [0, 8], sizes = [16, 8], strides = [1, 1]} : vector<16x32xf32> to vector<16x8xf32>
    %271 = arith.truncf %270 : vector<16x8xf32> to vector<16x8xbf16>
    %cst_85 = arith.constant dense<0.000000e+00> : vector<16x16xf32>
    %272 = tpu.matmul %267, %269, %cst_85 {dimension_numbers = #tpu.dot_dimension_numbers<[1], [1], [0], [0], [0, 0, 1, 0], [], []>} : vector<16x8xbf16>, vector<16x8xbf16>, vector<16x16xf32> -> vector<16x16xf32>
    %cst_86 = arith.constant 0.353553385 : f32
    %273 = vector.broadcast %cst_86 : f32 to vector<16x16xf32>
    %274 = arith.mulf %272, %273 : vector<16x16xf32>
    %cst_87 = arith.constant dense<0xFF800000> : vector<16xf32>
    %275 = vector.multi_reduction <maximumf>, %274, %cst_87 [1] : vector<16x16xf32> to vector<16xf32>
    %276 = vector.shape_cast %275 : vector<16xf32> to vector<16x1xf32>
    %277 = vector.broadcast %276 : vector<16x1xf32> to vector<16x16xf32>
    %278 = arith.subf %274, %277 : vector<16x16xf32>
    %279 = math.exp %278 : vector<16x16xf32>
    %cst_88 = arith.constant dense<0.000000e+00> : vector<16xf32>
    %280 = vector.multi_reduction <add>, %279, %cst_88 [1] : vector<16x16xf32> to vector<16xf32>
    %281 = vector.shape_cast %280 : vector<16xf32> to vector<16x1xf32>
    %282 = tpu.reciprocal %281 {approx = true} : vector<16x1xf32> -> vector<16x1xf32>
    %283 = vector.broadcast %282 : vector<16x1xf32> to vector<16x16xf32>
    %284 = arith.mulf %279, %283 : vector<16x16xf32>
    %285 = arith.truncf %284 : vector<16x16xf32> to vector<16x16xbf16>
    %cst_89 = arith.constant dense<0.000000e+00> : vector<16x8xf32>
    %286 = tpu.matmul %285, %271, %cst_89 {dimension_numbers = #tpu.dot_dimension_numbers<[1], [0], [0], [1], [0, 0, 1, 1], [], []>} : vector<16x16xbf16>, vector<16x8xbf16>, vector<16x8xf32> -> vector<16x8xf32>
    %287 = vector.extract_strided_slice %234 {offsets = [0, 16], sizes = [16, 8], strides = [1, 1]} : vector<16x32xf32> to vector<16x8xf32>
    %288 = arith.truncf %287 : vector<16x8xf32> to vector<16x8xbf16>
    %289 = vector.extract_strided_slice %239 {offsets = [0, 16], sizes = [16, 8], strides = [1, 1]} : vector<16x32xf32> to vector<16x8xf32>
    %290 = arith.truncf %289 : vector<16x8xf32> to vector<16x8xbf16>
    %291 = vector.extract_strided_slice %244 {offsets = [0, 16], sizes = [16, 8], strides = [1, 1]} : vector<16x32xf32> to vector<16x8xf32>
    %292 = arith.truncf %291 : vector<16x8xf32> to vector<16x8xbf16>
    %cst_90 = arith.constant dense<0.000000e+00> : vector<16x16xf32>
    %293 = tpu.matmul %288, %290, %cst_90 {dimension_numbers = #tpu.dot_dimension_numbers<[1], [1], [0], [0], [0, 0, 1, 0], [], []>} : vector<16x8xbf16>, vector<16x8xbf16>, vector<16x16xf32> -> vector<16x16xf32>
    %cst_91 = arith.constant 0.353553385 : f32
    %294 = vector.broadcast %cst_91 : f32 to vector<16x16xf32>
    %295 = arith.mulf %293, %294 : vector<16x16xf32>
    %cst_92 = arith.constant dense<0xFF800000> : vector<16xf32>
    %296 = vector.multi_reduction <maximumf>, %295, %cst_92 [1] : vector<16x16xf32> to vector<16xf32>
    %297 = vector.shape_cast %296 : vector<16xf32> to vector<16x1xf32>
    %298 = vector.broadcast %297 : vector<16x1xf32> to vector<16x16xf32>
    %299 = arith.subf %295, %298 : vector<16x16xf32>
    %300 = math.exp %299 : vector<16x16xf32>
    %cst_93 = arith.constant dense<0.000000e+00> : vector<16xf32>
    %301 = vector.multi_reduction <add>, %300, %cst_93 [1] : vector<16x16xf32> to vector<16xf32>
    %302 = vector.shape_cast %301 : vector<16xf32> to vector<16x1xf32>
    %303 = tpu.reciprocal %302 {approx = true} : vector<16x1xf32> -> vector<16x1xf32>
    %304 = vector.broadcast %303 : vector<16x1xf32> to vector<16x16xf32>
    %305 = arith.mulf %300, %304 : vector<16x16xf32>
    %306 = arith.truncf %305 : vector<16x16xf32> to vector<16x16xbf16>
    %cst_94 = arith.constant dense<0.000000e+00> : vector<16x8xf32>
    %307 = tpu.matmul %306, %292, %cst_94 {dimension_numbers = #tpu.dot_dimension_numbers<[1], [0], [0], [1], [0, 0, 1, 1], [], []>} : vector<16x16xbf16>, vector<16x8xbf16>, vector<16x8xf32> -> vector<16x8xf32>
    %308 = vector.extract_strided_slice %234 {offsets = [0, 24], sizes = [16, 8], strides = [1, 1]} : vector<16x32xf32> to vector<16x8xf32>
    %309 = arith.truncf %308 : vector<16x8xf32> to vector<16x8xbf16>
    %310 = vector.extract_strided_slice %239 {offsets = [0, 24], sizes = [16, 8], strides = [1, 1]} : vector<16x32xf32> to vector<16x8xf32>
    %311 = arith.truncf %310 : vector<16x8xf32> to vector<16x8xbf16>
    %312 = vector.extract_strided_slice %244 {offsets = [0, 24], sizes = [16, 8], strides = [1, 1]} : vector<16x32xf32> to vector<16x8xf32>
    %313 = arith.truncf %312 : vector<16x8xf32> to vector<16x8xbf16>
    %cst_95 = arith.constant dense<0.000000e+00> : vector<16x16xf32>
    %314 = tpu.matmul %309, %311, %cst_95 {dimension_numbers = #tpu.dot_dimension_numbers<[1], [1], [0], [0], [0, 0, 1, 0], [], []>} : vector<16x8xbf16>, vector<16x8xbf16>, vector<16x16xf32> -> vector<16x16xf32>
    %cst_96 = arith.constant 0.353553385 : f32
    %315 = vector.broadcast %cst_96 : f32 to vector<16x16xf32>
    %316 = arith.mulf %314, %315 : vector<16x16xf32>
    %cst_97 = arith.constant dense<0xFF800000> : vector<16xf32>
    %317 = vector.multi_reduction <maximumf>, %316, %cst_97 [1] : vector<16x16xf32> to vector<16xf32>
    %318 = vector.shape_cast %317 : vector<16xf32> to vector<16x1xf32>
    %319 = vector.broadcast %318 : vector<16x1xf32> to vector<16x16xf32>
    %320 = arith.subf %316, %319 : vector<16x16xf32>
    %321 = math.exp %320 : vector<16x16xf32>
    %cst_98 = arith.constant dense<0.000000e+00> : vector<16xf32>
    %322 = vector.multi_reduction <add>, %321, %cst_98 [1] : vector<16x16xf32> to vector<16xf32>
    %323 = vector.shape_cast %322 : vector<16xf32> to vector<16x1xf32>
    %324 = tpu.reciprocal %323 {approx = true} : vector<16x1xf32> -> vector<16x1xf32>
    %325 = vector.broadcast %324 : vector<16x1xf32> to vector<16x16xf32>
    %326 = arith.mulf %321, %325 : vector<16x16xf32>
    %327 = arith.truncf %326 : vector<16x16xf32> to vector<16x16xbf16>
    %cst_99 = arith.constant dense<0.000000e+00> : vector<16x8xf32>
    %328 = tpu.matmul %327, %313, %cst_99 {dimension_numbers = #tpu.dot_dimension_numbers<[1], [0], [0], [1], [0, 0, 1, 1], [], []>} : vector<16x16xbf16>, vector<16x8xbf16>, vector<16x8xf32> -> vector<16x8xf32>
    %329 = tpu.concatenate %265, %286, %307, %328 in 1 : vector<16x8xf32>, vector<16x8xf32>, vector<16x8xf32>, vector<16x8xf32> -> vector<16x32xf32>
    %330 = arith.truncf %329 : vector<16x32xf32> to vector<16x32xbf16>
    %331 = vector.extract_strided_slice %200 {offsets = [0, 96], sizes = [32, 32], strides = [1, 1]} : vector<32x128xbf16> to vector<32x32xbf16>
    %cst_100 = arith.constant dense<0.000000e+00> : vector<16x32xf32>
    %332 = tpu.matmul %330, %331, %cst_100 {dimension_numbers = #tpu.dot_dimension_numbers<[1], [0], [0], [1], [0, 0, 1, 1], [], []>} : vector<16x32xbf16>, vector<32x32xbf16>, vector<16x32xf32> -> vector<16x32xf32>
    %333 = vector.extract_strided_slice %202 {offsets = [0, 96], sizes = [1, 32], strides = [1, 1]} : vector<1x128xf32> to vector<1x32xf32>
    %334 = vector.broadcast %333 : vector<1x32xf32> to vector<16x32xf32>
    %335 = arith.addf %332, %334 : vector<16x32xf32>
    %336 = arith.addf %196, %335 : vector<16x32xf32>
    %337 = vector.extract_strided_slice %198 {offsets = [2, 0], sizes = [1, 32], strides = [1, 1]} : vector<4x32xf32> to vector<1x32xf32>
    %338 = vector.extract_strided_slice %198 {offsets = [3, 0], sizes = [1, 32], strides = [1, 1]} : vector<4x32xf32> to vector<1x32xf32>
    %cst_101 = arith.constant dense<0.000000e+00> : vector<16xf32>
    %339 = vector.multi_reduction <add>, %336, %cst_101 [1] : vector<16x32xf32> to vector<16xf32>
    %340 = vector.shape_cast %339 : vector<16xf32> to vector<16x1xf32>
    %cst_102 = arith.constant 3.200000e+01 : f32
    %341 = vector.broadcast %cst_102 : f32 to vector<16x1xf32>
    %342 = arith.divf %340, %341 : vector<16x1xf32>
    %343 = vector.broadcast %342 : vector<16x1xf32> to vector<16x32xf32>
    %344 = arith.subf %336, %343 : vector<16x32xf32>
    %345 = arith.mulf %344, %344 : vector<16x32xf32>
    %cst_103 = arith.constant dense<0.000000e+00> : vector<16xf32>
    %346 = vector.multi_reduction <add>, %345, %cst_103 [1] : vector<16x32xf32> to vector<16xf32>
    %347 = vector.shape_cast %346 : vector<16xf32> to vector<16x1xf32>
    %cst_104 = arith.constant 3.200000e+01 : f32
    %348 = vector.broadcast %cst_104 : f32 to vector<16x1xf32>
    %349 = arith.divf %347, %348 : vector<16x1xf32>
    %350 = vector.broadcast %342 : vector<16x1xf32> to vector<16x32xf32>
    %351 = arith.subf %336, %350 : vector<16x32xf32>
    %cst_105 = arith.constant 9.99999974E-6 : f32
    %352 = vector.broadcast %cst_105 : f32 to vector<16x1xf32>
    %353 = arith.addf %349, %352 : vector<16x1xf32>
    %354 = math.rsqrt %353 : vector<16x1xf32>
    %355 = vector.broadcast %354 : vector<16x1xf32> to vector<16x32xf32>
    %356 = arith.mulf %351, %355 : vector<16x32xf32>
    %357 = vector.broadcast %337 : vector<1x32xf32> to vector<16x32xf32>
    %358 = arith.mulf %356, %357 : vector<16x32xf32>
    %359 = vector.broadcast %338 : vector<1x32xf32> to vector<16x32xf32>
    %360 = arith.addf %358, %359 : vector<16x32xf32>
    %361 = arith.truncf %360 : vector<16x32xf32> to vector<16x32xbf16>
    %c1_106 = arith.constant 1 : index
    %c0_107 = arith.constant 0 : index
    %c0_108 = arith.constant 0 : index
    %362 = vector.load %arg7[%c1_106, %c0_107, %c0_108] : memref<2x32x64xbf16, #tpu.memory_space<vmem>>, vector<1x32x64xbf16>
    %363 = vector.shape_cast %362 : vector<1x32x64xbf16> to vector<32x64xbf16>
    %cst_109 = arith.constant dense<0.000000e+00> : vector<16x64xf32>
    %364 = tpu.matmul %361, %363, %cst_109 {dimension_numbers = #tpu.dot_dimension_numbers<[1], [0], [0], [1], [0, 0, 1, 1], [], []>} : vector<16x32xbf16>, vector<32x64xbf16>, vector<16x64xf32> -> vector<16x64xf32>
    %c1_110 = arith.constant 1 : index
    %c0_111 = arith.constant 0 : index
    %c0_112 = arith.constant 0 : index
    %365 = vector.load %arg8[%c1_110, %c0_111, %c0_112] : memref<2x1x64xf32, #tpu.memory_space<vmem>>, vector<1x1x64xf32>
    %366 = vector.shape_cast %365 : vector<1x1x64xf32> to vector<1x64xf32>
    %367 = vector.broadcast %366 : vector<1x64xf32> to vector<16x64xf32>
    %368 = arith.addf %364, %367 : vector<16x64xf32>
    %369 = arith.mulf %368, %368 : vector<16x64xf32>
    %370 = arith.mulf %368, %369 : vector<16x64xf32>
    %cst_113 = arith.constant 4.471500e-02 : f32
    %371 = vector.broadcast %cst_113 : f32 to vector<16x64xf32>
    %372 = arith.mulf %371, %370 : vector<16x64xf32>
    %373 = arith.addf %368, %372 : vector<16x64xf32>
    %cst_114 = arith.constant 0.797884583 : f32
    %374 = vector.broadcast %cst_114 : f32 to vector<16x64xf32>
    %375 = arith.mulf %374, %373 : vector<16x64xf32>
    %376 = math.tanh %375 : vector<16x64xf32>
    %cst_115 = arith.constant 1.000000e+00 : f32
    %377 = vector.broadcast %cst_115 : f32 to vector<16x64xf32>
    %378 = arith.addf %377, %376 : vector<16x64xf32>
    %cst_116 = arith.constant 5.000000e-01 : f32
    %379 = vector.broadcast %cst_116 : f32 to vector<16x64xf32>
    %380 = arith.mulf %379, %378 : vector<16x64xf32>
    %381 = arith.mulf %368, %380 : vector<16x64xf32>
    %382 = arith.truncf %381 : vector<16x64xf32> to vector<16x64xbf16>
    %c1_117 = arith.constant 1 : index
    %c0_118 = arith.constant 0 : index
    %c0_119 = arith.constant 0 : index
    %383 = vector.load %arg9[%c1_117, %c0_118, %c0_119] : memref<2x64x32xbf16, #tpu.memory_space<vmem>>, vector<1x64x32xbf16>
    %384 = vector.shape_cast %383 : vector<1x64x32xbf16> to vector<64x32xbf16>
    %cst_120 = arith.constant dense<0.000000e+00> : vector<16x32xf32>
    %385 = tpu.matmul %382, %384, %cst_120 {dimension_numbers = #tpu.dot_dimension_numbers<[1], [0], [0], [1], [0, 0, 1, 1], [], []>} : vector<16x64xbf16>, vector<64x32xbf16>, vector<16x32xf32> -> vector<16x32xf32>
    %c1_121 = arith.constant 1 : index
    %c0_122 = arith.constant 0 : index
    %c0_123 = arith.constant 0 : index
    %386 = vector.load %arg10[%c1_121, %c0_122, %c0_123] : memref<2x1x32xf32, #tpu.memory_space<vmem>>, vector<1x1x32xf32>
    %387 = vector.shape_cast %386 : vector<1x1x32xf32> to vector<1x32xf32>
    %388 = vector.broadcast %387 : vector<1x32xf32> to vector<16x32xf32>
    %389 = arith.addf %385, %388 : vector<16x32xf32>
    %390 = arith.addf %336, %389 : vector<16x32xf32>
    %c0_124 = arith.constant 0 : index
    %c0_125 = arith.constant 0 : index
    %391 = vector.load %arg11[%c0_124, %c0_125] : memref<2x32xf32, #tpu.memory_space<vmem>>, vector<2x32xf32>
    %392 = vector.extract_strided_slice %391 {offsets = [0, 0], sizes = [1, 32], strides = [1, 1]} : vector<2x32xf32> to vector<1x32xf32>
    %393 = vector.extract_strided_slice %391 {offsets = [1, 0], sizes = [1, 32], strides = [1, 1]} : vector<2x32xf32> to vector<1x32xf32>
    %cst_126 = arith.constant dense<0.000000e+00> : vector<16xf32>
    %394 = vector.multi_reduction <add>, %390, %cst_126 [1] : vector<16x32xf32> to vector<16xf32>
    %395 = vector.shape_cast %394 : vector<16xf32> to vector<16x1xf32>
    %cst_127 = arith.constant 3.200000e+01 : f32
    %396 = vector.broadcast %cst_127 : f32 to vector<16x1xf32>
    %397 = arith.divf %395, %396 : vector<16x1xf32>
    %398 = vector.broadcast %397 : vector<16x1xf32> to vector<16x32xf32>
    %399 = arith.subf %390, %398 : vector<16x32xf32>
    %400 = arith.mulf %399, %399 : vector<16x32xf32>
    %cst_128 = arith.constant dense<0.000000e+00> : vector<16xf32>
    %401 = vector.multi_reduction <add>, %400, %cst_128 [1] : vector<16x32xf32> to vector<16xf32>
    %402 = vector.shape_cast %401 : vector<16xf32> to vector<16x1xf32>
    %cst_129 = arith.constant 3.200000e+01 : f32
    %403 = vector.broadcast %cst_129 : f32 to vector<16x1xf32>
    %404 = arith.divf %402, %403 : vector<16x1xf32>
    %405 = vector.broadcast %397 : vector<16x1xf32> to vector<16x32xf32>
    %406 = arith.subf %390, %405 : vector<16x32xf32>
    %cst_130 = arith.constant 9.99999974E-6 : f32
    %407 = vector.broadcast %cst_130 : f32 to vector<16x1xf32>
    %408 = arith.addf %404, %407 : vector<16x1xf32>
    %409 = math.rsqrt %408 : vector<16x1xf32>
    %410 = vector.broadcast %409 : vector<16x1xf32> to vector<16x32xf32>
    %411 = arith.mulf %406, %410 : vector<16x32xf32>
    %412 = vector.broadcast %392 : vector<1x32xf32> to vector<16x32xf32>
    %413 = arith.mulf %411, %412 : vector<16x32xf32>
    %414 = vector.broadcast %393 : vector<1x32xf32> to vector<16x32xf32>
    %415 = arith.addf %413, %414 : vector<16x32xf32>
    %416 = arith.truncf %415 : vector<16x32xf32> to vector<16x32xbf16>
    %c0_131 = arith.constant 0 : index
    %c0_132 = arith.constant 0 : index
    %417 = vector.load %arg12[%c0_131, %c0_132] : memref<32x64xbf16, #tpu.memory_space<vmem>>, vector<32x64xbf16>
    %cst_133 = arith.constant dense<0.000000e+00> : vector<16x64xf32>
    %418 = tpu.matmul %416, %417, %cst_133 {dimension_numbers = #tpu.dot_dimension_numbers<[1], [0], [0], [1], [0, 0, 1, 1], [], []>} : vector<16x32xbf16>, vector<32x64xbf16>, vector<16x64xf32> -> vector<16x64xf32>
    %cst_134 = arith.constant dense<0xFF800000> : vector<16xf32>
    %419 = vector.multi_reduction <maximumf>, %418, %cst_134 [1] : vector<16x64xf32> to vector<16xf32>
    %420 = vector.shape_cast %419 : vector<16xf32> to vector<16x1xf32>
    %421 = tpu.iota {dimensions = array<i32: 1>} : vector<16x64xi32>
    %422 = vector.broadcast %420 : vector<16x1xf32> to vector<16x64xf32>
    %423 = arith.cmpf oeq, %418, %422 : vector<16x64xf32>
    %c64_i32 = arith.constant 64 : i32
    %424 = vector.broadcast %c64_i32 : i32 to vector<16x64xi32>
    %425 = arith.select %423, %421, %424 : vector<16x64xi1>, vector<16x64xi32>
    %cst_135 = arith.constant dense<2147483647> : vector<16xi32>
    %426 = vector.multi_reduction <minsi>, %425, %cst_135 [1] : vector<16x64xi32> to vector<16xi32>
    %427 = vector.shape_cast %426 : vector<16xi32> to vector<16x1xi32>
    %428 = vector.broadcast %427 : vector<16x1xi32> to vector<16x64xi32>
    %429 = arith.cmpi eq, %421, %428 : vector<16x64xi32>
    %430 = arith.extui %429 : vector<16x64xi1> to vector<16x64xi32>
    %431 = arith.sitofp %430 : vector<16x64xi32> to vector<16x64xf32>
    %c0_136 = arith.constant 0 : index
    %c0_137 = arith.constant 0 : index
    %432 = vector.load %arg13[%c0_136, %c0_137] : memref<64x16xf32, #tpu.memory_space<vmem>>, vector<64x16xf32>
    %cst_138 = arith.constant dense<0.000000e+00> : vector<16x16xf32>
    %433 = tpu.matmul %431, %432, %cst_138 {dimension_numbers = #tpu.dot_dimension_numbers<[1], [0], [0], [1], [0, 0, 1, 1], [], []>} : vector<16x64xf32>, vector<64x16xf32>, vector<16x16xf32> -> vector<16x16xf32>
    %c0_139 = arith.constant 0 : index
    %c0_140 = arith.constant 0 : index
    %c0_141 = arith.constant 0 : index
    %434 = vector.load %arg2[%c0_139, %c0_140, %c0_141] : memref<1x16x16xf32, #tpu.memory_space<vmem>>, vector<1x16x16xf32>
    %435 = vector.shape_cast %434 : vector<1x16x16xf32> to vector<16x16xf32>
    %cst_142 = arith.constant dense<0.000000e+00> : vector<16xf32>
    %436 = vector.multi_reduction <add>, %433, %cst_142 [0] : vector<16x16xf32> to vector<16xf32>
    %437 = vector.shape_cast %436 : vector<16xf32> to vector<1x16xf32>
    %cst_143 = arith.constant 1.600000e+01 : f32
    %438 = vector.broadcast %cst_143 : f32 to vector<1x16xf32>
    %439 = arith.divf %437, %438 : vector<1x16xf32>
    %440 = vector.broadcast %439 : vector<1x16xf32> to vector<16x16xf32>
    %441 = arith.subf %433, %440 : vector<16x16xf32>
    %442 = arith.mulf %441, %441 : vector<16x16xf32>
    %cst_144 = arith.constant dense<0.000000e+00> : vector<16xf32>
    %443 = vector.multi_reduction <add>, %442, %cst_144 [0] : vector<16x16xf32> to vector<16xf32>
    %444 = vector.shape_cast %443 : vector<16xf32> to vector<1x16xf32>
    %cst_145 = arith.constant 1.500000e+01 : f32
    %445 = vector.broadcast %cst_145 : f32 to vector<1x16xf32>
    %446 = arith.divf %444, %445 : vector<1x16xf32>
    %cst_146 = arith.constant dense<0.000000e+00> : vector<16xf32>
    %447 = vector.multi_reduction <add>, %435, %cst_146 [0] : vector<16x16xf32> to vector<16xf32>
    %448 = vector.shape_cast %447 : vector<16xf32> to vector<1x16xf32>
    %cst_147 = arith.constant 1.600000e+01 : f32
    %449 = vector.broadcast %cst_147 : f32 to vector<1x16xf32>
    %450 = arith.divf %448, %449 : vector<1x16xf32>
    %451 = vector.broadcast %450 : vector<1x16xf32> to vector<16x16xf32>
    %452 = arith.subf %435, %451 : vector<16x16xf32>
    %453 = arith.mulf %452, %452 : vector<16x16xf32>
    %cst_148 = arith.constant dense<0.000000e+00> : vector<16xf32>
    %454 = vector.multi_reduction <add>, %453, %cst_148 [0] : vector<16x16xf32> to vector<16xf32>
    %455 = vector.shape_cast %454 : vector<16xf32> to vector<1x16xf32>
    %cst_149 = arith.constant 1.500000e+01 : f32
    %456 = vector.broadcast %cst_149 : f32 to vector<1x16xf32>
    %457 = arith.divf %455, %456 : vector<1x16xf32>
    %458 = vector.broadcast %439 : vector<1x16xf32> to vector<16x16xf32>
    %459 = arith.subf %433, %458 : vector<16x16xf32>
    %cst_150 = arith.constant 9.99999974E-6 : f32
    %460 = vector.broadcast %cst_150 : f32 to vector<1x16xf32>
    %461 = arith.addf %446, %460 : vector<1x16xf32>
    %462 = math.rsqrt %461 : vector<1x16xf32>
    %463 = vector.broadcast %462 : vector<1x16xf32> to vector<16x16xf32>
    %464 = arith.mulf %459, %463 : vector<16x16xf32>
    %cst_151 = arith.constant 9.99999974E-6 : f32
    %465 = vector.broadcast %cst_151 : f32 to vector<1x16xf32>
    %466 = arith.addf %457, %465 : vector<1x16xf32>
    %467 = math.sqrt %466 : vector<1x16xf32>
    %468 = vector.broadcast %467 : vector<1x16xf32> to vector<16x16xf32>
    %469 = arith.mulf %464, %468 : vector<16x16xf32>
    %470 = vector.broadcast %450 : vector<1x16xf32> to vector<16x16xf32>
    %471 = arith.addf %469, %470 : vector<16x16xf32>
    %c0_152 = arith.constant 0 : index
    %c0_153 = arith.constant 0 : index
    %c0_154 = arith.constant 0 : index
    %472 = vector.load %arg14[%c0_152, %c0_153, %c0_154] : memref<1x16x16xf32, #tpu.memory_space<vmem>>, vector<1x16x16xf32>
    %473 = vector.shape_cast %472 : vector<1x16x16xf32> to vector<16x16xf32>
    %474 = vector.shape_cast %471 : vector<16x16xf32> to vector<1x16x16xf32>
    tpu.vector_store %arg14[%c0_152, %c0_153, %c0_154], %474 {strides = array<i32>} : memref<1x16x16xf32, #tpu.memory_space<vmem>>, vector<1x16x16xf32>,
    return
  }
  func.func @transform_0(%arg0: i32) -> (i32, i32, i32) {
    %c0_i32 = arith.constant 0 : i32
    %c0_i32_0 = arith.constant 0 : i32
    %c0_i32_1 = arith.constant 0 : i32
    return %arg0, %c0_i32, %c0_i32_0 : i32, i32, i32
  }
  func.func @transform_1(%arg0: i32) -> (i32, i32, i32) {
    %c0_i32 = arith.constant 0 : i32
    %c0_i32_0 = arith.constant 0 : i32
    %c0_i32_1 = arith.constant 0 : i32
    return %arg0, %c0_i32, %c0_i32_0 : i32, i32, i32
  }
  func.func @transform_2(%arg0: i32) -> (i32, i32) {
    %c0_i32 = arith.constant 0 : i32
    %c0_i32_0 = arith.constant 0 : i32
    %c0_i32_1 = arith.constant 0 : i32
    return %c0_i32, %c0_i32_0 : i32, i32
  }
  func.func @transform_3(%arg0: i32) -> (i32, i32, i32) {
    %c0_i32 = arith.constant 0 : i32
    %c0_i32_0 = arith.constant 0 : i32
    %c0_i32_1 = arith.constant 0 : i32
    %c0_i32_2 = arith.constant 0 : i32
    return %c0_i32, %c0_i32_0, %c0_i32_1 : i32, i32, i32
  }
  func.func @transform_4(%arg0: i32) -> (i32, i32, i32) {
    %c0_i32 = arith.constant 0 : i32
    %c0_i32_0 = arith.constant 0 : i32
    %c0_i32_1 = arith.constant 0 : i32
    %c0_i32_2 = arith.constant 0 : i32
    return %c0_i32, %c0_i32_0, %c0_i32_1 : i32, i32, i32
  }
  func.func @transform_5(%arg0: i32) -> (i32, i32, i32) {
    %c0_i32 = arith.constant 0 : i32
    %c0_i32_0 = arith.constant 0 : i32
    %c0_i32_1 = arith.constant 0 : i32
    %c0_i32_2 = arith.constant 0 : i32
    return %c0_i32, %c0_i32_0, %c0_i32_1 : i32, i32, i32
  }
  func.func @transform_6(%arg0: i32) -> (i32, i32, i32) {
    %c0_i32 = arith.constant 0 : i32
    %c0_i32_0 = arith.constant 0 : i32
    %c0_i32_1 = arith.constant 0 : i32
    %c0_i32_2 = arith.constant 0 : i32
    return %c0_i32, %c0_i32_0, %c0_i32_1 : i32, i32, i32
  }
  func.func @transform_7(%arg0: i32) -> (i32, i32, i32) {
    %c0_i32 = arith.constant 0 : i32
    %c0_i32_0 = arith.constant 0 : i32
    %c0_i32_1 = arith.constant 0 : i32
    %c0_i32_2 = arith.constant 0 : i32
    return %c0_i32, %c0_i32_0, %c0_i32_1 : i32, i32, i32
  }
  func.func @transform_8(%arg0: i32) -> (i32, i32, i32) {
    %c0_i32 = arith.constant 0 : i32
    %c0_i32_0 = arith.constant 0 : i32
    %c0_i32_1 = arith.constant 0 : i32
    %c0_i32_2 = arith.constant 0 : i32
    return %c0_i32, %c0_i32_0, %c0_i32_1 : i32, i32, i32
  }
  func.func @transform_9(%arg0: i32) -> (i32, i32, i32) {
    %c0_i32 = arith.constant 0 : i32
    %c0_i32_0 = arith.constant 0 : i32
    %c0_i32_1 = arith.constant 0 : i32
    %c0_i32_2 = arith.constant 0 : i32
    return %c0_i32, %c0_i32_0, %c0_i32_1 : i32, i32, i32
  }
  func.func @transform_10(%arg0: i32) -> (i32, i32) {
    %c0_i32 = arith.constant 0 : i32
    %c0_i32_0 = arith.constant 0 : i32
    %c0_i32_1 = arith.constant 0 : i32
    return %c0_i32, %c0_i32_0 : i32, i32
  }
  func.func @transform_11(%arg0: i32) -> (i32, i32) {
    %c0_i32 = arith.constant 0 : i32
    %c0_i32_0 = arith.constant 0 : i32
    %c0_i32_1 = arith.constant 0 : i32
    return %c0_i32, %c0_i32_0 : i32, i32
  }
  func.func @transform_12(%arg0: i32) -> (i32, i32) {
    %c0_i32 = arith.constant 0 : i32
    %c0_i32_0 = arith.constant 0 : i32
    %c0_i32_1 = arith.constant 0 : i32
    return %c0_i32, %c0_i32_0 : i32, i32
  }
  func.func @transform_13(%arg0: i32) -> (i32, i32, i32) {
    %c0_i32 = arith.constant 0 : i32
    %c0_i32_0 = arith.constant 0 : i32
    %c0_i32_1 = arith.constant 0 : i32
    return %arg0, %c0_i32, %c0_i32_0 : i32, i32, i32
  }
}

module attributes {stable_mosaic.version = 11 : i64} {
  func.func @kernel(%arg0: i32, %arg1: memref<32x144xf32, #tpu.memory_space<vmem>>, %arg2: memref<144x8xbf16, #tpu.memory_space<vmem>>, %arg3: memref<1x8xf32, #tpu.memory_space<vmem>>, %arg4: memref<32x8xf32, #tpu.memory_space<vmem>>) attributes {dimension_semantics = [#tpu.dimension_semantics<parallel>], iteration_bounds = array<i64: 1>, scalar_prefetch = 0 : i64, scratch_operands = 0 : i64, tpu.core_type = #tpu.core_type<tc>, window_params = [{transform_indices = @transform_0, window_bounds = array<i64: 32, 144>}, {pipeline_mode = #tpu.pipeline_mode<synchronous>, transform_indices = @transform_1, window_bounds = array<i64: 144, 8>}, {pipeline_mode = #tpu.pipeline_mode<synchronous>, transform_indices = @transform_2, window_bounds = array<i64: 1, 8>}, {transform_indices = @transform_3, window_bounds = array<i64: 32, 8>}]} {
    %c0 = arith.constant 0 : index
    %c0_0 = arith.constant 0 : index
    %0 = vector.load %arg1[%c0, %c0_0] : memref<32x144xf32, #tpu.memory_space<vmem>>, vector<32x144xf32>
    %1 = arith.truncf %0 : vector<32x144xf32> to vector<32x144xbf16>
    %c0_1 = arith.constant 0 : index
    %c0_2 = arith.constant 0 : index
    %2 = vector.load %arg2[%c0_1, %c0_2] : memref<144x8xbf16, #tpu.memory_space<vmem>>, vector<144x8xbf16>
    %cst = arith.constant dense<0.000000e+00> : vector<32x8xf32>
    %3 = tpu.matmul %1, %2, %cst {dimension_numbers = #tpu.dot_dimension_numbers<[1], [0], [0], [1], [0, 0, 1, 1], [], []>} : vector<32x144xbf16>, vector<144x8xbf16>, vector<32x8xf32> -> vector<32x8xf32>
    %c0_3 = arith.constant 0 : index
    %c0_4 = arith.constant 0 : index
    %4 = vector.load %arg3[%c0_3, %c0_4] : memref<1x8xf32, #tpu.memory_space<vmem>>, vector<1x8xf32>
    %5 = vector.broadcast %4 : vector<1x8xf32> to vector<32x8xf32>
    %6 = arith.addf %3, %5 : vector<32x8xf32>
    %cst_5 = arith.constant 0.000000e+00 : f32
    %7 = vector.broadcast %cst_5 : f32 to vector<32x8xf32>
    %8 = arith.cmpf oge, %6, %7 : vector<32x8xf32>
    %cst_6 = arith.constant 2.000000e-01 : f32
    %9 = vector.broadcast %cst_6 : f32 to vector<32x8xf32>
    %10 = arith.mulf %9, %6 : vector<32x8xf32>
    %11 = arith.select %8, %6, %10 : vector<32x8xi1>, vector<32x8xf32>
    %c0_7 = arith.constant 0 : index
    %c0_8 = arith.constant 0 : index
    %12 = vector.load %arg4[%c0_7, %c0_8] : memref<32x8xf32, #tpu.memory_space<vmem>>, vector<32x8xf32>
    tpu.vector_store %arg4[%c0_7, %c0_8], %11 {strides = array<i32>} : memref<32x8xf32, #tpu.memory_space<vmem>>, vector<32x8xf32>,
    return
  }
  func.func @transform_0(%arg0: i32) -> (i32, i32) {
    %c0_i32 = arith.constant 0 : i32
    %c0_i32_0 = arith.constant 0 : i32
    return %arg0, %c0_i32 : i32, i32
  }
  func.func @transform_1(%arg0: i32) -> (i32, i32) {
    %c0_i32 = arith.constant 0 : i32
    %c0_i32_0 = arith.constant 0 : i32
    %c0_i32_1 = arith.constant 0 : i32
    return %c0_i32, %c0_i32_0 : i32, i32
  }
  func.func @transform_2(%arg0: i32) -> (i32, i32) {
    %c0_i32 = arith.constant 0 : i32
    %c0_i32_0 = arith.constant 0 : i32
    %c0_i32_1 = arith.constant 0 : i32
    return %c0_i32, %c0_i32_0 : i32, i32
  }
  func.func @transform_3(%arg0: i32) -> (i32, i32) {
    %c0_i32 = arith.constant 0 : i32
    %c0_i32_0 = arith.constant 0 : i32
    return %arg0, %c0_i32 : i32, i32
  }
}

module attributes {stable_mosaic.version = 11 : i64} {
  func.func @kernel(%arg0: i32, %arg1: memref<128x72xf32, #tpu.memory_space<vmem>>, %arg2: memref<128x72xf32, #tpu.memory_space<vmem>>, %arg3: memref<72x8xbf16, #tpu.memory_space<vmem>>, %arg4: memref<1x8xf32, #tpu.memory_space<vmem>>, %arg5: memref<128x8xf32, #tpu.memory_space<vmem>>) attributes {dimension_semantics = [#tpu.dimension_semantics<parallel>], iteration_bounds = array<i64: 1>, scalar_prefetch = 0 : i64, scratch_operands = 0 : i64, tpu.core_type = #tpu.core_type<tc>, window_params = [{transform_indices = @transform_0, window_bounds = array<i64: 128, 72>}, {transform_indices = @transform_1, window_bounds = array<i64: 128, 72>}, {pipeline_mode = #tpu.pipeline_mode<synchronous>, transform_indices = @transform_2, window_bounds = array<i64: 72, 8>}, {pipeline_mode = #tpu.pipeline_mode<synchronous>, transform_indices = @transform_3, window_bounds = array<i64: 1, 8>}, {transform_indices = @transform_4, window_bounds = array<i64: 128, 8>}]} {
    %c0 = arith.constant 0 : index
    %c0_0 = arith.constant 0 : index
    %0 = vector.load %arg1[%c0, %c0_0] : memref<128x72xf32, #tpu.memory_space<vmem>>, vector<128x72xf32>
    %c0_1 = arith.constant 0 : index
    %c0_2 = arith.constant 0 : index
    %1 = vector.load %arg2[%c0_1, %c0_2] : memref<128x72xf32, #tpu.memory_space<vmem>>, vector<128x72xf32>
    %cst = arith.constant 5.000000e-01 : f32
    %2 = vector.broadcast %cst : f32 to vector<128x72xf32>
    %3 = arith.mulf %2, %1 : vector<128x72xf32>
    %4 = arith.addf %0, %3 : vector<128x72xf32>
    %5 = arith.truncf %4 : vector<128x72xf32> to vector<128x72xbf16>
    %c0_3 = arith.constant 0 : index
    %c0_4 = arith.constant 0 : index
    %6 = vector.load %arg3[%c0_3, %c0_4] : memref<72x8xbf16, #tpu.memory_space<vmem>>, vector<72x8xbf16>
    %cst_5 = arith.constant dense<0.000000e+00> : vector<128x8xf32>
    %7 = tpu.matmul %5, %6, %cst_5 {dimension_numbers = #tpu.dot_dimension_numbers<[1], [0], [0], [1], [0, 0, 1, 1], [], []>} : vector<128x72xbf16>, vector<72x8xbf16>, vector<128x8xf32> -> vector<128x8xf32>
    %c0_6 = arith.constant 0 : index
    %c0_7 = arith.constant 0 : index
    %8 = vector.load %arg4[%c0_6, %c0_7] : memref<1x8xf32, #tpu.memory_space<vmem>>, vector<1x8xf32>
    %9 = vector.broadcast %8 : vector<1x8xf32> to vector<128x8xf32>
    %10 = arith.addf %7, %9 : vector<128x8xf32>
    %cst_8 = arith.constant 0.000000e+00 : f32
    %11 = vector.broadcast %cst_8 : f32 to vector<128x8xf32>
    %12 = arith.cmpf oge, %10, %11 : vector<128x8xf32>
    %cst_9 = arith.constant 2.000000e-01 : f32
    %13 = vector.broadcast %cst_9 : f32 to vector<128x8xf32>
    %14 = arith.mulf %13, %10 : vector<128x8xf32>
    %15 = arith.select %12, %10, %14 : vector<128x8xi1>, vector<128x8xf32>
    %c0_10 = arith.constant 0 : index
    %c0_11 = arith.constant 0 : index
    %16 = vector.load %arg5[%c0_10, %c0_11] : memref<128x8xf32, #tpu.memory_space<vmem>>, vector<128x8xf32>
    tpu.vector_store %arg5[%c0_10, %c0_11], %15 {strides = array<i32>} : memref<128x8xf32, #tpu.memory_space<vmem>>, vector<128x8xf32>,
    return
  }
  func.func @transform_0(%arg0: i32) -> (i32, i32) {
    %c0_i32 = arith.constant 0 : i32
    %c0_i32_0 = arith.constant 0 : i32
    return %arg0, %c0_i32 : i32, i32
  }
  func.func @transform_1(%arg0: i32) -> (i32, i32) {
    %c0_i32 = arith.constant 0 : i32
    %c0_i32_0 = arith.constant 0 : i32
    return %arg0, %c0_i32 : i32, i32
  }
  func.func @transform_2(%arg0: i32) -> (i32, i32) {
    %c0_i32 = arith.constant 0 : i32
    %c0_i32_0 = arith.constant 0 : i32
    %c0_i32_1 = arith.constant 0 : i32
    return %c0_i32, %c0_i32_0 : i32, i32
  }
  func.func @transform_3(%arg0: i32) -> (i32, i32) {
    %c0_i32 = arith.constant 0 : i32
    %c0_i32_0 = arith.constant 0 : i32
    %c0_i32_1 = arith.constant 0 : i32
    return %c0_i32, %c0_i32_0 : i32, i32
  }
  func.func @transform_4(%arg0: i32) -> (i32, i32) {
    %c0_i32 = arith.constant 0 : i32
    %c0_i32_0 = arith.constant 0 : i32
    return %arg0, %c0_i32 : i32, i32
  }
}

module attributes {stable_mosaic.version = 11 : i64} {
  func.func @kernel(%arg0: i32, %arg1: memref<128x72xf32, #tpu.memory_space<vmem>>, %arg2: memref<72x3xbf16, #tpu.memory_space<vmem>>, %arg3: memref<1x3xf32, #tpu.memory_space<vmem>>, %arg4: memref<128x3xf32, #tpu.memory_space<vmem>>) attributes {dimension_semantics = [#tpu.dimension_semantics<parallel>], iteration_bounds = array<i64: 4>, scalar_prefetch = 0 : i64, scratch_operands = 0 : i64, tpu.core_type = #tpu.core_type<tc>, window_params = [{transform_indices = @transform_0, window_bounds = array<i64: 128, 72>}, {pipeline_mode = #tpu.pipeline_mode<synchronous>, transform_indices = @transform_1, window_bounds = array<i64: 72, 3>}, {pipeline_mode = #tpu.pipeline_mode<synchronous>, transform_indices = @transform_2, window_bounds = array<i64: 1, 3>}, {transform_indices = @transform_3, window_bounds = array<i64: 128, 3>}]} {
    %c0 = arith.constant 0 : index
    %c0_0 = arith.constant 0 : index
    %0 = vector.load %arg1[%c0, %c0_0] : memref<128x72xf32, #tpu.memory_space<vmem>>, vector<128x72xf32>
    %1 = arith.truncf %0 : vector<128x72xf32> to vector<128x72xbf16>
    %c0_1 = arith.constant 0 : index
    %c0_2 = arith.constant 0 : index
    %2 = vector.load %arg2[%c0_1, %c0_2] : memref<72x3xbf16, #tpu.memory_space<vmem>>, vector<72x3xbf16>
    %cst = arith.constant dense<0.000000e+00> : vector<128x3xf32>
    %3 = tpu.matmul %1, %2, %cst {dimension_numbers = #tpu.dot_dimension_numbers<[1], [0], [0], [1], [0, 0, 1, 1], [], []>} : vector<128x72xbf16>, vector<72x3xbf16>, vector<128x3xf32> -> vector<128x3xf32>
    %c0_3 = arith.constant 0 : index
    %c0_4 = arith.constant 0 : index
    %4 = vector.load %arg3[%c0_3, %c0_4] : memref<1x3xf32, #tpu.memory_space<vmem>>, vector<1x3xf32>
    %5 = vector.broadcast %4 : vector<1x3xf32> to vector<128x3xf32>
    %6 = arith.addf %3, %5 : vector<128x3xf32>
    %cst_5 = arith.constant -1.000000e+00 : f32
    %cst_6 = arith.constant 1.000000e+00 : f32
    %7 = vector.broadcast %cst_5 : f32 to vector<128x3xf32>
    %8 = arith.maximumf %7, %6 : vector<128x3xf32>
    %9 = vector.broadcast %cst_6 : f32 to vector<128x3xf32>
    %10 = arith.minimumf %9, %8 : vector<128x3xf32>
    %cst_7 = arith.constant 5.000000e-01 : f32
    %11 = vector.broadcast %cst_7 : f32 to vector<128x3xf32>
    %12 = arith.mulf %10, %11 : vector<128x3xf32>
    %cst_8 = arith.constant 5.000000e-01 : f32
    %13 = vector.broadcast %cst_8 : f32 to vector<128x3xf32>
    %14 = arith.addf %12, %13 : vector<128x3xf32>
    %c0_9 = arith.constant 0 : index
    %c0_10 = arith.constant 0 : index
    %15 = vector.load %arg4[%c0_9, %c0_10] : memref<128x3xf32, #tpu.memory_space<vmem>>, vector<128x3xf32>
    tpu.vector_store %arg4[%c0_9, %c0_10], %14 {strides = array<i32>} : memref<128x3xf32, #tpu.memory_space<vmem>>, vector<128x3xf32>,
    return
  }
  func.func @transform_0(%arg0: i32) -> (i32, i32) {
    %c0_i32 = arith.constant 0 : i32
    %c0_i32_0 = arith.constant 0 : i32
    return %arg0, %c0_i32 : i32, i32
  }
  func.func @transform_1(%arg0: i32) -> (i32, i32) {
    %c0_i32 = arith.constant 0 : i32
    %c0_i32_0 = arith.constant 0 : i32
    %c0_i32_1 = arith.constant 0 : i32
    return %c0_i32, %c0_i32_0 : i32, i32
  }
  func.func @transform_2(%arg0: i32) -> (i32, i32) {
    %c0_i32 = arith.constant 0 : i32
    %c0_i32_0 = arith.constant 0 : i32
    %c0_i32_1 = arith.constant 0 : i32
    return %c0_i32, %c0_i32_0 : i32, i32
  }
  func.func @transform_3(%arg0: i32) -> (i32, i32) {
    %c0_i32 = arith.constant 0 : i32
    %c0_i32_0 = arith.constant 0 : i32
    return %arg0, %c0_i32 : i32, i32
  }
}

</mosaic_0001>

<bundles_post_ra>
// kernel: codeformer_forward.6
= control target key start
LH: loop header
LB: loop body
LE: loop exit
PB: predicated region body
PF: predicated region fallthrough
CT: control target
= control target key end

     0   :  { %vm118_vm0 = vcmask 1044480   ;;  %vm119_vm1 = vcmask 1045504   ;;  %v339_v1 = vmov 65535   ;;  %vm93_vm2 = vcmask 220160   ;;  %s507_s1 = inlined_call_operand.vmem [shape: bf16[27,8], index: 1, kind: input, shape index: {}]   ;;  %s508_s0 = inlined_call_operand.vmem [shape: f32[128,27], index: 0, kind: input, shape index: {}]   ;;  %s509_s2 = inlined_call_operand.vmem [shape: f32[1,8], index: 2, kind: input, shape index: {}]   ;;  %s510_s3 = inlined_call_operand.vmem [shape: f32[128,8], index: 3, kind: output, shape index: {}]  }
   0x1   :  { %v337_v0 = vld [vmem:[%s507_s1] sm:$0xff]   ;;  %v120_v2 = vsel %vm118_vm0, 4294967295, %v339_v1  ;;  %v338_v3 = vld [vmem:[%s507_s1 + $0x8] sm:$0x3f]   ;;  %v17_v13 = vld [vmem:[%s508_s0 + $0x10] sm:$0xff]  ;;  %vm270_vm3 = vcmask 64512  }
   0x2   :  { %312 = vmatprep.subr.bf16.mxu0 %v337_v0  ;;  %332 = vmatprep.subr.bf16.mxu1 %v337_v0  ;;  %v121_v4 = vsel %vm119_vm1, %v120_v2, 0  ;;  %v15_v5 = vld [vmem:[%s508_s0] sm:$0xff]  ;;  %v16_v6 = vld [vmem:[%s508_s0 + $0x8] sm:$0xff]  ;;  %v18_v14 = vld [vmem:[%s508_s0 + $0x18] sm:$0xff]  ;;  %v33_v16 = vmul.f32 2.0, %v17_v13 }
   0x3   :  { %v23_v7 = vld [vmem:[%s508_s0 + $0x40] sm:$0xff]  ;;  %313 = vmatpush3.bf16.msra.mxu0 %v337_v0  ;;  %334 = vmatpush3.bf16.msra.mxu1 %v337_v0  ;;  %v123_v8 = vand.u32 %v338_v3, %v121_v4  ;;  %v31_v9 = vmul.f32 2.0, %v15_v5  ;;  %v32_v10 = vmul.f32 2.0, %v16_v6  ;;  %v24_v11 = vld [vmem:[%s508_s0 + $0x48] sm:$0xff]  ;;  %v34_v17 = vmul.f32 2.0, %v18_v14  ;;  %v25_v18 = vld [vmem:[%s508_s0 + $0x50] sm:$0xff] }
   0x4   :  { %v39_v12 = vmul.f32 2.0, %v23_v7  ;;  %v40_v15 = vmul.f32 2.0, %v24_v11  ;;  %v26_v19 = vld [vmem:[%s508_s0 + $0x58] sm:$0xff]  ;;  %v19_v20 = vld [vmem:[%s508_s0 + $0x20] sm:$0xff]  ;;  %v41_v24 = vmul.f32 2.0, %v25_v18  ;;  %v20_v25 = vld [vmem:[%s508_s0 + $0x28] sm:$0xff] }
   0x5   :  { %314 = vmatprep.subr.bf16.mxu0 %v123_v8  ;;  %333 = vmatprep.subr.bf16.mxu1 %v123_v8  ;;  %v47_v21 = vadd.f32 -1.0, %v31_v9  ;;  %v48_v22 = vadd.f32 -1.0, %v32_v10  ;;  %v27_v26 = vld [vmem:[%s508_s0 + $0x60] sm:$0xff]  ;;  %v49_v28 = vadd.f32 -1.0, %v33_v16  ;;  %v50_v29 = vadd.f32 -1.0, %v34_v17  ;;  %v28_v31 = vld [vmem:[%s508_s0 + $0x68] sm:$0xff] }
   0x6   :  { %v55_v23 = vadd.f32 -1.0, %v39_v12  ;;  %v56_v27 = vadd.f32 -1.0, %v40_v15  ;;  %v42_v30 = vmul.f32 2.0, %v26_v19  ;;  %v21_v32 = vld [vmem:[%s508_s0 + $0x30] sm:$0xff]  ;;  %v57_v34 = vadd.f32 -1.0, %v41_v24  ;;  %v22_v37 = vld [vmem:[%s508_s0 + $0x38] sm:$0xff] }
   0x7   :  { %315 = vmatpush3.bf16.msra.mxu0 %v123_v8  ;;  %335 = vmatpush3.bf16.msra.mxu1 %v123_v8  ;;  %v63_v33 = vpack.c.bf16 %v48_v22, %v47_v21  ;;  %v35_v35 = vmul.f32 2.0, %v19_v20  ;;  %v36_v36 = vmul.f32 2.0, %v20_v25  ;;  %v29_v38 = vld [vmem:[%s508_s0 + $0x70] sm:$0xff]  ;;  %v64_v40 = vpack.c.bf16 %v50_v29, %v49_v28  ;;  %v30_v43 = vld [vmem:[%s508_s0 + $0x78] sm:$0xff]  ;;  %v425_v62 = vld [vmem:[%s509_s2] ss:$0 sm:$0xff] }
   0x8   :  { %v67_v39 = vpack.c.bf16 %v56_v27, %v55_v23  ;;  %v58_v41 = vadd.f32 -1.0, %v42_v30  ;;  %v43_v42 = vmul.f32 2.0, %v27_v26  ;;  %v44_v46 = vmul.f32 2.0, %v28_v31 }
   0x9   :  { %316 = vmatprep.mubr.msk.bf16.mxu0 %vm93_vm2, %v63_v33  ;;  %v51_v44 = vadd.f32 -1.0, %v35_v35  ;;  %v52_v45 = vadd.f32 -1.0, %v36_v36  ;;  %v37_v47 = vmul.f32 2.0, %v21_v32  ;;  %v38_v50 = vmul.f32 2.0, %v22_v37 }
   0xa   :  { %324 = vmatprep.mubr.msk.bf16.mxu1 %vm93_vm2, %v67_v39  ;;  %317 = vmatmul.mubr.msk.bf16.vlgmr.msra.gmra.mrb[0].mxu0 %vm93_vm2, %v64_v40  ;;  %v68_v48 = vpack.c.bf16 %v58_v41, %v57_v34  ;;  %v59_v49 = vadd.f32 -1.0, %v43_v42  ;;  %v45_v51 = vmul.f32 2.0, %v29_v38  ;;  %v60_v53 = vadd.f32 -1.0, %v44_v46 }
   0xb   :  { %v65_v52 = vpack.c.bf16 %v52_v45, %v51_v44  ;;  %v53_v54 = vadd.f32 -1.0, %v37_v47  ;;  %v46_v55 = vmul.f32 2.0, %v30_v43  ;;  %v54_v56 = vadd.f32 -1.0, %v38_v50 }
   0xc   :  { %325 = vmatmul.mubr.msk.bf16.vlgmr.msra.gmra.mrb[0].mxu1 %vm93_vm2, %v68_v48  ;;  %v61_v57 = vadd.f32 -1.0, %v45_v51  ;;  %v69_v58 = vpack.c.bf16 %v60_v53, %v59_v49 }
   0xd   :  { %320 = vmatprep.mubr.msk.bf16.mxu0 %vm93_vm2, %v65_v52  ;;  %v62_v59 = vadd.f32 -1.0, %v46_v55  ;;  %v66_v60 = vpack.c.bf16 %v54_v56, %v53_v54 }
   0xe   :  { %328 = vmatprep.mubr.msk.bf16.mxu1 %vm93_vm2, %v69_v58 }
   0xf   :  { %v70_v61 = vpack.c.bf16 %v62_v59, %v61_v57 }
  0x12   :  { %321 = vmatmul.mubr.msk.bf16.gmra.mrb[4].mxu0 %vm93_vm2, %v66_v60 }
  0x14   :  { %329 = vmatmul.mubr.msk.bf16.gmra.mrb[4].mxu1 %vm93_vm2, %v70_v61 }
  0xdd   :  { %v318_v63 = vpop.f32.mrb[0].mxu0 }
  0xde   :  { %v168_v0 = vadd.f32 %v318_v63, %v425_v62  ;;  %v159_v1 = vpop.f32.mrb[1].mxu0 }
  0xdf   :  { %v326_v2 = vpop.f32.mrb[0].mxu1  ;;  %v160_v3 = vadd.f32 %v425_v62, %v159_v1  ;;  %v319_v4 = vpop.f32.mrb[2].mxu0 }
  0xe0   :  { %vm224_vm4 = vcmp.ge.f32.partialorder %v168_v0, 0.0  ;;  %v240_v5 = vmul.f32 0.2, %v168_v0  ;;  %v200_v6 = vadd.f32 %v326_v2, %v425_v62  ;;  %v191_v7 = vpop.f32.mrb[1].mxu1  ;;  %v171_v8 = vadd.f32 %v319_v4, %v425_v62  ;;  %v162_v9 = vpop.f32.mrb[3].mxu0 }
  0xe1   :  { %vm222_vm5 = vcmp.ge.f32.partialorder %v160_v3, 0.0  ;;  %v238_v10 = vmul.f32 0.2, %v160_v3  ;;  %v192_v11 = vadd.f32 %v425_v62, %v191_v7  ;;  %v327_v12 = vpop.f32.mrb[2].mxu1  ;;  %v163_v13 = vadd.f32 %v425_v62, %v162_v9 }
  0xe2   :  { %v256_v14 = vsel %vm224_vm4, %v168_v0, %v240_v5  ;;  %vm232_vm6 = vcmp.ge.f32.partialorder %v200_v6, 0.0  ;;  %v248_v15 = vmul.f32 0.2, %v200_v6  ;;  %vm225_vm7 = vcmp.ge.f32.partialorder %v171_v8, 0.0  ;;  %v194_v16 = vpop.f32.mrb[3].mxu1 }
  0xe3   :  { %273 = vst.msk [vmem:[%s510_s3 + $0x10] sm:$0xff] %vm270_vm3, %v256_v14  ;;  %v254_v17 = vsel %vm222_vm5, %v160_v3, %v238_v10  ;;  %vm230_vm8 = vcmp.ge.f32.partialorder %v192_v11, 0.0  ;;  %v246_v18 = vmul.f32 0.2, %v192_v11  ;;  %v241_v19 = vmul.f32 0.2, %v171_v8 }
  0xe4   :  { %v264_v20 = vsel %vm232_vm6, %v200_v6, %v248_v15  ;;  %271 = vst.msk [vmem:[%s510_s3] sm:$0xff] %vm270_vm3, %v254_v17  ;;  %v203_v21 = vadd.f32 %v327_v12, %v425_v62  ;;  %vm223_vm9 = vcmp.ge.f32.partialorder %v163_v13, 0.0  ;;  %v239_v22 = vmul.f32 0.2, %v163_v13 }
  0xe5   :  { %281 = vst.msk [vmem:[%s510_s3 + $0x50] sm:$0xff] %vm270_vm3, %v264_v20  ;;  %v262_v23 = vsel %vm230_vm8, %v192_v11, %v246_v18  ;;  %v257_v24 = vsel %vm225_vm7, %v171_v8, %v241_v19  ;;  %v195_v25 = vadd.f32 %v425_v62, %v194_v16  ;;  %v322_v26 = vpop.f32.mrb[4].mxu0 }
  0xe6   :  { %279 = vst.msk [vmem:[%s510_s3 + $0x40] sm:$0xff] %vm270_vm3, %v262_v23  ;;  %274 = vst.msk [vmem:[%s510_s3 + $0x18] sm:$0xff] %vm270_vm3, %v257_v24  ;;  %vm233_vm10 = vcmp.ge.f32.partialorder %v203_v21, 0.0  ;;  %v249_v27 = vmul.f32 0.2, %v203_v21  ;;  %v255_v28 = vsel %vm223_vm9, %v163_v13, %v239_v22  ;;  %v184_v29 = vadd.f32 %v322_v26, %v425_v62  ;;  %v175_v30 = vpop.f32.mrb[5].mxu0 }
  0xe7   :  { %272 = vst.msk [vmem:[%s510_s3 + $0x8] sm:$0xff] %vm270_vm3, %v255_v28  ;;  %vm231_vm11 = vcmp.ge.f32.partialorder %v195_v25, 0.0  ;;  %v247_v31 = vmul.f32 0.2, %v195_v25  ;;  %v330_v32 = vpop.f32.mrb[4].mxu1  ;;  %v176_v33 = vadd.f32 %v425_v62, %v175_v30  ;;  %v323_v34 = vpop.f32.mrb[6].mxu0 }
  0xe8   :  { %v265_v35 = vsel %vm233_vm10, %v203_v21, %v249_v27  ;;  %vm228_vm12 = vcmp.ge.f32.partialorder %v184_v29, 0.0  ;;  %v244_v36 = vmul.f32 0.2, %v184_v29  ;;  %v216_v37 = vadd.f32 %v330_v32, %v425_v62  ;;  %v207_v38 = vpop.f32.mrb[5].mxu1  ;;  %v178_v39 = vpop.f32.mrb[7].mxu0 }
  0xe9   :  { %282 = vst.msk [vmem:[%s510_s3 + $0x58] sm:$0xff] %vm270_vm3, %v265_v35  ;;  %v263_v40 = vsel %vm231_vm11, %v195_v25, %v247_v31  ;;  %vm226_vm13 = vcmp.ge.f32.partialorder %v176_v33, 0.0  ;;  %v242_v41 = vmul.f32 0.2, %v176_v33  ;;  %v208_v42 = vadd.f32 %v425_v62, %v207_v38  ;;  %v331_v43 = vpop.f32.mrb[6].mxu1 }
  0xea   :  { %280 = vst.msk [vmem:[%s510_s3 + $0x48] sm:$0xff] %vm270_vm3, %v263_v40  ;;  %v260_v44 = vsel %vm228_vm12, %v184_v29, %v244_v36  ;;  %vm236_vm14 = vcmp.ge.f32.partialorder %v216_v37, 0.0  ;;  %v252_v45 = vmul.f32 0.2, %v216_v37  ;;  %v187_v46 = vadd.f32 %v323_v34, %v425_v62  ;;  %v210_v47 = vpop.f32.mrb[7].mxu1 }
  0xeb   :  { %277 = vst.msk [vmem:[%s510_s3 + $0x30] sm:$0xff] %vm270_vm3, %v260_v44  ;;  %v258_v48 = vsel %vm226_vm13, %v176_v33, %v242_v41  ;;  %vm234_vm15 = vcmp.ge.f32.partialorder %v208_v42, 0.0  ;;  %v250_v49 = vmul.f32 0.2, %v208_v42  ;;  %v219_v50 = vadd.f32 %v331_v43, %v425_v62 }
  0xec   :  { %v268_v51 = vsel %vm236_vm14, %v216_v37, %v252_v45  ;;  %275 = vst.msk [vmem:[%s510_s3 + $0x20] sm:$0xff] %vm270_vm3, %v258_v48  ;;  %vm229_vm0 = vcmp.ge.f32.partialorder %v187_v46, 0.0  ;;  %v245_v52 = vmul.f32 0.2, %v187_v46  ;;  %v179_v53 = vadd.f32 %v425_v62, %v178_v39 }
  0xed   :  { %285 = vst.msk [vmem:[%s510_s3 + $0x70] sm:$0xff] %vm270_vm3, %v268_v51  ;;  %v266_v54 = vsel %vm234_vm15, %v208_v42, %v250_v49  ;;  %vm237_vm1 = vcmp.ge.f32.partialorder %v219_v50, 0.0  ;;  %v253_v55 = vmul.f32 0.2, %v219_v50  ;;  %v211_v56 = vadd.f32 %v425_v62, %v210_v47 }
  0xee   :  { %283 = vst.msk [vmem:[%s510_s3 + $0x60] sm:$0xff] %vm270_vm3, %v266_v54  ;;  %v261_v57 = vsel %vm229_vm0, %v187_v46, %v245_v52  ;;  %vm227_vm2 = vcmp.ge.f32.partialorder %v179_v53, 0.0  ;;  %v243_v58 = vmul.f32 0.2, %v179_v53 }
  0xef   :  { %278 = vst.msk [vmem:[%s510_s3 + $0x38] sm:$0xff] %vm270_vm3, %v261_v57  ;;  %v269_v59 = vsel %vm237_vm1, %v219_v50, %v253_v55  ;;  %vm235_vm4 = vcmp.ge.f32.partialorder %v211_v56, 0.0  ;;  %v251_v60 = vmul.f32 0.2, %v211_v56 }
  0xf0   :  { %286 = vst.msk [vmem:[%s510_s3 + $0x78] sm:$0xff] %vm270_vm3, %v269_v59  ;;  %v259_v61 = vsel %vm227_vm2, %v179_v53, %v243_v58 }
  0xf1   :  { %276 = vst.msk [vmem:[%s510_s3 + $0x28] sm:$0xff] %vm270_vm3, %v259_v61  ;;  %v267_v62 = vsel %vm235_vm4, %v211_v56, %v251_v60 }
  0xf2   :  { %284 = vst.msk [vmem:[%s510_s3 + $0x68] sm:$0xff] %vm270_vm3, %v267_v62 }

// kernel: codeformer_forward.7
= control target key start
LH: loop header
LB: loop body
LE: loop exit
PB: predicated region body
PF: predicated region fallthrough
CT: control target
= control target key end

     0   :  { %vm72_vm0 = vcmask 588800   ;;  %vm79_vm1 = vcmask 1043456   ;;  %vm144_vm3 = vcmask 130048   ;;  %vm221_vm7 = vcmask 261120   ;;  %s386_s1 = inlined_call_operand.vmem [shape: bf16[72,16], index: 1, kind: input, shape index: {}]   ;;  %s387_s0 = inlined_call_operand.vmem [shape: f32[32,72], index: 0, kind: input, shape index: {}]   ;;  %s388_s3 = inlined_call_operand.vmem [shape: bf16[16,32], index: 3, kind: input, shape index: {}]   ;;  %s389_s2 = inlined_call_operand.vmem [shape: f32[1,16], index: 2, kind: input, shape index: {}]   ;;  %s390_s5 = inlined_call_operand.vmem [shape: f32[32,16], index: 5, kind: output, shape index: {0}]   ;;  %s391_s4 = inlined_call_operand.vmem [shape: f32[1,32], index: 4, kind: input, shape index: {}]   ;;  %s392_s6 = inlined_call_operand.vmem [shape: f32[32,32], index: 6, kind: output, shape index: {1}]  }
   0x1   :  { %v277_v0 = vld [vmem:[%s386_s1] sm:$0xff]   ;;  %v278_v1 = vld [vmem:[%s386_s1 + $0x8] sm:$0xff]   ;;  %v279_v2 = vld [vmem:[%s386_s1 + $0x10] sm:$0xff]  }
   0x2   :  { %256 = vmatprep.subr.bf16.mxu0 %v277_v0  ;;  %v23_v3 = vld [vmem:[%s387_s0] sm:$0xff]  ;;  %v24_v4 = vld [vmem:[%s387_s0 + $0x8] sm:$0xff]  ;;  %v280_v6 = vld [vmem:[%s386_s1 + $0x18] sm:$0xff]  }
   0x3   :  { %257 = vmatpush3.bf16.msra.mxu0 %v277_v0  ;;  %v27_v5 = vpack.c.bf16 %v24_v4, %v23_v3  ;;  %v281_v7 = vld [vmem:[%s386_s1 + $0x20] ss:$0 sps:$4 sm:$0xff]   ;;  %v25_v8 = vld [vmem:[%s387_s0 + $0x10] sm:$0xff]  ;;  %v26_v9 = vld [vmem:[%s387_s0 + $0x18] sm:$0xff] }
   0x4   :  { %258 = vmatprep.subr.bf16.mxu0 %v278_v1  ;;  %v81_v10 = vsel %vm79_vm1, %v281_v7, 0  ;;  %v28_v11 = vpack.c.bf16 %v26_v9, %v25_v8  ;;  %v282_v12 = vld [vmem:[%s388_s3] sm:$0xff]  }
   0x5   :  { %266 = vmatprep.mubr.msk.bf16.mxu0 %vm72_vm0, %v27_v5  ;;  %270 = vmatprep.subr.bf16.mxu1 %v282_v12  ;;  %v234_v13 = vld [vmem:[%s389_s2] ss:$0 sm:$0xff] }
   0x6   :  { %271 = vmatpush3.bf16.msra.mxu1 %v282_v12  ;;  %v242_v32 = vld [vmem:[%s391_s4] ss:$0 sm:$0xff] }
   0x7   :  { %259 = vmatpush3.bf16.msra.mxu0 %v278_v1 }
   0x8   :  { %260 = vmatprep.subr.bf16.mxu0 %v279_v2 }
   0xb   :  { %261 = vmatpush3.bf16.msra.mxu0 %v279_v2 }
   0xc   :  { %262 = vmatprep.subr.bf16.mxu0 %v280_v6 }
   0xf   :  { %263 = vmatpush3.bf16.msra.mxu0 %v280_v6 }
  0x10   :  { %276 = vmatprep.subr.msk.bf16.mxu0 %vm79_vm1, %v281_v7 }
  0x13   :  { %265 = vmatpush3.bf16.msra.mxu0 %v81_v10 }
  0x16   :  { %267 = vmatmul.mubr.msk.bf16.vlgmr.msra.gmra.mrb[0].mxu0 %vm72_vm0, %v28_v11 }
  0xe9   :  { %v268_v14 = vpop.f32.mrb[0].mxu0 }
  0xea   :  { %v126_v15 = vadd.f32 %v268_v14, %v234_v13  ;;  %v117_v16 = vpop.f32.mrb[1].mxu0 }
  0xeb   :  { %v118_v17 = vadd.f32 %v234_v13, %v117_v16  ;;  %v269_v18 = vpop.f32.mrb[2].mxu0 }
  0xec   :  { %vm134_vm2 = vcmp.ge.f32.partialorder %v126_v15, 0.0  ;;  %v138_v19 = vmul.f32 0.2, %v126_v15  ;;  %v129_v20 = vadd.f32 %v269_v18, %v234_v13  ;;  %v120_v21 = vpop.f32.mrb[3].mxu0 }
  0xed   :  { %v136_v22 = vmul.f32 0.2, %v118_v17  ;;  %v121_v23 = vadd.f32 %v234_v13, %v120_v21  ;;  %vm132_vm4 = vcmp.ge.f32.partialorder %v118_v17, 0.0 }
  0xee   :  { %v142_v24 = vsel %vm134_vm2, %v126_v15, %v138_v19  ;;  %vm135_vm5 = vcmp.ge.f32.partialorder %v129_v20, 0.0  ;;  %v139_v25 = vmul.f32 0.2, %v129_v20 }
  0xef   :  { %147 = vst.msk [vmem:[%s390_s5 + $0x10] sm:$0xff] %vm144_vm3, %v142_v24  ;;  %v137_v26 = vmul.f32 0.2, %v121_v23  ;;  %vm133_vm6 = vcmp.ge.f32.partialorder %v121_v23, 0.0  ;;  %v140_v27 = vsel %vm132_vm4, %v118_v17, %v136_v22 }
  0xf0   :  { %v143_v28 = vsel %vm135_vm5, %v129_v20, %v139_v25  ;;  %145 = vst.msk [vmem:[%s390_s5] sm:$0xff] %vm144_vm3, %v140_v27 }
  0xf1   :  { %148 = vst.msk [vmem:[%s390_s5 + $0x18] sm:$0xff] %vm144_vm3, %v143_v28  ;;  %v150_v29 = vpack.c.bf16 %v143_v28, %v142_v24  ;;  %v141_v30 = vsel %vm133_vm6, %v121_v23, %v137_v26 }
  0xf2   :  { %146 = vst.msk [vmem:[%s390_s5 + $0x8] sm:$0xff] %vm144_vm3, %v141_v30  ;;  %v149_v31 = vpack.c.bf16 %v141_v30, %v140_v27 }
  0xf4   :  { %272 = vmatprep.mubr.msk.bf16.mxu1 %vm144_vm3, %v149_v31 }
  0xf5   :  { %273 = vmatmul.mubr.msk.bf16.vlgmr.msra.gmra.mrb[0].mxu1 %vm144_vm3, %v150_v29 }
 0x1c8   :  { %v274_v33 = vpop.f32.mrb[0].mxu1 }
 0x1c9   :  { %v215_v34 = vadd.f32 %v274_v33, %v242_v32  ;;  %v206_v35 = vpop.f32.mrb[1].mxu1 }
 0x1ca   :  { %v207_v36 = vadd.f32 %v242_v32, %v206_v35  ;;  %v275_v37 = vpop.f32.mrb[2].mxu1 }
 0x1cb   :  { %224 = vst.msk [vmem:[%s392_s6 + $0x10] sm:$0xff] %vm221_vm7, %v215_v34  ;;  %v218_v38 = vadd.f32 %v275_v37, %v242_v32  ;;  %v209_v39 = vpop.f32.mrb[3].mxu1 }
 0x1cc   :  { %222 = vst.msk [vmem:[%s392_s6] sm:$0xff] %vm221_vm7, %v207_v36  ;;  %v210_v40 = vadd.f32 %v242_v32, %v209_v39 }
 0x1cd   :  { %225 = vst.msk [vmem:[%s392_s6 + $0x18] sm:$0xff] %vm221_vm7, %v218_v38 }
 0x1ce   :  { %223 = vst.msk [vmem:[%s392_s6 + $0x8] sm:$0xff] %vm221_vm7, %v210_v40 }

// kernel: codeformer_forward.9
= control target key start
LH: loop header
LB: loop body
LE: loop exit
PB: predicated region body
PF: predicated region fallthrough
CT: control target
= control target key end

     0   :  { %v223_v0 = vmov 0   ;;  %vm106_vm0 = vcmask 130048   ;;  %vm174_vm1 = vcmask 64512   ;;  %s314_s1 = inlined_call_operand.vmem [shape: bf16[144,8], index: 1, kind: input, shape index: {}]   ;;  %s315_s0 = inlined_call_operand.vmem [shape: f32[32,144], index: 0, kind: input, shape index: {}]   ;;  %s316_s2 = inlined_call_operand.vmem [shape: f32[1,8], index: 2, kind: input, shape index: {}]   ;;  %s317_s3 = inlined_call_operand.vmem [shape: f32[32,8], index: 3, kind: output, shape index: {}]  }
   0x1   :  { %113 = vmatprep.subr.bf16.mxu0 %v223_v0  ;;  %195 = vmatprep.subr.bf16.mxu1 %v223_v0  ;;  %v214_v1 = vld [vmem:[%s314_s1] sm:$0xff]   ;;  %v215_v2 = vld [vmem:[%s314_s1 + $0x8] sm:$0xff]   ;;  %v216_v3 = vld [vmem:[%s314_s1 + $0x10] sm:$0xff]  }
   0x2   :  { %114 = vmatpush1.bf16.msra.mxu0 %v214_v1  ;;  %204 = vmatpush1.bf16.msra.mxu1 %v214_v1  ;;  %v16_v4 = vld [vmem:[%s315_s0 + $0x8] sm:$0xff]  ;;  %v18_v5 = vld [vmem:[%s315_s0 + $0x18] sm:$0xff]  ;;  %v218_v11 = vld [vmem:[%s314_s1 + $0x20] sm:$0xff]  }
   0x3   :  { %115 = vmatprep.subr.bf16.mxu0 %v223_v0  ;;  %196 = vmatprep.subr.bf16.mxu1 %v223_v0  ;;  %v20_v6 = vld [vmem:[%s315_s0 + $0x28] sm:$0xff]  ;;  %v217_v7 = vld [vmem:[%s314_s1 + $0x18] sm:$0xff]   ;;  %v24_v8 = vpack.c.bf16 %v18_v5, %v16_v4  ;;  %v220_v13 = vld [vmem:[%s314_s1 + $0x30] sm:$0xff]  }
   0x4   :  { %v22_v9 = vld [vmem:[%s315_s0 + $0x38] sm:$0xff]  ;;  %v219_v12 = vld [vmem:[%s314_s1 + $0x28] sm:$0xff]   ;;  %v222_v15 = vld [vmem:[%s314_s1 + $0x40] sm:$0xff]  }
   0x5   :  { %v26_v10 = vpack.c.bf16 %v22_v9, %v20_v6  ;;  %193 = vmatprep.mubr.msk.bf16.mxu0 %vm106_vm0, %v24_v8  ;;  %v221_v14 = vld [vmem:[%s314_s1 + $0x38] sm:$0xff]   ;;  %v15_v16 = vld [vmem:[%s315_s0] sm:$0xff]  ;;  %v17_v17 = vld [vmem:[%s315_s0 + $0x10] sm:$0xff] }
   0x6   :  { %116 = vmatpush1.bf16.msra.mxu0 %v215_v2  ;;  %205 = vmatpush1.bf16.msra.mxu1 %v215_v2  ;;  %v19_v18 = vld [vmem:[%s315_s0 + $0x20] sm:$0xff]  ;;  %v21_v19 = vld [vmem:[%s315_s0 + $0x30] sm:$0xff]  ;;  %v23_v20 = vpack.c.bf16 %v17_v17, %v15_v16 }
   0x7   :  { %117 = vmatprep.subr.bf16.mxu0 %v223_v0  ;;  %197 = vmatprep.subr.bf16.mxu1 %v223_v0  ;;  %v25_v21 = vpack.c.bf16 %v21_v19, %v19_v18  ;;  %v183_v22 = vld [vmem:[%s316_s2] ss:$0 sm:$0xff] }
   0x8   :  { %194 = vmatprep.mubr.msk.bf16.mxu1 %vm106_vm0, %v26_v10 }
   0xa   :  { %118 = vmatpush1.bf16.msra.mxu0 %v216_v3  ;;  %206 = vmatpush1.bf16.msra.mxu1 %v216_v3 }
   0xb   :  { %119 = vmatprep.subr.bf16.mxu0 %v223_v0  ;;  %198 = vmatprep.subr.bf16.mxu1 %v223_v0 }
   0xe   :  { %120 = vmatpush1.bf16.msra.mxu0 %v217_v7  ;;  %207 = vmatpush1.bf16.msra.mxu1 %v217_v7 }
   0xf   :  { %121 = vmatprep.subr.bf16.mxu0 %v223_v0  ;;  %199 = vmatprep.subr.bf16.mxu1 %v223_v0 }
  0x12   :  { %122 = vmatpush1.bf16.msra.mxu0 %v218_v11  ;;  %208 = vmatpush1.bf16.msra.mxu1 %v218_v11 }
  0x13   :  { %123 = vmatprep.subr.bf16.mxu0 %v223_v0  ;;  %200 = vmatprep.subr.bf16.mxu1 %v223_v0 }
  0x16   :  { %124 = vmatpush1.bf16.msra.mxu0 %v219_v12  ;;  %209 = vmatpush1.bf16.msra.mxu1 %v219_v12 }
  0x17   :  { %125 = vmatprep.subr.bf16.mxu0 %v223_v0  ;;  %201 = vmatprep.subr.bf16.mxu1 %v223_v0 }
  0x1a   :  { %126 = vmatpush1.bf16.msra.mxu0 %v220_v13  ;;  %210 = vmatpush1.bf16.msra.mxu1 %v220_v13 }
  0x1b   :  { %127 = vmatprep.subr.bf16.mxu0 %v223_v0  ;;  %202 = vmatprep.subr.bf16.mxu1 %v223_v0 }
  0x1e   :  { %128 = vmatpush1.bf16.msra.mxu0 %v221_v14  ;;  %211 = vmatpush1.bf16.msra.mxu1 %v221_v14 }
  0x1f   :  { %129 = vmatprep.subr.bf16.mxu0 %v223_v0  ;;  %203 = vmatprep.subr.bf16.mxu1 %v223_v0 }
  0x22   :  { %130 = vmatpush1.bf16.msra.mxu0 %v222_v15  ;;  %212 = vmatpush1.bf16.msra.mxu1 %v222_v15 }
  0x25   :  { %146 = vmatmul.mubr.bf16.vlgmr.msra.gmra.mrb[0].mxu0 %v23_v20  ;;  %154 = vmatmul.mubr.bf16.vlgmr.msra.gmra.mrb[0].mxu1 %v25_v21 }
  0xf8   :  { %v147_v23 = vpop.f32.mrb[0].mxu0  ;;  %v155_v24 = vpop.f32.mrb[0].mxu1 }
  0xf9   :  { %v148_v25 = vadd.f32 %v183_v22, %v147_v23  ;;  %v156_v26 = vadd.f32 %v183_v22, %v155_v24  ;;  %v149_v27 = vpop.f32.mrb[1].mxu0  ;;  %v157_v28 = vpop.f32.mrb[1].mxu1 }
  0xfa   :  { %v150_v29 = vpop.f32.mrb[2].mxu0  ;;  %v158_v30 = vpop.f32.mrb[2].mxu1 }
  0xfb   :  { %vm162_vm2 = vcmp.ge.f32.partialorder %v148_v25, 0.0  ;;  %v166_v31 = vmul.f32 0.2, %v148_v25  ;;  %vm164_vm3 = vcmp.ge.f32.partialorder %v156_v26, 0.0  ;;  %v168_v32 = vmul.f32 0.2, %v156_v26 }
  0xfc   :  { %v151_v33 = vadd.f32 %v183_v22, %v150_v29  ;;  %v159_v34 = vadd.f32 %v183_v22, %v158_v30  ;;  %v152_v35 = vpop.f32.mrb[3].mxu0  ;;  %v160_v36 = vpop.f32.mrb[3].mxu1 }
  0xfd   :  { %v170_v37 = vsel %vm162_vm2, %v148_v25, %v166_v31  ;;  %v172_v38 = vsel %vm164_vm3, %v156_v26, %v168_v32 }
  0xfe   :  { %175 = vst.msk [vmem:[%s317_s3] sm:$0xff] %vm174_vm1, %v170_v37  ;;  %177 = vst.msk [vmem:[%s317_s3 + $0x10] sm:$0xff] %vm174_vm1, %v172_v38  ;;  %vm163_vm4 = vcmp.ge.f32.partialorder %v151_v33, 0.0  ;;  %v167_v39 = vmul.f32 0.2, %v151_v33  ;;  %vm165_vm5 = vcmp.ge.f32.partialorder %v159_v34, 0.0 }
  0xff   :  { %v169_v40 = vmul.f32 0.2, %v159_v34 }
 0x100   :  { %v171_v41 = vsel %vm163_vm4, %v151_v33, %v167_v39 }
 0x101   :  { %v173_v42 = vsel %vm165_vm5, %v159_v34, %v169_v40  ;;  %176 = vst.msk [vmem:[%s317_s3 + $0x8] sm:$0xff] %vm174_vm1, %v171_v41 }
 0x102   :  { %178 = vst.msk [vmem:[%s317_s3 + $0x18] sm:$0xff] %vm174_vm1, %v173_v42 }

// kernel: codeformer_forward.10
= control target key start
LH: loop header
LB: loop body
LE: loop exit
PB: predicated region body
PF: predicated region fallthrough
CT: control target
= control target key end

     0   :  { %vm133_vm0 = vcmask 588800   ;;  %vm158_vm1 = vcmask 1043456   ;;  %vm307_vm2 = vcmask 64512   ;;  %s630_s2 = inlined_call_operand.vmem [shape: bf16[72,8], index: 2, kind: input, shape index: {}]   ;;  %s631_s0 = inlined_call_operand.vmem [shape: f32[128,72], index: 0, kind: input, shape index: {}]   ;;  %s632_s1 = inlined_call_operand.vmem [shape: f32[128,72], index: 1, kind: input, shape index: {}]   ;;  %s633_s3 = inlined_call_operand.vmem [shape: f32[1,8], index: 3, kind: input, shape index: {}]   ;;  %s634_s4 = inlined_call_operand.vmem [shape: f32[128,8], index: 4, kind: output, shape index: {}]  }
   0x1   :  { %v393_v0 = vld [vmem:[%s630_s2] sm:$0xff]   ;;  %v394_v1 = vld [vmem:[%s630_s2 + $0x8] sm:$0xff]   ;;  %v395_v2 = vld [vmem:[%s630_s2 + $0x10] sm:$0xff]  }
   0x2   :  { %355 = vmatprep.subr.bf16.mxu0 %v393_v0  ;;  %381 = vmatprep.subr.bf16.mxu1 %v393_v0  ;;  %v18_v3 = vld [vmem:[%s631_s0] sm:$0xff]  ;;  %v19_v4 = vld [vmem:[%s631_s0 + $0x8] sm:$0xff]  ;;  %v396_v11 = vld [vmem:[%s630_s2 + $0x18] sm:$0xff]  }
   0x3   :  { %356 = vmatpush3.bf16.msra.mxu0 %v393_v0  ;;  %386 = vmatpush3.bf16.msra.mxu1 %v393_v0  ;;  %v34_v5 = vld [vmem:[%s632_s1] sm:$0xff]  ;;  %v35_v6 = vld [vmem:[%s632_s1 + $0x8] sm:$0xff]  ;;  %v20_v18 = vld [vmem:[%s631_s0 + $0x10] sm:$0xff] }
   0x4   :  { %357 = vmatprep.subr.bf16.mxu0 %v394_v1  ;;  %382 = vmatprep.subr.bf16.mxu1 %v394_v1  ;;  %v50_v7 = vmul.f32 0.5, %v34_v5  ;;  %v51_v8 = vmul.f32 0.5, %v35_v6  ;;  %v26_v9 = vld [vmem:[%s631_s0 + $0x40] sm:$0xff]  ;;  %v27_v12 = vld [vmem:[%s631_s0 + $0x48] sm:$0xff]  ;;  %v21_v19 = vld [vmem:[%s631_s0 + $0x18] sm:$0xff] }
   0x5   :  { %v42_v10 = vld [vmem:[%s632_s1 + $0x40] sm:$0xff]  ;;  %v43_v13 = vld [vmem:[%s632_s1 + $0x48] sm:$0xff]  ;;  %v36_v20 = vld [vmem:[%s632_s1 + $0x10] sm:$0xff] }
   0x6   :  { %v58_v14 = vmul.f32 0.5, %v42_v10  ;;  %v66_v15 = vadd.f32 %v50_v7, %v18_v3  ;;  %v67_v16 = vadd.f32 %v51_v8, %v19_v4  ;;  %v59_v17 = vmul.f32 0.5, %v43_v13  ;;  %v37_v21 = vld [vmem:[%s632_s1 + $0x18] sm:$0xff]  ;;  %v28_v25 = vld [vmem:[%s631_s0 + $0x50] sm:$0xff]  ;;  %v397_v28 = vld [vmem:[%s630_s2 + $0x20] ss:$0 sps:$4 sm:$0xff]  }
   0x7   :  { %358 = vmatpush3.bf16.msra.mxu0 %v394_v1  ;;  %387 = vmatpush3.bf16.msra.mxu1 %v394_v1  ;;  %v52_v23 = vmul.f32 0.5, %v36_v20  ;;  %v53_v24 = vmul.f32 0.5, %v37_v21  ;;  %v44_v26 = vld [vmem:[%s632_s1 + $0x50] sm:$0xff]  ;;  %v45_v27 = vld [vmem:[%s632_s1 + $0x58] sm:$0xff]  ;;  %v22_v34 = vld [vmem:[%s631_s0 + $0x20] sm:$0xff]  ;;  %v160_v59 = vsel %vm158_vm1, %v397_v28, 0 }
   0x8   :  { %359 = vmatprep.subr.bf16.mxu0 %v395_v2  ;;  %383 = vmatprep.subr.bf16.mxu1 %v395_v2  ;;  %v74_v22 = vadd.f32 %v58_v14, %v26_v9  ;;  %v82_v29 = vpack.c.bf16 %v67_v16, %v66_v15  ;;  %v75_v30 = vadd.f32 %v59_v17, %v27_v12  ;;  %v29_v31 = vld [vmem:[%s631_s0 + $0x58] sm:$0xff]  ;;  %v60_v32 = vmul.f32 0.5, %v44_v26  ;;  %v38_v35 = vld [vmem:[%s632_s1 + $0x20] sm:$0xff]  ;;  %v23_v36 = vld [vmem:[%s631_s0 + $0x28] sm:$0xff] }
   0x9   :  { %v61_v33 = vmul.f32 0.5, %v45_v27  ;;  %v39_v37 = vld [vmem:[%s632_s1 + $0x28] sm:$0xff]  ;;  %v54_v38 = vmul.f32 0.5, %v38_v35  ;;  %v30_v39 = vld [vmem:[%s631_s0 + $0x60] sm:$0xff]  ;;  %v68_v45 = vadd.f32 %v52_v23, %v20_v18  ;;  %v69_v46 = vadd.f32 %v53_v24, %v21_v19  ;;  %v40_v52 = vld [vmem:[%s632_s1 + $0x30] sm:$0xff] }
   0xa   :  { %v86_v40 = vpack.c.bf16 %v75_v30, %v74_v22  ;;  %v55_v41 = vmul.f32 0.5, %v39_v37  ;;  %v31_v42 = vld [vmem:[%s631_s0 + $0x68] sm:$0xff]  ;;  %v46_v43 = vld [vmem:[%s632_s1 + $0x60] sm:$0xff]  ;;  %365 = vmatprep.mubr.msk.bf16.mxu0 %vm133_vm0, %v82_v29  ;;  %v76_v49 = vadd.f32 %v60_v32, %v28_v25  ;;  %v41_v56 = vld [vmem:[%s632_s1 + $0x38] sm:$0xff]  ;;  %v56_v61 = vmul.f32 0.5, %v40_v52 }
   0xb   :  { %360 = vmatpush3.bf16.msra.mxu0 %v395_v2  ;;  %388 = vmatpush3.bf16.msra.mxu1 %v395_v2  ;;  %v47_v44 = vld [vmem:[%s632_s1 + $0x68] sm:$0xff]  ;;  %v62_v47 = vmul.f32 0.5, %v46_v43  ;;  %v77_v50 = vadd.f32 %v61_v33, %v29_v31  ;;  %v70_v51 = vadd.f32 %v54_v38, %v22_v34  ;;  %v48_v57 = vld [vmem:[%s632_s1 + $0x70] sm:$0xff]  ;;  %v49_v58 = vld [vmem:[%s632_s1 + $0x78] sm:$0xff]  ;;  %v83_v60 = vpack.c.bf16 %v69_v46, %v68_v45 }
   0xc   :  { %361 = vmatprep.subr.bf16.mxu0 %v396_v11  ;;  %384 = vmatprep.subr.bf16.mxu1 %v396_v11  ;;  %v63_v48 = vmul.f32 0.5, %v47_v44  ;;  %v71_v53 = vadd.f32 %v55_v41, %v23_v36  ;;  %v24_v63 = vld [vmem:[%s631_s0 + $0x30] sm:$0xff]  ;;  %v57_v0 = vmul.f32 0.5, %v41_v56  ;;  %v64_v1 = vmul.f32 0.5, %v48_v57  ;;  %v25_v5 = vld [vmem:[%s631_s0 + $0x38] sm:$0xff] }
   0xd   :  { %373 = vmatprep.mubr.msk.bf16.mxu1 %vm133_vm0, %v86_v40  ;;  %v78_v54 = vadd.f32 %v62_v47, %v30_v39  ;;  %v87_v62 = vpack.c.bf16 %v77_v50, %v76_v49  ;;  %v65_v2 = vmul.f32 0.5, %v49_v58  ;;  %v32_v6 = vld [vmem:[%s631_s0 + $0x70] sm:$0xff]  ;;  %v33_v7 = vld [vmem:[%s631_s0 + $0x78] sm:$0xff]  ;;  %v72_v8 = vadd.f32 %v56_v61, %v24_v63  ;;  %v548_v14 = vld [vmem:[%s633_s3] ss:$0 sm:$0xff] }
   0xe   :  { %v79_v55 = vadd.f32 %v63_v48, %v31_v42  ;;  %v84_v3 = vpack.c.bf16 %v71_v53, %v70_v51  ;;  %v73_v9 = vadd.f32 %v57_v0, %v25_v5  ;;  %v80_v10 = vadd.f32 %v64_v1, %v32_v6 }
   0xf   :  { %362 = vmatpush3.bf16.msra.mxu0 %v396_v11  ;;  %389 = vmatpush3.bf16.msra.mxu1 %v396_v11  ;;  %v81_v11 = vadd.f32 %v65_v2, %v33_v7 }
  0x10   :  { %391 = vmatprep.subr.msk.bf16.mxu0 %vm158_vm1, %v397_v28  ;;  %392 = vmatprep.subr.msk.bf16.mxu1 %vm158_vm1, %v397_v28  ;;  %v88_v4 = vpack.c.bf16 %v79_v55, %v78_v54  ;;  %v85_v12 = vpack.c.bf16 %v73_v9, %v72_v8 }
  0x11   :  { %v89_v13 = vpack.c.bf16 %v81_v11, %v80_v10 }
  0x13   :  { %364 = vmatpush3.bf16.msra.mxu0 %v160_v59  ;;  %390 = vmatpush3.bf16.msra.mxu1 %v160_v59 }
  0x16   :  { %366 = vmatmul.mubr.msk.bf16.vlgmr.msra.gmra.mrb[0].mxu0 %vm133_vm0, %v83_v60  ;;  %374 = vmatmul.mubr.msk.bf16.vlgmr.msra.gmra.mrb[0].mxu1 %vm133_vm0, %v87_v62 }
  0x17   :  { %369 = vmatprep.mubr.msk.bf16.mxu0 %vm133_vm0, %v84_v3  ;;  %377 = vmatprep.mubr.msk.bf16.mxu1 %vm133_vm0, %v88_v4 }
  0x1e   :  { %370 = vmatmul.mubr.msk.bf16.gmra.mrb[4].mxu0 %vm133_vm0, %v85_v12  ;;  %378 = vmatmul.mubr.msk.bf16.gmra.mrb[4].mxu1 %vm133_vm0, %v89_v13 }
  0xe9   :  { %v367_v15 = vpop.f32.mrb[0].mxu0  ;;  %v375_v16 = vpop.f32.mrb[0].mxu1 }
  0xea   :  { %v205_v17 = vadd.f32 %v367_v15, %v548_v14  ;;  %v237_v18 = vadd.f32 %v375_v16, %v548_v14  ;;  %v196_v19 = vpop.f32.mrb[1].mxu0  ;;  %v228_v20 = vpop.f32.mrb[1].mxu1 }
  0xeb   :  { %v197_v21 = vadd.f32 %v548_v14, %v196_v19  ;;  %v229_v22 = vadd.f32 %v548_v14, %v228_v20  ;;  %v368_v23 = vpop.f32.mrb[2].mxu0  ;;  %v376_v24 = vpop.f32.mrb[2].mxu1 }
  0xec   :  { %vm261_vm3 = vcmp.ge.f32.partialorder %v205_v17, 0.0  ;;  %v277_v25 = vmul.f32 0.2, %v205_v17  ;;  %vm269_vm4 = vcmp.ge.f32.partialorder %v237_v18, 0.0  ;;  %v285_v26 = vmul.f32 0.2, %v237_v18 }
  0xed   :  { %vm259_vm5 = vcmp.ge.f32.partialorder %v197_v21, 0.0  ;;  %v275_v27 = vmul.f32 0.2, %v197_v21  ;;  %vm267_vm6 = vcmp.ge.f32.partialorder %v229_v22, 0.0  ;;  %v283_v28 = vmul.f32 0.2, %v229_v22 }
  0xee   :  { %v293_v29 = vsel %vm261_vm3, %v205_v17, %v277_v25  ;;  %v301_v30 = vsel %vm269_vm4, %v237_v18, %v285_v26  ;;  %v208_v31 = vadd.f32 %v368_v23, %v548_v14  ;;  %v240_v32 = vadd.f32 %v376_v24, %v548_v14  ;;  %v199_v33 = vpop.f32.mrb[3].mxu0  ;;  %v231_v34 = vpop.f32.mrb[3].mxu1 }
  0xef   :  { %310 = vst.msk [vmem:[%s634_s4 + $0x10] sm:$0xff] %vm307_vm2, %v293_v29  ;;  %318 = vst.msk [vmem:[%s634_s4 + $0x50] sm:$0xff] %vm307_vm2, %v301_v30  ;;  %v291_v35 = vsel %vm259_vm5, %v197_v21, %v275_v27  ;;  %v299_v36 = vsel %vm267_vm6, %v229_v22, %v283_v28  ;;  %v200_v37 = vadd.f32 %v548_v14, %v199_v33 }
  0xf0   :  { %v232_v38 = vadd.f32 %v548_v14, %v231_v34  ;;  %308 = vst.msk [vmem:[%s634_s4] sm:$0xff] %vm307_vm2, %v291_v35  ;;  %316 = vst.msk [vmem:[%s634_s4 + $0x40] sm:$0xff] %vm307_vm2, %v299_v36  ;;  %vm262_vm7 = vcmp.ge.f32.partialorder %v208_v31, 0.0  ;;  %v278_v39 = vmul.f32 0.2, %v208_v31  ;;  %vm270_vm8 = vcmp.ge.f32.partialorder %v240_v32, 0.0 }
  0xf1   :  { %v286_v40 = vmul.f32 0.2, %v240_v32  ;;  %vm260_vm9 = vcmp.ge.f32.partialorder %v200_v37, 0.0  ;;  %v276_v41 = vmul.f32 0.2, %v200_v37  ;;  %v371_v45 = vpop.f32.mrb[4].mxu0 }
  0xf2   :  { %vm268_vm10 = vcmp.ge.f32.partialorder %v232_v38, 0.0  ;;  %v284_v42 = vmul.f32 0.2, %v232_v38  ;;  %v294_v43 = vsel %vm262_vm7, %v208_v31, %v278_v39  ;;  %v379_v46 = vpop.f32.mrb[4].mxu1  ;;  %v221_v49 = vadd.f32 %v371_v45, %v548_v14  ;;  %v212_v51 = vpop.f32.mrb[5].mxu0 }
  0xf3   :  { %v302_v44 = vsel %vm270_vm8, %v240_v32, %v286_v40  ;;  %311 = vst.msk [vmem:[%s634_s4 + $0x18] sm:$0xff] %vm307_vm2, %v294_v43  ;;  %v292_v47 = vsel %vm260_vm9, %v200_v37, %v276_v41  ;;  %v253_v50 = vadd.f32 %v379_v46, %v548_v14  ;;  %v244_v52 = vpop.f32.mrb[5].mxu1  ;;  %v213_v53 = vadd.f32 %v548_v14, %v212_v51  ;;  %v372_v55 = vpop.f32.mrb[6].mxu0 }
  0xf4   :  { %319 = vst.msk [vmem:[%s634_s4 + $0x58] sm:$0xff] %vm307_vm2, %v302_v44  ;;  %v300_v48 = vsel %vm268_vm10, %v232_v38, %v284_v42  ;;  %309 = vst.msk [vmem:[%s634_s4 + $0x8] sm:$0xff] %vm307_vm2, %v292_v47  ;;  %v245_v54 = vadd.f32 %v548_v14, %v244_v52  ;;  %v380_v56 = vpop.f32.mrb[6].mxu1  ;;  %vm265_vm11 = vcmp.ge.f32.partialorder %v221_v49, 0.0  ;;  %v281_v57 = vmul.f32 0.2, %v221_v49 }
  0xf5   :  { %317 = vst.msk [vmem:[%s634_s4 + $0x48] sm:$0xff] %vm307_vm2, %v300_v48  ;;  %vm273_vm12 = vcmp.ge.f32.partialorder %v253_v50, 0.0  ;;  %v289_v58 = vmul.f32 0.2, %v253_v50  ;;  %vm263_vm13 = vcmp.ge.f32.partialorder %v213_v53, 0.0  ;;  %v224_v63 = vadd.f32 %v372_v55, %v548_v14  ;;  %v215_v1 = vpop.f32.mrb[7].mxu0 }
  0xf6   :  { %v279_v59 = vmul.f32 0.2, %v213_v53  ;;  %vm271_vm14 = vcmp.ge.f32.partialorder %v245_v54, 0.0  ;;  %v287_v60 = vmul.f32 0.2, %v245_v54  ;;  %v297_v61 = vsel %vm265_vm11, %v221_v49, %v281_v57  ;;  %v247_v2 = vpop.f32.mrb[7].mxu1 }
  0xf7   :  { %v305_v62 = vsel %vm273_vm12, %v253_v50, %v289_v58  ;;  %v256_v0 = vadd.f32 %v380_v56, %v548_v14  ;;  %314 = vst.msk [vmem:[%s634_s4 + $0x30] sm:$0xff] %vm307_vm2, %v297_v61  ;;  %v216_v5 = vadd.f32 %v548_v14, %v215_v1  ;;  %v248_v6 = vadd.f32 %v548_v14, %v247_v2 }
  0xf8   :  { %322 = vst.msk [vmem:[%s634_s4 + $0x70] sm:$0xff] %vm307_vm2, %v305_v62  ;;  %v295_v3 = vsel %vm263_vm13, %v213_v53, %v279_v59  ;;  %v303_v4 = vsel %vm271_vm14, %v245_v54, %v287_v60  ;;  %vm266_vm15 = vcmp.ge.f32.partialorder %v224_v63, 0.0  ;;  %v282_v7 = vmul.f32 0.2, %v224_v63 }
  0xf9   :  { %312 = vst.msk [vmem:[%s634_s4 + $0x20] sm:$0xff] %vm307_vm2, %v295_v3  ;;  %320 = vst.msk [vmem:[%s634_s4 + $0x60] sm:$0xff] %vm307_vm2, %v303_v4  ;;  %vm274_vm0 = vcmp.ge.f32.partialorder %v256_v0, 0.0  ;;  %v290_v8 = vmul.f32 0.2, %v256_v0  ;;  %vm264_vm1 = vcmp.ge.f32.partialorder %v216_v5, 0.0 }
  0xfa   :  { %v280_v9 = vmul.f32 0.2, %v216_v5  ;;  %vm272_vm3 = vcmp.ge.f32.partialorder %v248_v6, 0.0  ;;  %v288_v10 = vmul.f32 0.2, %v248_v6  ;;  %v298_v11 = vsel %vm266_vm15, %v224_v63, %v282_v7 }
  0xfb   :  { %v306_v12 = vsel %vm274_vm0, %v256_v0, %v290_v8  ;;  %315 = vst.msk [vmem:[%s634_s4 + $0x38] sm:$0xff] %vm307_vm2, %v298_v11 }
  0xfc   :  { %323 = vst.msk [vmem:[%s634_s4 + $0x78] sm:$0xff] %vm307_vm2, %v306_v12  ;;  %v296_v13 = vsel %vm264_vm1, %v216_v5, %v280_v9  ;;  %v304_v14 = vsel %vm272_vm3, %v248_v6, %v288_v10 }
  0xfd   :  { %313 = vst.msk [vmem:[%s634_s4 + $0x28] sm:$0xff] %vm307_vm2, %v296_v13  ;;  %321 = vst.msk [vmem:[%s634_s4 + $0x68] sm:$0xff] %vm307_vm2, %v304_v14 }

// kernel: codeformer_forward.8
= control target key start
LH: loop header
LB: loop body
LE: loop exit
PB: predicated region body
PF: predicated region fallthrough
CT: control target
= control target key end

     0   :  { %s3526_s25 = smov 0   ;;  %s4101_s0 = inlined_call_operand.vmem [shape: f32[2,16,32], index: 0, kind: input, shape index: {}]   ;;  %s4102_s1 = inlined_call_operand.vmem [shape: f32[2,16,16], index: 1, kind: input, shape index: {}]   ;;  %s4103_s2 = inlined_call_operand.vmem [shape: f32[16,32], index: 2, kind: input, shape index: {}]   ;;  %s4104_s3 = inlined_call_operand.vmem [shape: f32[2,4,32], index: 3, kind: input, shape index: {}]   ;;  %s4105_s4 = inlined_call_operand.vmem [shape: bf16[2,32,128], index: 4, kind: input, shape index: {}]   ;;  %s4106_s5 = inlined_call_operand.vmem [shape: f32[2,1,128], index: 5, kind: input, shape index: {}]   ;;  %s4107_s6 = inlined_call_operand.vmem [shape: bf16[2,32,64], index: 6, kind: input, shape index: {}]   ;;  %s4108_s7 = inlined_call_operand.vmem [shape: f32[2,1,64], index: 7, kind: input, shape index: {}]   ;;  %s4109_s8 = inlined_call_operand.vmem [shape: bf16[2,64,32], index: 8, kind: input, shape index: {}]   ;;  %s4110_s9 = inlined_call_operand.vmem [shape: f32[2,1,32], index: 9, kind: input, shape index: {}]   ;;  %s4111_s10 = inlined_call_operand.vmem [shape: f32[2,32], index: 10, kind: input, shape index: {}]   ;;  %s4112_s11 = inlined_call_operand.vmem [shape: bf16[32,64], index: 11, kind: input, shape index: {}]   ;;  %s4113_s12 = inlined_call_operand.vmem [shape: f32[64,16], index: 12, kind: input, shape index: {}]   ;;  %s4114_s13 = inlined_call_operand.vmem [shape: f32[2,16,16], index: 13, kind: output, shape index: {}]  }
   0x1 LB: > { %s2853_s26 = sadd.s32 4294967295, %s3443_s25   ;;  %p2857_p0 = scmp.ge.s32.totalorder %s3443_s25, 1  ;;  %s3443_s25 = sphi %s3526_s25, %s23_s25  }
   0x2   : > { %p397_p1 = scmp.lt.s32.totalorder %s3443_s25, 3 }
   0x4   : > { %p398_p2 = pnand %p2857_p0, %p397_p1 }
   0x5   : > { %p446_p3 = scmp.lt.s32.totalorder (!%p398_p2), %s2853_s26, 1  ;;  %vm472_vm0 = vcmask (!%p398_p2), 261120   ;;  %v3551_v4 = vld [vmem:[%s4105_s4] sm:$0xff] (!%p398_p2)   ;;  %s3445_s16 = smov (!%p398_p2), 96   ;;  %v3562_v15 = vld [vmem:[%s4105_s4 + $0x8] sm:$0xff] (!%p398_p2)   ;;  %v3446_v17 = vmov (!%p398_p2), 0.0   ;;  %v500_v21 = vlaneseq (!%p398_p2) }
   0x6   : > { %401 = sbr.rel (%p398_p2) target bundleno = 6445 (0x192d), region = 72  ;;  %3031 = vmatprep.subr.bf16.mxu0 (!%p398_p2), %v3446_v17  ;;  %3039 = vmatprep.subr.bf16.mxu1 (!%p398_p2), %v3446_v17  ;;  %vm3447_vm1 = vmmov (!%p398_p2), 0   ;;  %v3580_v18 = vld [vmem:[%s4106_s5] ss:$0 sm:$0xff] (!%p398_p2)  ;;  %v3613_v41 = vld [vmem:[%s4103_s2 + $0x8] sm:$0xff] (!%p398_p2)  ;;  %vm684_vm2 = vcmask (!%p398_p2), 64512  }
   0x7   : > { %3032 = vmatpush3.bf16.msra.mxu0 (!%p398_p2), %v3551_v4  ;;  %3035 = vmatprep.mubr.msk.bf16.mxu0 (!%p398_p2), %vm3447_vm1, %v3446_v17  ;;  %v3585_v25 = vshrl.u32 (!%p398_p2), %v500_v21, 7  ;;  %v3594_v29 = vld [vmem:[%s4104_s3] sm:$0xf] (!%p398_p2)  ;;  %s3448_s29 = smov (!%p398_p2), 120   ;;  %s3450_s14 = smov (!%p398_p2), 104   ;;  %vm734_vm3 = vcmask (!%p398_p2), 130048  }
   0x8   : > { %3033 = vmatprep.subr.bf16.mxu0 (!%p398_p2), %v3446_v17  ;;  %3043 = vmatprep.mubr.msk.bf16.mxu1 (!%p398_p2), %vm3447_vm1, %v3446_v17  ;;  %v3608_v40 = vld [vmem:[%s4103_s2] sm:$0xff] (!%p398_p2)  ;;  %s3451_s15 = smov (!%p398_p2), 64   ;;  %s3452_s17 = smov (!%p398_p2), 32   ;;  %vm1202_vm4 = vcmask (!%p398_p2), 195584   ;;  %vm1425_vm5 = vcmask (!%p398_p2), 523264  }
   0x9   : > { %v3588_v28 = vsub.s32 (!%p398_p2), 0, %v3585_v25  ;;  %v3599_v31 = vsub.s32 (!%p398_p2), 1, %v3585_v25  ;;  %s3453_s18 = smov (!%p398_p2), 8   ;;  %s3454_s19 = smov (!%p398_p2), 16  }
   0xa   : > { %s4115_s20 = smov (!%p398_p2), 24  }
   0xb   : > { %3034 = vmatpush3.bf16.msra.mxu0 (!%p398_p2), %v3562_v15  ;;  %v503_v30 = vrot.slane (!%p398_p2), %v3594_v29, %v3588_v28  ;;  %v509_v35 = vrot.slane (!%p398_p2), %v3594_v29, %v3599_v31 }
   0xc   : > { %3047 = vmatprep.subr.bf16.mxu0 (!%p398_p2), %v3446_v17 }
   0xd   : > { %s4118_s26 = smov (!%p446_p3, %s2853_s26), 1 }
   0xe   : > { %s3534_s27 = sshll.u32 %s4118_s26, 4 }
   0xf   : > { %s450_s30 = scalar_lea.vmem %s4101_s0, %s3534_s27  ;;  %s455_s21 = scalar_lea.vmem %s4102_s1, %s3534_s27 }
  0x10   : > { %v3540_v0 = vld [vmem:[%s450_s30] sm:$0xff]  ;;  %v3544_v2 = vld [vmem:[%s450_s30 + $0x8] sm:$0xff]  ;;  %s3449_s30 = smov 112   ;;  %s460_s23 = scalar_lea.vmem %s4114_s13, %s3534_s27 }
  0x11   : > { %v473_v1 = vsel %vm472_vm0, %v3540_v0, 0.0  ;;  %v476_v3 = vsel %vm472_vm0, %v3544_v2, 0.0 }
  0x12   : > { %474 = vadd.xlane.f32.xlu0 %v473_v1 }
  0x16   : > { %477 = vadd.xlane.f32.xlu0 %v476_v3 }
  0x2c   : > { %578 = vrot.lane.b32.xlu0 %v3551_v4, %s3445_s16 }
  0x9f   : > { %v475_v5 = vpop.xlane.xlu0 %474 }
  0xa0   : > { %v480_v6 = vmul.f32 0.03125, %v475_v5 }
  0xa2   : > { %v482_v7 = vsub.f32 %v3540_v0, %v480_v6 }
  0xa3   : > { %v478_v8 = vpop.xlane.xlu0 %477 }
  0xa4   : > { %v481_v9 = vmul.f32 0.03125, %v478_v8  ;;  %v484_v10 = vmul.f32 %v482_v7, %v482_v7 }
  0xa6   : > { %v483_v11 = vsub.f32 %v3544_v2, %v481_v9  ;;  %v486_v12 = vsel %vm472_vm0, %v484_v10, 0.0 }
  0xa7   : > { %487 = vadd.xlane.f32.xlu1 %v486_v12  ;;  %v579_v16 = vpop.permute.xlu0 %578 }
  0xa8   : > { %v485_v13 = vmul.f32 %v483_v11, %v483_v11  ;;  %3040 = vmatpush3.bf16.msra.mxu1 %v579_v16 }
  0xa9   : > { %3041 = vmatprep.subr.bf16.mxu1 %v3446_v17 }
  0xaa   : > { %v489_v14 = vsel %vm472_vm0, %v485_v13, 0.0 }
  0xab   : > { %490 = vadd.xlane.f32.xlu1 %v489_v14 }
  0xbc   : > { %580 = vrot.lane.b32.xlu1 %v3562_v15, %s3445_s16 }
  0xc0   : > { %584 = vrot.lane.b32.xlu1 %v3580_v18, %s3445_s16 }
 0x134   : > { %v488_v19 = vpop.xlane.xlu1 %487 }
 0x135   : > { %v492_v20 = vmul.f32 0.03125, %v488_v19 }
 0x137   : > { %v494_v22 = vadd.f32 1e-05, %v492_v20 }
 0x138   : > { %v491_v23 = vpop.xlane.xlu1 %490 }
 0x139   : > { %3341 = vrsqrt.f32 %v494_v22  ;;  %v493_v24 = vmul.f32 0.03125, %v491_v23 }
 0x13b   : > { %v495_v26 = vadd.f32 1e-05, %v493_v24 }
 0x13c   : > { %v581_v27 = vpop.permute.xlu1 %580 }
 0x13d   : > { %3343 = vrsqrt.f32 %v495_v26  ;;  %3042 = vmatpush3.bf16.msra.mxu1 %v581_v27 }
 0x13e   : > { %3055 = vmatprep.subr.bf16.mxu1 %v3446_v17 }
 0x140   : > { %v585_v47 = vpop.permute.xlu1 %584 }
 0x143   : > { %v3342_v32 = vpop.eup %3341 }
 0x144   : > { %v498_v33 = vmul.f32 %v3342_v32, %v482_v7 }
 0x146   : > { %v504_v34 = vmul.f32 %v503_v30, %v498_v33 }
 0x147   : > { %v3344_v36 = vpop.eup %3343 }
 0x148   : > { %v499_v37 = vmul.f32 %v3344_v36, %v483_v11  ;;  %v3603_v39 = vadd.f32 %v509_v35, %v504_v34 }
 0x14a   : > { %v505_v38 = vmul.f32 %v503_v30, %v499_v37  ;;  %v512_v43 = vadd.f32 %v3603_v39, %v3608_v40 }
 0x14c   : > { %v3615_v42 = vadd.f32 %v509_v35, %v505_v38 }
 0x14e   : > { %v513_v44 = vadd.f32 %v3615_v42, %v3613_v41  ;;  %v515_v45 = vpack.c.bf16 %v3615_v42, %v3603_v39 }
 0x150   : > { %v514_v46 = vpack.c.bf16 %v513_v44, %v512_v43 }
 0x152   : > { %3036 = vmatmul.mubr.msk.bf16.vlgmr.msra.gmra.mrb[0].mxu0 %vm472_vm0, %v514_v46  ;;  %3044 = vmatmul.mubr.msk.bf16.vlgmr.msra.gmra.mrb[0].mxu1 %vm472_vm0, %v514_v46 }
 0x153   : > { %3057 = vmatprep.mubr.msk.bf16.mxu1 %vm3447_vm1, %v3446_v17  ;;  %3051 = vmatprep.mubr.msk.bf16.mxu0 %vm3447_vm1, %v3446_v17 }
 0x225   : > { %v571_v48 = vpop.f32.mrb[0].mxu0  ;;  %v621_v49 = vpop.f32.mrb[0].mxu1 }
 0x226   : > { %v3037_v50 = vpop.f32.mrb[1].mxu0  ;;  %v3045_v51 = vpop.f32.mrb[1].mxu1  ;;  %v572_v54 = vadd.f32 %v3580_v18, %v571_v48  ;;  %v622_v55 = vadd.f32 %v621_v49, %v585_v47 }
 0x227   : > { %v574_v52 = vpop.f32.mrb[2].mxu0  ;;  %v624_v53 = vpop.f32.mrb[2].mxu1 }
 0x228   : > { %v575_v56 = vadd.f32 %v3580_v18, %v574_v52  ;;  %v625_v57 = vadd.f32 %v624_v53, %v585_v47  ;;  %v3038_v58 = vpop.f32.mrb[3].mxu0  ;;  %v3046_v59 = vpop.f32.mrb[3].mxu1 }
 0x22a   : > { %v681_v60 = vpack.c.bf16 %v575_v56, %v572_v54  ;;  %v682_v61 = vpack.c.bf16 %v625_v57, %v622_v55 }
 0x22c   : > { %803 = vrot.lane.b32.xlu0 %v681_v60, %s3448_s29  ;;  %806 = vrot.lane.b32.xlu1 %v682_v61, %s3448_s29  ;;  %v689_v62 = vsel %vm684_vm2, %v682_v61, 0 }
 0x22d   : > { %3056 = vmatpush3.bf16.xpose.msra.mxu1 %v689_v62 }
 0x22e   : > { %3067 = vmatprep.subr.bf16.mxu1 %v3446_v17 }
 0x230   : > { %928 = vrot.lane.b32.xlu0 %v681_v60, %s3449_s30  ;;  %930 = vrot.lane.b32.xlu1 %v682_v61, %s3449_s30 }
 0x234   : > { %1051 = vrot.lane.b32.xlu0 %v681_v60, %s3450_s14  ;;  %1053 = vrot.lane.b32.xlu1 %v682_v61, %s3450_s14 }
 0x235   : > { %3058 = vmatmul.mubr.msk.bf16.vlgmr.msra.gmra.mrb[4].mxu1 %vm684_vm2, %v681_v60 }
 0x236   : > { %3069 = vmatprep.mubr.msk.bf16.mxu1 %vm3447_vm1, %v3446_v17 }
 0x238   : > { %628 = vrot.lane.b32.xlu1 %v3551_v4, %s3451_s15  ;;  %630 = vrot.lane.b32.xlu0 %v3562_v15, %s3451_s15 }
 0x29e   : > { %v807_v63 = vpop.permute.xlu1 %806  ;;  %v804_v1 = vpop.permute.xlu0 %803 }
 0x29f   : > { %v812_v3 = vsel %vm684_vm2, %v807_v63, 0 }
 0x2a0   : > { %3068 = vmatpush3.bf16.xpose.msra.mxu1 %v812_v3 }
 0x2a1   : > { %3079 = vmatprep.subr.bf16.mxu1 %v3446_v17 }
 0x2a2   : > { %v931_v5 = vpop.permute.xlu1 %930  ;;  %v929_v6 = vpop.permute.xlu0 %928 }
 0x2a3   : > { %v936_v8 = vsel %vm684_vm2, %v931_v5, 0 }
 0x2a6   : > { %v1054_v7 = vpop.permute.xlu1 %1053  ;;  %v1052_v9 = vpop.permute.xlu0 %1051 }
 0x2a7   : > { %3070 = vmatmul.mubr.msk.bf16.vlgmr.msra.gmra.mrb[8].mxu1 %vm684_vm2, %v804_v1  ;;  %v1059_v12 = vsel %vm684_vm2, %v1054_v7, 0 }
 0x2a8   : > { %3080 = vmatpush3.bf16.xpose.msra.mxu1 %v936_v8  ;;  %3081 = vmatprep.mubr.msk.bf16.mxu1 %vm3447_vm1, %v3446_v17 }
 0x2a9   : > { %3091 = vmatprep.subr.bf16.mxu1 %v3446_v17 }
 0x2aa   : > { %v629_v10 = vpop.permute.xlu1 %628  ;;  %v631_v11 = vpop.permute.xlu0 %630 }
 0x2ab   : > { %3048 = vmatpush3.bf16.msra.mxu0 %v629_v10 }
 0x2ac   : > { %3049 = vmatprep.subr.bf16.mxu0 %v3446_v17 }
 0x2af   : > { %3050 = vmatpush3.bf16.msra.mxu0 %v631_v11  ;;  %3082 = vmatmul.mubr.msk.bf16.vlgmr.msra.gmra.mrb[12].mxu1 %vm684_vm2, %v929_v6 }
 0x2b0   : > { %3092 = vmatpush3.bf16.xpose.msra.mxu1 %v1059_v12  ;;  %3093 = vmatprep.mubr.msk.bf16.mxu1 %vm3447_vm1, %v3446_v17 }
 0x2b1   : > { %3061 = vmatprep.subr.bf16.mxu0 %v3446_v17  ;;  %3103 = vmatprep.subr.bf16.mxu1 %v3446_v17 }
 0x2b2   : > { %3052 = vmatmul.mubr.msk.bf16.vlgmr.msra.gmra.mrb[4].mxu0 %vm472_vm0, %v515_v45 }
 0x2b3   : > { %3063 = vmatprep.mubr.msk.bf16.mxu0 %vm3447_vm1, %v3446_v17 }
 0x2b7   : > { %3094 = vmatmul.mubr.msk.bf16.vlgmr.msra.gmra.mrb[16].mxu1 %vm684_vm2, %v1052_v9 }
 0x2b8   : > { %3107 = vmatprep.mubr.msk.bf16.mxu1 %vm3447_vm1, %v3446_v17 }
 0x308   : > { %v725_v13 = vpop.f32.mrb[4].mxu1 }
 0x309   : > { %v3669_v14 = vmul.f32 0.35355338, %v725_v13  ;;  %v3059_v16 = vpop.f32.mrb[5].mxu1 }
 0x30a   : > { %v728_v19 = vpop.f32.mrb[6].mxu1 }
 0x30b   : > { %v3671_v20 = vmul.f32 0.35355338, %v728_v19  ;;  %v3060_v22 = vpop.f32.mrb[7].mxu1  ;;  %v735_v23 = vsel %vm734_vm3, %v3669_v14, -inf }
 0x30c   : > { %736 = vmax.xlane.f32.xlu1 %v735_v23 }
 0x30d   : > { %v738_v24 = vsel %vm734_vm3, %v3671_v20, -inf }
 0x30e   : > { %739 = vmax.xlane.f32.xlu0 %v738_v24 }
 0x37a   : > { %v848_v26 = vpop.f32.mrb[8].mxu1 }
 0x37b   : > { %v855_v27 = vmul.f32 0.35355338, %v848_v26  ;;  %v3071_v30 = vpop.f32.mrb[9].mxu1 }
 0x37c   : > { %v851_v32 = vpop.f32.mrb[10].mxu1 }
 0x37d   : > { %v856_v33 = vmul.f32 0.35355338, %v851_v32  ;;  %v3072_v34 = vpop.f32.mrb[11].mxu1  ;;  %v857_v35 = vsel %vm734_vm3, %v855_v27, -inf }
 0x37e   : > { %858 = vmax.xlane.f32.xlu0 %v857_v35 }
 0x37f   : > { %v860_v36 = vsel %vm734_vm3, %v856_v33, -inf }
 0x382   : > { %861 = vmax.xlane.f32.xlu0 %v860_v36  ;;  %v972_v37 = vpop.f32.mrb[12].mxu1 }
 0x383   : > { %v979_v38 = vmul.f32 0.35355338, %v972_v37  ;;  %v3083_v39 = vpop.f32.mrb[13].mxu1 }
 0x384   : > { %v975_v42 = vpop.f32.mrb[14].mxu1 }
 0x385   : > { %v980_v43 = vmul.f32 0.35355338, %v975_v42  ;;  %v674_v44 = vpop.f32.mrb[4].mxu0  ;;  %v3084_v45 = vpop.f32.mrb[15].mxu1  ;;  %v981_v46 = vsel %vm734_vm3, %v979_v38, -inf }
 0x386   : > { %982 = vmax.xlane.f32.xlu1 %v981_v46  ;;  %v3053_v47 = vpop.f32.mrb[5].mxu0 }
 0x387   : > { %v677_v48 = vpop.f32.mrb[6].mxu0  ;;  %v984_v49 = vsel %vm734_vm3, %v980_v43, -inf }
 0x388   : > { %985 = vmax.xlane.f32.xlu0 %v984_v49  ;;  %v3054_v50 = vpop.f32.mrb[7].mxu0 }
 0x38a   : > { %v1095_v51 = vpop.f32.mrb[16].mxu1 }
 0x38b   : > { %v1102_v52 = vmul.f32 0.35355338, %v1095_v51  ;;  %v3095_v53 = vpop.f32.mrb[17].mxu1 }
 0x38c   : > { %v1098_v54 = vpop.f32.mrb[18].mxu1 }
 0x38d   : > { %v1103_v55 = vmul.f32 0.35355338, %v1098_v54  ;;  %v3096_v56 = vpop.f32.mrb[19].mxu1  ;;  %v1104_v57 = vsel %vm734_vm3, %v1102_v52, -inf }
 0x38e   : > { %1105 = vmax.xlane.f32.xlu1 %v1104_v57 }
 0x38f   : > { %v1107_v58 = vsel %vm734_vm3, %v1103_v55, -inf }
 0x390   : > { %1108 = vmax.xlane.f32.xlu0 %v1107_v58 }
 0x399   : > { %v737_v59 = vpop.xlane.xlu1 %736 }
 0x39a   : > { %v741_v10 = vsub.f32 %v3669_v14, %v737_v59 }
 0x39b   : > { %v740_v9 = vpop.xlane.xlu0 %739 }
 0x39c   : > { %v743_v12 = vmul.f32 1.442695, %v741_v10  ;;  %v742_v13 = vsub.f32 %v3671_v20, %v740_v9 }
 0x39e   : > { %v745_v16 = vmul.f32 1.442695, %v742_v13 }
 0x39f   : > { %634 = vrot.lane.b32.xlu1 %v3580_v18, %s3451_s15 }
 0x40b   : > { %v859_v11 = vpop.xlane.xlu0 %858 }
 0x40c   : > { %v863_v19 = vsub.f32 %v855_v27, %v859_v11 }
 0x40e   : > { %v865_v23 = vmul.f32 1.442695, %v863_v19 }
 0x40f   : > { %v862_v22 = vpop.xlane.xlu0 %861 }
 0x410   : > { %v864_v24 = vsub.f32 %v856_v33, %v862_v22 }
 0x412   : > { %v867_v30 = vmul.f32 1.442695, %v864_v24 }
 0x413   : > { %v983_v60 = vpop.xlane.xlu1 %982 }
 0x414   : > { %v987_v61 = vsub.f32 %v979_v38, %v983_v60 }
 0x415   : > { %v986_v26 = vpop.xlane.xlu0 %985 }
 0x416   : > { %v989_v62 = vmul.f32 1.442695, %v987_v61  ;;  %v988_v32 = vsub.f32 %v980_v43, %v986_v26 }
 0x418   : > { %3345 = vpow2.f32 %v989_v62  ;;  %v991_v14 = vmul.f32 1.442695, %v988_v32 }
 0x419   : > { %3347 = vpow2.f32 %v743_v12 }
 0x41a   : > { %3349 = vpow2.f32 %v745_v16 }
 0x41b   : > { %v1106_v63 = vpop.xlane.xlu1 %1105  ;;  %3351 = vpow2.f32 %v865_v23 }
 0x41c   : > { %3353 = vpow2.f32 %v867_v30  ;;  %v1110_v35 = vsub.f32 %v1102_v52, %v1106_v63 }
 0x41d   : > { %v1109_v36 = vpop.xlane.xlu0 %1108  ;;  %3355 = vpow2.f32 %v991_v14 }
 0x41e   : > { %v1112_v27 = vmul.f32 1.442695, %v1110_v35  ;;  %v1111_v38 = vsub.f32 %v1103_v55, %v1109_v36 }
 0x41f   : > { %v635_v1 = vpop.permute.xlu1 %634 }
 0x420   : > { %v675_v3 = vadd.f32 %v674_v44, %v635_v1  ;;  %v678_v5 = vadd.f32 %v677_v48, %v635_v1  ;;  %3357 = vpow2.f32 %v1112_v27  ;;  %v1114_v33 = vmul.f32 1.442695, %v1111_v38 }
 0x422   : > { %v3685_v6 = vpop.eup %3345  ;;  %v683_v7 = vpack.c.bf16 %v678_v5, %v675_v3  ;;  %3359 = vpow2.f32 %v1114_v33 }
 0x423   : > { %v993_v8 = vsel %vm734_vm3, %v3685_v6, 0.0  ;;  %v3348_v34 = vpop.eup %3347 }
 0x424   : > { %994 = vadd.xlane.f32.xlu1 %v993_v8  ;;  %881 = vrot.lane.b32.xlu0 %v683_v7, %s3448_s29  ;;  %v747_v20 = vsel %vm734_vm3, %v3348_v34, 0.0  ;;  %v3350_v37 = vpop.eup %3349 }
 0x425   : > { %3062 = vmatpush3.bf16.msra.mxu0 %v683_v7  ;;  %v750_v39 = vsel %vm734_vm3, %v3350_v37, 0.0  ;;  %v3352_v42 = vpop.eup %3351 }
 0x426   : > { %3073 = vmatprep.subr.bf16.mxu0 %v3446_v17  ;;  %v869_v43 = vsel %vm734_vm3, %v3352_v42, 0.0  ;;  %v3354_v44 = vpop.eup %3353 }
 0x427   : > { %v872_v45 = vsel %vm734_vm3, %v3354_v44, 0.0  ;;  %v3356_v46 = vpop.eup %3355 }
 0x428   : > { %v996_v47 = vsel %vm734_vm3, %v3356_v46, 0.0 }
 0x42a   : > { %v3358_v48 = vpop.eup %3357 }
 0x42b   : > { %v1116_v49 = vsel %vm734_vm3, %v3358_v48, 0.0 }
 0x42c   : > { %v3360_v50 = vpop.eup %3359 }
 0x42d   : > { %v1119_v51 = vsel %vm734_vm3, %v3360_v50, 0.0 }
 0x435   : > { %1004 = vrot.lane.b32.xlu1 %v683_v7, %s3449_s30 }
 0x439   : > { %1208 = vrot.lane.b32.xlu1 %v3562_v15, %s3452_s17 }
 0x443   : > { %748 = vadd.xlane.f32.xlu0 %v747_v20 }
 0x447   : > { %751 = vadd.xlane.f32.xlu0 %v750_v39 }
 0x44b   : > { %870 = vadd.xlane.f32.xlu0 %v869_v43 }
 0x44f   : > { %873 = vadd.xlane.f32.xlu0 %v872_v45 }
 0x453   : > { %997 = vadd.xlane.f32.xlu0 %v996_v47 }
 0x457   : > { %1117 = vadd.xlane.f32.xlu0 %v1116_v49 }
 0x45b   : > { %1120 = vadd.xlane.f32.xlu0 %v1119_v51 }
 0x471   : > { %1127 = vrot.lane.b32.xlu0 %v683_v7, %s3450_s14 }
 0x475   : > { %1206 = vrot.lane.b32.xlu0 %v3551_v4, %s3452_s17 }
 0x496   : > { %v882_v52 = vpop.permute.xlu0 %881 }
 0x4b1   : > { %v995_v59 = vpop.xlane.xlu1 %994 }
 0x4b5   : > { %v1005_v12 = vpop.permute.xlu1 %1004 }
 0x4b9   : > { %v1209_v15 = vpop.permute.xlu1 %1208 }
 0x4d0   : > { %v749_v53 = vpop.xlane.xlu0 %748 }
 0x4d1   : > { %3361 = vrcp.f32 %v749_v53 }
 0x4d4   : > { %v752_v54 = vpop.xlane.xlu0 %751 }
 0x4d5   : > { %3363 = vrcp.f32 %v752_v54 }
 0x4d8   : > { %v871_v55 = vpop.xlane.xlu0 %870 }
 0x4d9   : > { %3365 = vrcp.f32 %v871_v55 }
 0x4db   : > { %v3362_v57 = vpop.eup %3361 }
 0x4dc   : > { %v874_v56 = vpop.xlane.xlu0 %873  ;;  %v755_v60 = vmul.f32 %v3362_v57, %v3348_v34 }
 0x4dd   : > { %3367 = vrcp.f32 %v874_v56 }
 0x4df   : > { %v3364_v58 = vpop.eup %3363 }
 0x4e0   : > { %v756_v61 = vmul.f32 %v3364_v58, %v3350_v37  ;;  %v998_v62 = vpop.xlane.xlu0 %997 }
 0x4e1   : > { %3369 = vrcp.f32 %v998_v62 }
 0x4e2   : > { %v757_v63 = vpack.c.bf16 %v756_v61, %v755_v60  ;;  %3371 = vrcp.f32 %v995_v59 }
 0x4e3   : > { %v3366_v3 = vpop.eup %3365 }
 0x4e4   : > { %3064 = vmatmul.mubr.msk.bf16.vlgmr.msra.gmra.mrb[8].mxu0 %vm734_vm3, %v757_v63  ;;  %v1118_v1 = vpop.xlane.xlu0 %1117  ;;  %v877_v7 = vmul.f32 %v3366_v3, %v3352_v42 }
 0x4e5   : > { %3074 = vmatpush3.bf16.msra.mxu0 %v882_v52  ;;  %3075 = vmatprep.mubr.msk.bf16.mxu0 %vm3447_vm1, %v3446_v17 }
 0x4e6   : > { %3085 = vmatprep.subr.bf16.mxu0 %v3446_v17 }
 0x4e7   : > { %v3368_v5 = vpop.eup %3367 }
 0x4e8   : > { %v878_v8 = vmul.f32 %v3368_v5, %v3354_v44  ;;  %v1121_v9 = vpop.xlane.xlu0 %1120 }
 0x4e9   : > { %3373 = vrcp.f32 %v1121_v9 }
 0x4ea   : > { %v879_v10 = vpack.c.bf16 %v878_v8, %v877_v7  ;;  %3375 = vrcp.f32 %v1118_v1 }
 0x4eb   : > { %v3370_v11 = vpop.eup %3369 }
 0x4ec   : > { %3076 = vmatmul.mubr.msk.bf16.vlgmr.msra.gmra.mrb[12].mxu0 %vm734_vm3, %v879_v10  ;;  %v3372_v13 = vpop.eup %3371  ;;  %v1002_v16 = vmul.f32 %v3370_v11, %v3356_v46  ;;  %v1128_v24 = vpop.permute.xlu0 %1127 }
 0x4ed   : > { %3086 = vmatpush3.bf16.msra.mxu0 %v1005_v12  ;;  %3087 = vmatprep.mubr.msk.bf16.mxu0 %vm3447_vm1, %v3446_v17  ;;  %v1001_v19 = vmul.f32 %v3372_v13, %v3685_v6 }
 0x4ee   : > { %3097 = vmatprep.subr.bf16.mxu0 %v3446_v17 }
 0x4ef   : > { %v1003_v22 = vpack.c.bf16 %v1002_v16, %v1001_v19 }
 0x4f0   : > { %v1207_v6 = vpop.permute.xlu0 %1206 }
 0x4f1   : > { %3104 = vmatpush3.bf16.msra.mxu1 %v1207_v6 }
 0x4f2   : > { %3105 = vmatprep.subr.bf16.mxu1 %v3446_v17 }
 0x4f3   : > { %v3374_v23 = vpop.eup %3373 }
 0x4f4   : > { %3088 = vmatmul.mubr.msk.bf16.vlgmr.msra.gmra.mrb[16].mxu0 %vm734_vm3, %v1003_v22  ;;  %v3376_v26 = vpop.eup %3375  ;;  %v1125_v30 = vmul.f32 %v3374_v23, %v3360_v50 }
 0x4f5   : > { %3098 = vmatpush3.bf16.msra.mxu0 %v1128_v24  ;;  %3099 = vmatprep.mubr.msk.bf16.mxu0 %vm3447_vm1, %v3446_v17  ;;  %v1124_v32 = vmul.f32 %v3376_v26, %v3358_v48 }
 0x4f6   : > { %3111 = vmatprep.subr.bf16.mxu0 %v3446_v17  ;;  %3106 = vmatpush3.bf16.msra.mxu1 %v1209_v15 }
 0x4f7   : > { %v1126_v34 = vpack.c.bf16 %v1125_v30, %v1124_v32  ;;  %3119 = vmatprep.subr.bf16.mxu1 %v3446_v17 }
 0x4fc   : > { %3100 = vmatmul.mubr.msk.bf16.vlgmr.msra.gmra.mrb[20].mxu0 %vm734_vm3, %v1126_v34 }
 0x4fd   : > { %3115 = vmatprep.mubr.msk.bf16.mxu0 %vm3447_vm1, %v3446_v17 }
 0x5b7   : > { %v795_v14 = vpop.f32.mrb[8].mxu0 }
 0x5b8   : > { %v3065_v35 = vpop.f32.mrb[9].mxu0 }
 0x5b9   : > { %v798_v36 = vpop.f32.mrb[10].mxu0  ;;  %v3325_v35 = vld [vmem:[%s4107_s6] sm:$0xff]  }
 0x5ba   : > { %v3066_v20 = vpop.f32.mrb[11].mxu0  ;;  %3112 = vmatpush3.bf16.msra.mxu0 %v3325_v35 }
 0x5bb   : > { %3113 = vmatprep.subr.bf16.mxu0 %v3446_v17 }
 0x5bf   : > { %v921_v37 = vpop.f32.mrb[12].mxu0 }
 0x5c0   : > { %v3077_v27 = vpop.f32.mrb[13].mxu0 }
 0x5c1   : > { %v924_v38 = vpop.f32.mrb[14].mxu0 }
 0x5c2   : > { %v3293_v39 = vpack.i.bf16 %v924_v38, %v921_v37  ;;  %v3078_v42 = vpop.f32.mrb[15].mxu0 }
 0x5c4   : > { %3294 = vrot.lane.b32.xlu0 %v3293_v39, %s3453_s18 }
 0x5c7   : > { %v1044_v4 = vpop.f32.mrb[16].mxu0 }
 0x5c8   : > { %v3089_v33 = vpop.f32.mrb[17].mxu0 }
 0x5c9   : > { %v1047_v43 = vpop.f32.mrb[18].mxu0 }
 0x5ca   : > { %v3298_v44 = vpack.i.bf16 %v1047_v43, %v1044_v4  ;;  %v3090_v45 = vpop.f32.mrb[19].mxu0  ;;  %v1289_v4 = vsub.s32 2, %v3585_v25  ;;  %v1295_v43 = vsub.s32 3, %v3585_v25  ;;  %v3336_v25 = vld [vmem:[%s4109_s8 + $0x28] sm:$0xff]  }
 0x5cc   : > { %3299 = vrot.lane.b32.xlu0 %v3298_v44, %s3454_s19  ;;  %v1290_v33 = vrot.slane %v3594_v29, %v1289_v4 }
 0x5cf   : > { %v1167_v46 = vpop.f32.mrb[20].mxu0 }
 0x5d0   : > { %v3101_v47 = vpop.f32.mrb[21].mxu0 }
 0x5d1   : > { %v1170_v48 = vpop.f32.mrb[22].mxu0 }
 0x5d2   : > { %v3303_v49 = vpack.i.bf16 %v1170_v48, %v1167_v46  ;;  %v3102_v50 = vpop.f32.mrb[23].mxu0  ;;  %v1296_v48 = vrot.slane %v3594_v29, %v1295_v43  ;;  %v3328_v29 = vld [vmem:[%s4109_s8 + $0x8] sm:$0xff]  }
 0x5d4   : > { %3304 = vrot.lane.b32.xlu0 %v3303_v49, %s4115_s20 }
 0x5d8   : > { %1212 = vrot.lane.b32.xlu0 %v3580_v18, %s3452_s17 }
 0x636   : > { %v3295_v51 = vpop.permute.xlu0 %3294 }
 0x637   : > { %v3297_v53 = vunpack.i.h.bf16 %v3295_v51  ;;  %v3296_v54 = vunpack.i.l.bf16 %v3295_v51 }
 0x639   : > { %v1199_v58 = vsel %vm684_vm2, %v798_v36, %v3297_v53  ;;  %v1198_v59 = vsel %vm684_vm2, %v795_v14, %v3296_v54  ;;  %v3326_v36 = vld [vmem:[%s4107_s6 + $0x8] sm:$0xff]   ;;  %v3327_v53 = vld [vmem:[%s4109_s8] sm:$0xff]   ;;  %v3329_v54 = vld [vmem:[%s4109_s8 + $0x10] sm:$0xff]  }
 0x63a   : > { %3114 = vmatpush3.bf16.msra.mxu0 %v3326_v36 }
 0x63b   : > { %3131 = vmatprep.subr.bf16.mxu0 %v3446_v17 }
 0x63e   : > { %v3300_v52 = vpop.permute.xlu0 %3299 }
 0x63f   : > { %v3302_v55 = vunpack.i.h.bf16 %v3300_v52  ;;  %v3301_v56 = vunpack.i.l.bf16 %v3300_v52 }
 0x641   : > { %v1200_v62 = vsel %vm734_vm3, %v1198_v59, %v3301_v56  ;;  %v1201_v63 = vsel %vm734_vm3, %v1199_v58, %v3302_v55  ;;  %v3330_v55 = vld [vmem:[%s4109_s8 + $0x18] sm:$0xff]   ;;  %v2879_v56 = vld [vmem:[%s4108_s7] ss:$0 sm:$0xff] }
 0x646   : > { %v3305_v57 = vpop.permute.xlu0 %3304 }
 0x647   : > { %v3307_v60 = vunpack.i.h.bf16 %v3305_v57  ;;  %v3306_v61 = vunpack.i.l.bf16 %v3305_v57 }
 0x649   : > { %v1203_v18 = vsel %vm1202_vm4, %v1200_v62, %v3306_v61  ;;  %v1204_v1 = vsel %vm1202_vm4, %v1201_v63, %v3307_v60 }
 0x64a   : > { %v1205_v3 = vpack.c.bf16 %v1204_v1, %v1203_v18  ;;  %v1213_v5 = vpop.permute.xlu0 %1212 }
 0x64c   : > { %3108 = vmatmul.mubr.msk.bf16.vlgmr.msra.gmra.mrb[20].mxu1 %vm472_vm0, %v1205_v3 }
 0x64d   : > { %3127 = vmatprep.mubr.msk.bf16.mxu1 %vm3447_vm1, %v3446_v17  ;;  %3120 = vmatpush3.bf16.msra.mxu1 %v3327_v53 }
 0x64e   : > { %3121 = vmatprep.subr.bf16.mxu1 %v3446_v17 }
 0x651   : > { %3122 = vmatpush3.bf16.msra.mxu1 %v3328_v29 }
 0x652   : > { %3123 = vmatprep.subr.bf16.mxu1 %v3446_v17 }
 0x655   : > { %3124 = vmatpush3.bf16.msra.mxu1 %v3329_v54 }
 0x656   : > { %3125 = vmatprep.subr.bf16.mxu1 %v3446_v17 }
 0x659   : > { %3126 = vmatpush3.bf16.msra.mxu1 %v3330_v55 }
 0x65a   : > { %3147 = vmatprep.subr.bf16.mxu1 %v3446_v17 }
 0x71f   : > { %v1252_v7 = vpop.f32.mrb[20].mxu1 }
 0x720   : > { %v1253_v8 = vadd.f32 %v1252_v7, %v1213_v5  ;;  %v3109_v9 = vpop.f32.mrb[21].mxu1 }
 0x721   : > { %v1255_v10 = vpop.f32.mrb[22].mxu1 }
 0x722   : > { %v3739_v11 = vadd.f32 %v1253_v8, %v3540_v0  ;;  %v1256_v12 = vadd.f32 %v1255_v10, %v1213_v5  ;;  %v3110_v13 = vpop.f32.mrb[23].mxu1 }
 0x724   : > { %v3742_v16 = vadd.f32 %v1256_v12, %v3544_v2  ;;  %v1261_v19 = vsel %vm472_vm0, %v3739_v11, 0.0 }
 0x725   : > { %1262 = vadd.xlane.f32.xlu1 %v1261_v19 }
 0x726   : > { %v1264_v22 = vsel %vm472_vm0, %v3742_v16, 0.0 }
 0x727   : > { %1265 = vadd.xlane.f32.xlu0 %v1264_v22 }
 0x7b2   : > { %v1263_v23 = vpop.xlane.xlu1 %1262 }
 0x7b3   : > { %v1267_v24 = vmul.f32 0.03125, %v1263_v23 }
 0x7b4   : > { %v1266_v26 = vpop.xlane.xlu0 %1265 }
 0x7b5   : > { %v1269_v30 = vsub.f32 %v3739_v11, %v1267_v24  ;;  %v1268_v0 = vmul.f32 0.03125, %v1266_v26 }
 0x7b7   : > { %v1270_v32 = vsub.f32 %v3742_v16, %v1268_v0  ;;  %v1271_v34 = vmul.f32 %v1269_v30, %v1269_v30 }
 0x7b9   : > { %v1273_v2 = vsel %vm472_vm0, %v1271_v34, 0.0  ;;  %v1272_v6 = vmul.f32 %v1270_v32, %v1270_v32  ;;  %v2883_v34 = vld [vmem:[%s4110_s9] ss:$0 sm:$0xff] }
 0x7ba   : > { %1274 = vadd.xlane.f32.xlu0 %v1273_v2 }
 0x7bb   : > { %v1276_v14 = vsel %vm472_vm0, %v1272_v6, 0.0 }
 0x7bc   : > { %1277 = vadd.xlane.f32.xlu1 %v1276_v14 }
 0x847   : > { %v1275_v20 = vpop.xlane.xlu0 %1274 }
 0x848   : > { %v1279_v37 = vmul.f32 0.03125, %v1275_v20 }
 0x849   : > { %v1278_v27 = vpop.xlane.xlu1 %1277 }
 0x84a   : > { %v1281_v38 = vadd.f32 1e-05, %v1279_v37  ;;  %v1280_v39 = vmul.f32 0.03125, %v1278_v27 }
 0x84c   : > { %3377 = vrsqrt.f32 %v1281_v38  ;;  %v1282_v42 = vadd.f32 1e-05, %v1280_v39 }
 0x84e   : > { %3379 = vrsqrt.f32 %v1282_v42  ;;  %v3809_v42 = vld [vmem:[%s4105_s4 + $0x10] sm:$0xff]  }
 0x856   : > { %v3378_v15 = vpop.eup %3377 }
 0x857   : > { %v1285_v44 = vmul.f32 %v3378_v15, %v1269_v30 }
 0x858   : > { %v3380_v45 = vpop.eup %3379 }
 0x859   : > { %v1291_v46 = vmul.f32 %v1290_v33, %v1285_v44  ;;  %v1286_v47 = vmul.f32 %v3380_v45, %v1270_v32 }
 0x85b   : > { %v1292_v49 = vmul.f32 %v1290_v33, %v1286_v47  ;;  %v1297_v50 = vadd.f32 %v1296_v48, %v1291_v46 }
 0x85d   : > { %v1298_v51 = vadd.f32 %v1296_v48, %v1292_v49 }
 0x85f   : > { %v1299_v52 = vpack.c.bf16 %v1298_v51, %v1297_v50  ;;  %v3831_v51 = vld [vmem:[%s4106_s5 + $0x1] ss:$0 sm:$0xff] }
 0x861   : > { %3116 = vmatmul.mubr.msk.bf16.vlgmr.msra.gmra.mrb[24].mxu0 %vm472_vm0, %v1299_v52 }
 0x862   : > { %3135 = vmatprep.mubr.msk.bf16.mxu0 %vm3447_vm1, %v3446_v17  ;;  %3132 = vmatpush3.bf16.msra.mxu0 %v3809_v42 }
 0x863   : > { %3133 = vmatprep.subr.bf16.mxu0 %v3446_v17 }
 0x934   : > { %v1360_v57 = vpop.f32.mrb[24].mxu0 }
 0x935   : > { %v1361_v58 = vadd.f32 %v2879_v56, %v1360_v57  ;;  %v3117_v59 = vpop.f32.mrb[25].mxu0  ;;  %v3838_v57 = vld [vmem:[%s4104_s3 + $0x4] sm:$0xf] }
 0x936   : > { %v1363_v60 = vpop.f32.mrb[26].mxu0 }
 0x937   : > { %v1367_v61 = vmul.f32 %v1361_v58, %v1361_v58  ;;  %v1364_v62 = vadd.f32 %v2879_v56, %v1363_v60  ;;  %v3118_v63 = vpop.f32.mrb[27].mxu0 }
 0x939   : > { %v1369_v18 = vmul.f32 %v1367_v61, %v1361_v58  ;;  %v1368_v1 = vmul.f32 %v1364_v62, %v1364_v62  ;;  %v1516_v61 = vrot.slane %v3838_v57, %v3599_v31 }
 0x93b   : > { %v1371_v3 = vmul.f32 0.044715, %v1369_v18  ;;  %v1370_v5 = vmul.f32 %v1368_v1, %v1364_v62 }
 0x93d   : > { %v1373_v7 = vadd.f32 %v1371_v3, %v1361_v58  ;;  %v1372_v8 = vmul.f32 0.044715, %v1370_v5 }
 0x93f   : > { %v1375_v9 = vmul.f32 0.7978846, %v1373_v7  ;;  %v1374_v10 = vadd.f32 %v1372_v8, %v1364_v62 }
 0x941   : > { %3381 = vtanh.f32 %v1375_v9  ;;  %v1376_v12 = vmul.f32 0.7978846, %v1374_v10 }
 0x943   : > { %3383 = vtanh.f32 %v1376_v12 }
 0x94b   : > { %v3382_v13 = vpop.eup %3381 }
 0x94c   : > { %v1379_v19 = vadd.f32 1.0, %v3382_v13 }
 0x94d   : > { %v3384_v22 = vpop.eup %3383 }
 0x94e   : > { %v1381_v23 = vmul.f32 0.5, %v1379_v19  ;;  %v1380_v24 = vadd.f32 1.0, %v3384_v22 }
 0x950   : > { %v1382_v26 = vmul.f32 0.5, %v1380_v24  ;;  %v1383_v30 = vmul.f32 %v1381_v23, %v1361_v58  ;;  %v1510_v58 = vrot.slane %v3838_v57, %v3588_v28 }
 0x952   : > { %v1384_v0 = vmul.f32 %v1382_v26, %v1364_v62 }
 0x954   : > { %v1385_v32 = vpack.c.bf16 %v1384_v0, %v1383_v30 }
 0x956   : > { %3128 = vmatmul.mubr.msk.bf16.vlgmr.msra.gmra.mrb[24].mxu1 %vm1425_vm5, %v1385_v32 }
 0x957   : > { %3151 = vmatprep.mubr.msk.bf16.mxu1 %vm3447_vm1, %v3446_v17 }
 0xa29   : > { %v1463_v2 = vpop.f32.mrb[24].mxu1 }
 0xa2a   : > { %v1464_v6 = vadd.f32 %v2883_v34, %v1463_v2  ;;  %v3129_v14 = vpop.f32.mrb[25].mxu1 }
 0xa2b   : > { %v1466_v35 = vpop.f32.mrb[26].mxu1 }
 0xa2c   : > { %v3797_v36 = vadd.f32 %v1464_v6, %v3739_v11  ;;  %v1467_v20 = vadd.f32 %v2883_v34, %v1466_v35  ;;  %v3130_v37 = vpop.f32.mrb[27].mxu1  ;;  %v3816_v11 = vld [vmem:[%s4105_s4 + $0x18] sm:$0xff]  }
 0xa2d   : > { %3134 = vmatpush3.bf16.msra.mxu0 %v3816_v11 }
 0xa2e   : > { %v3800_v27 = vadd.f32 %v1467_v20, %v3742_v16  ;;  %v1481_v38 = vsel %vm472_vm0, %v3797_v36, 0.0  ;;  %3139 = vmatprep.subr.bf16.mxu0 %v3446_v17 }
 0xa2f   : > { %1482 = vadd.xlane.f32.xlu0 %v1481_v38 }
 0xa30   : > { %v1484_v39 = vsel %vm472_vm0, %v3800_v27, 0.0 }
 0xa31   : > { %1485 = vadd.xlane.f32.xlu1 %v1484_v39 }
 0xabc   : > { %v1483_v16 = vpop.xlane.xlu0 %1482 }
 0xabd   : > { %v1487_v33 = vmul.f32 0.03125, %v1483_v16 }
 0xabe   : > { %v1486_v15 = vpop.xlane.xlu1 %1485 }
 0xabf   : > { %v1489_v44 = vsub.f32 %v3797_v36, %v1487_v33  ;;  %v1488_v45 = vmul.f32 0.03125, %v1486_v15 }
 0xac1   : > { %v1490_v46 = vsub.f32 %v3800_v27, %v1488_v45  ;;  %v1491_v47 = vmul.f32 %v1489_v44, %v1489_v44 }
 0xac3   : > { %v1493_v48 = vsel %vm472_vm0, %v1491_v47, 0.0  ;;  %v1492_v49 = vmul.f32 %v1490_v46, %v1490_v46 }
 0xac4   : > { %1494 = vadd.xlane.f32.xlu0 %v1493_v48 }
 0xac5   : > { %v1496_v50 = vsel %vm472_vm0, %v1492_v49, 0.0 }
 0xac6   : > { %1497 = vadd.xlane.f32.xlu1 %v1496_v50 }
 0xad7   : > { %1587 = vrot.lane.b32.xlu1 %v3816_v11, %s3445_s16 }
 0xada   : > { %1585 = vrot.lane.b32.xlu0 %v3809_v42, %s3445_s16 }
 0xadb   : > { %1591 = vrot.lane.b32.xlu1 %v3831_v51, %s3445_s16  ;;  %s4116_s16 = smov 24  }
 0xb51   : > { %v1495_v52 = vpop.xlane.xlu0 %1494 }
 0xb52   : > { %v1499_v53 = vmul.f32 0.03125, %v1495_v52 }
 0xb53   : > { %v1498_v29 = vpop.xlane.xlu1 %1497 }
 0xb54   : > { %v1501_v54 = vadd.f32 1e-05, %v1499_v53  ;;  %v1500_v55 = vmul.f32 0.03125, %v1498_v29 }
 0xb55   : > { %v1586_v10 = vpop.permute.xlu0 %1585 }
 0xb56   : > { %3385 = vrsqrt.f32 %v1501_v54  ;;  %v1502_v56 = vadd.f32 1e-05, %v1500_v55 }
 0xb57   : > { %v1588_v13 = vpop.permute.xlu1 %1587 }
 0xb58   : > { %3387 = vrsqrt.f32 %v1502_v56 }
 0xb5b   : > { %v1592_v0 = vpop.permute.xlu1 %1591 }
 0xb60   : > { %v3386_v59 = vpop.eup %3385 }
 0xb61   : > { %v1505_v60 = vmul.f32 %v3386_v59, %v1489_v44 }
 0xb62   : > { %v3388_v62 = vpop.eup %3387 }
 0xb63   : > { %v1511_v63 = vmul.f32 %v1510_v58, %v1505_v60  ;;  %v1506_v18 = vmul.f32 %v3388_v62, %v1490_v46 }
 0xb65   : > { %v1512_v1 = vmul.f32 %v1510_v58, %v1506_v18  ;;  %v3844_v3 = vadd.f32 %v1516_v61, %v1511_v63 }
 0xb67   : > { %v3846_v5 = vadd.f32 %v1516_v61, %v1512_v1  ;;  %v1519_v7 = vadd.f32 %v3844_v3, %v3608_v40 }
 0xb69   : > { %v1520_v8 = vadd.f32 %v3846_v5, %v3613_v41  ;;  %v1522_v9 = vpack.c.bf16 %v3846_v5, %v3844_v3 }
 0xb6b   : > { %v1521_v12 = vpack.c.bf16 %v1520_v8, %v1519_v7 }
 0xb6d   : > { %3136 = vmatmul.mubr.msk.bf16.vlgmr.msra.gmra.mrb[28].mxu0 %vm472_vm0, %v1521_v12 }
 0xb6e   : > { %3140 = vmatpush3.bf16.msra.mxu0 %v1586_v10  ;;  %3143 = vmatprep.mubr.msk.bf16.mxu0 %vm3447_vm1, %v3446_v17 }
 0xb6f   : > { %3141 = vmatprep.subr.bf16.mxu0 %v3446_v17 }
 0xb72   : > { %3142 = vmatpush3.bf16.msra.mxu0 %v1588_v13 }
 0xb73   : > { %3155 = vmatprep.subr.bf16.mxu0 %v3446_v17 }
 0xb75   : > { %3144 = vmatmul.mubr.msk.bf16.vlgmr.msra.gmra.mrb[32].mxu0 %vm472_vm0, %v1521_v12 }
 0xb76   : > { %3157 = vmatprep.mubr.msk.bf16.mxu0 %vm3447_vm1, %v3446_v17 }
 0xc40   : > { %v1578_v40 = vpop.f32.mrb[28].mxu0 }
 0xc41   : > { %v3137_v41 = vpop.f32.mrb[29].mxu0  ;;  %v1579_v22 = vadd.f32 %v3831_v51, %v1578_v40 }
 0xc42   : > { %v1581_v19 = vpop.f32.mrb[30].mxu0 }
 0xc43   : > { %v1582_v23 = vadd.f32 %v3831_v51, %v1581_v19  ;;  %v3138_v24 = vpop.f32.mrb[31].mxu0 }
 0xc45   : > { %v1688_v26 = vpack.c.bf16 %v1582_v23, %v1579_v22 }
 0xc47   : > { %1808 = vrot.lane.b32.xlu1 %v1688_v26, %s3448_s29 }
 0xc48   : > { %v1628_v30 = vpop.f32.mrb[32].mxu0 }
 0xc49   : > { %v3145_v32 = vpop.f32.mrb[33].mxu0  ;;  %v1629_v2 = vadd.f32 %v1628_v30, %v1592_v0 }
 0xc4a   : > { %v1631_v34 = vpop.f32.mrb[34].mxu0 }
 0xc4b   : > { %v1632_v6 = vadd.f32 %v1631_v34, %v1592_v0  ;;  %1933 = vrot.lane.b32.xlu1 %v1688_v26, %s3449_s30  ;;  %v3146_v14 = vpop.f32.mrb[35].mxu0 }
 0xc4d   : > { %v1689_v35 = vpack.c.bf16 %v1632_v6, %v1629_v2 }
 0xc4f   : > { %2056 = vrot.lane.b32.xlu1 %v1688_v26, %s3450_s14  ;;  %1811 = vrot.lane.b32.xlu0 %v1689_v35, %s3448_s29  ;;  %v1695_v20 = vsel %vm684_vm2, %v1689_v35, 0 }
 0xc50   : > { %3156 = vmatpush3.bf16.xpose.msra.mxu0 %v1695_v20 }
 0xc51   : > { %3167 = vmatprep.subr.bf16.mxu0 %v3446_v17 }
 0xc53   : > { %1935 = vrot.lane.b32.xlu0 %v1689_v35, %s3449_s30  ;;  %1637 = vrot.lane.b32.xlu1 %v3816_v11, %s3451_s15 }
 0xc57   : > { %2058 = vrot.lane.b32.xlu0 %v1689_v35, %s3450_s14  ;;  %3158 = vmatmul.mubr.msk.bf16.vlgmr.msra.gmra.mrb[36].mxu0 %vm684_vm2, %v1688_v26 }
 0xc58   : > { %3169 = vmatprep.mubr.msk.bf16.mxu0 %vm3447_vm1, %v3446_v17 }
 0xc5b   : > { %1635 = vrot.lane.b32.xlu0 %v3809_v42, %s3451_s15 }
 0xcb9   : > { %v1809_v37 = vpop.permute.xlu1 %1808 }
 0xcbd   : > { %v1934_v16 = vpop.permute.xlu1 %1933 }
 0xcc1   : > { %v1812_v38 = vpop.permute.xlu0 %1811  ;;  %v2057_v45 = vpop.permute.xlu1 %2056 }
 0xcc2   : > { %v1817_v39 = vsel %vm684_vm2, %v1812_v38, 0 }
 0xcc3   : > { %3168 = vmatpush3.bf16.xpose.msra.mxu0 %v1817_v39 }
 0xcc4   : > { %3179 = vmatprep.subr.bf16.mxu0 %v3446_v17 }
 0xcc5   : > { %v1936_v33 = vpop.permute.xlu0 %1935  ;;  %v1638_v47 = vpop.permute.xlu1 %1637 }
 0xcc6   : > { %v1941_v44 = vsel %vm684_vm2, %v1936_v33, 0 }
 0xcc9   : > { %v2059_v15 = vpop.permute.xlu0 %2058 }
 0xcca   : > { %3170 = vmatmul.mubr.msk.bf16.vlgmr.msra.gmra.mrb[40].mxu0 %vm684_vm2, %v1809_v37  ;;  %v2064_v48 = vsel %vm684_vm2, %v2059_v15, 0 }
 0xccb   : > { %3180 = vmatpush3.bf16.xpose.msra.mxu0 %v1941_v44  ;;  %3181 = vmatprep.mubr.msk.bf16.mxu0 %vm3447_vm1, %v3446_v17 }
 0xccc   : > { %3191 = vmatprep.subr.bf16.mxu0 %v3446_v17 }
 0xccd   : > { %v1636_v46 = vpop.permute.xlu0 %1635 }
 0xcce   : > { %3148 = vmatpush3.bf16.msra.mxu1 %v1636_v46 }
 0xccf   : > { %3149 = vmatprep.subr.bf16.mxu1 %v3446_v17 }
 0xcd2   : > { %3150 = vmatpush3.bf16.msra.mxu1 %v1638_v47  ;;  %3182 = vmatmul.mubr.msk.bf16.vlgmr.msra.gmra.mrb[44].mxu0 %vm684_vm2, %v1934_v16 }
 0xcd3   : > { %3192 = vmatpush3.bf16.xpose.msra.mxu0 %v2064_v48  ;;  %3193 = vmatprep.mubr.msk.bf16.mxu0 %vm3447_vm1, %v3446_v17 }
 0xcd4   : > { %3161 = vmatprep.subr.bf16.mxu1 %v3446_v17  ;;  %3203 = vmatprep.subr.bf16.mxu0 %v3446_v17 }
 0xcd5   : > { %3152 = vmatmul.mubr.msk.bf16.vlgmr.msra.gmra.mrb[28].mxu1 %vm472_vm0, %v1522_v9 }
 0xcd6   : > { %3163 = vmatprep.mubr.msk.bf16.mxu1 %vm3447_vm1, %v3446_v17 }
 0xcda   : > { %3194 = vmatmul.mubr.msk.bf16.vlgmr.msra.gmra.mrb[48].mxu0 %vm684_vm2, %v2057_v45 }
 0xcdb   : > { %3207 = vmatprep.mubr.msk.bf16.mxu0 %vm3447_vm1, %v3446_v17 }
 0xd2a   : > { %v1731_v49 = vpop.f32.mrb[36].mxu0 }
 0xd2b   : > { %v3902_v50 = vmul.f32 0.35355338, %v1731_v49  ;;  %v3159_v52 = vpop.f32.mrb[37].mxu0 }
 0xd2c   : > { %v1734_v53 = vpop.f32.mrb[38].mxu0 }
 0xd2d   : > { %v3904_v29 = vmul.f32 0.35355338, %v1734_v53  ;;  %v3160_v54 = vpop.f32.mrb[39].mxu0  ;;  %v1740_v55 = vsel %vm734_vm3, %v3902_v50, -inf }
 0xd2e   : > { %1741 = vmax.xlane.f32.xlu0 %v1740_v55 }
 0xd2f   : > { %v1743_v56 = vsel %vm734_vm3, %v3904_v29, -inf }
 0xd30   : > { %1744 = vmax.xlane.f32.xlu1 %v1743_v56 }
 0xd9d   : > { %v1853_v58 = vpop.f32.mrb[40].mxu0 }
 0xd9e   : > { %v1860_v59 = vmul.f32 0.35355338, %v1853_v58  ;;  %v3171_v60 = vpop.f32.mrb[41].mxu0 }
 0xd9f   : > { %v1856_v61 = vpop.f32.mrb[42].mxu0 }
 0xda0   : > { %v3910_v62 = vmul.f32 0.35355338, %v1856_v61  ;;  %v3172_v63 = vpop.f32.mrb[43].mxu0  ;;  %v1862_v18 = vsel %vm734_vm3, %v1860_v59, -inf }
 0xda1   : > { %1863 = vmax.xlane.f32.xlu0 %v1862_v18 }
 0xda2   : > { %v1865_v1 = vsel %vm734_vm3, %v3910_v62, -inf }
 0xda5   : > { %1866 = vmax.xlane.f32.xlu0 %v1865_v1  ;;  %v1977_v3 = vpop.f32.mrb[44].mxu0 }
 0xda6   : > { %v1984_v5 = vmul.f32 0.35355338, %v1977_v3  ;;  %v3183_v7 = vpop.f32.mrb[45].mxu0 }
 0xda7   : > { %v1980_v8 = vpop.f32.mrb[46].mxu0 }
 0xda8   : > { %v1985_v9 = vmul.f32 0.35355338, %v1980_v8  ;;  %v1681_v10 = vpop.f32.mrb[28].mxu1  ;;  %v3184_v12 = vpop.f32.mrb[47].mxu0  ;;  %v1986_v13 = vsel %vm734_vm3, %v1984_v5, -inf }
 0xda9   : > { %1987 = vmax.xlane.f32.xlu1 %v1986_v13  ;;  %v3153_v40 = vpop.f32.mrb[29].mxu1 }
 0xdaa   : > { %v1684_v41 = vpop.f32.mrb[30].mxu1  ;;  %v1989_v19 = vsel %vm734_vm3, %v1985_v9, -inf }
 0xdab   : > { %1990 = vmax.xlane.f32.xlu0 %v1989_v19  ;;  %v3154_v22 = vpop.f32.mrb[31].mxu1 }
 0xdad   : > { %v2100_v23 = vpop.f32.mrb[48].mxu0 }
 0xdae   : > { %v2107_v24 = vmul.f32 0.35355338, %v2100_v23  ;;  %v3195_v26 = vpop.f32.mrb[49].mxu0 }
 0xdaf   : > { %v2103_v30 = vpop.f32.mrb[50].mxu0 }
 0xdb0   : > { %v2108_v0 = vmul.f32 0.35355338, %v2103_v30  ;;  %v3196_v32 = vpop.f32.mrb[51].mxu0  ;;  %v2109_v34 = vsel %vm734_vm3, %v2107_v24, -inf }
 0xdb1   : > { %2110 = vmax.xlane.f32.xlu1 %v2109_v34 }
 0xdb2   : > { %v2112_v2 = vsel %vm734_vm3, %v2108_v0, -inf }
 0xdb3   : > { %2113 = vmax.xlane.f32.xlu0 %v2112_v2 }
 0xdbb   : > { %v1742_v45 = vpop.xlane.xlu0 %1741 }
 0xdbc   : > { %v1746_v46 = vsub.f32 %v3902_v50, %v1742_v45 }
 0xdbd   : > { %v1745_v6 = vpop.xlane.xlu1 %1744 }
 0xdbe   : > { %v1748_v48 = vmul.f32 1.442695, %v1746_v46  ;;  %v1747_v49 = vsub.f32 %v3904_v29, %v1745_v6 }
 0xdc0   : > { %v1750_v52 = vmul.f32 1.442695, %v1747_v49 }
 0xdc2   : > { %1641 = vrot.lane.b32.xlu1 %v3831_v51, %s3451_s15 }
 0xe2e   : > { %v1864_v47 = vpop.xlane.xlu0 %1863 }
 0xe2f   : > { %v1868_v53 = vsub.f32 %v1860_v59, %v1864_v47 }
 0xe31   : > { %v1870_v55 = vmul.f32 1.442695, %v1868_v53 }
 0xe32   : > { %v1867_v54 = vpop.xlane.xlu0 %1866 }
 0xe33   : > { %v1869_v56 = vsub.f32 %v3910_v62, %v1867_v54 }
 0xe35   : > { %v1872_v50 = vmul.f32 1.442695, %v1869_v56 }
 0xe36   : > { %v1988_v14 = vpop.xlane.xlu1 %1987 }
 0xe37   : > { %v1992_v35 = vsub.f32 %v1984_v5, %v1988_v14 }
 0xe38   : > { %v1991_v58 = vpop.xlane.xlu0 %1990 }
 0xe39   : > { %v1994_v20 = vmul.f32 1.442695, %v1992_v35  ;;  %v1993_v60 = vsub.f32 %v1985_v9, %v1991_v58 }
 0xe3b   : > { %3389 = vpow2.f32 %v1994_v20  ;;  %v1996_v29 = vmul.f32 1.442695, %v1993_v60 }
 0xe3c   : > { %3391 = vpow2.f32 %v1748_v48 }
 0xe3d   : > { %3393 = vpow2.f32 %v1750_v52 }
 0xe3e   : > { %v2111_v37 = vpop.xlane.xlu1 %2110  ;;  %3395 = vpow2.f32 %v1870_v55 }
 0xe3f   : > { %3397 = vpow2.f32 %v1872_v50  ;;  %v2115_v63 = vsub.f32 %v2107_v24, %v2111_v37 }
 0xe40   : > { %v2114_v18 = vpop.xlane.xlu0 %2113  ;;  %3399 = vpow2.f32 %v1996_v29 }
 0xe41   : > { %v2117_v3 = vmul.f32 1.442695, %v2115_v63  ;;  %v2116_v5 = vsub.f32 %v2108_v0, %v2114_v18 }
 0xe42   : > { %v1642_v38 = vpop.permute.xlu1 %1641 }
 0xe43   : > { %v1682_v39 = vadd.f32 %v1681_v10, %v1642_v38  ;;  %v1685_v16 = vadd.f32 %v1684_v41, %v1642_v38  ;;  %3401 = vpow2.f32 %v2117_v3 }
 0xe45   : > { %v3921_v33 = vpop.eup %3389  ;;  %v1690_v15 = vpack.c.bf16 %v1685_v16, %v1682_v39 }
 0xe46   : > { %v1998_v44 = vsel %vm734_vm3, %v3921_v33, 0.0  ;;  %v3392_v61 = vpop.eup %3391 }
 0xe47   : > { %1999 = vadd.xlane.f32.xlu1 %v1998_v44  ;;  %1886 = vrot.lane.b32.xlu0 %v1690_v15, %s3448_s29  ;;  %v1752_v59 = vsel %vm734_vm3, %v3392_v61, 0.0  ;;  %v3394_v1 = vpop.eup %3393 }
 0xe48   : > { %3162 = vmatpush3.bf16.msra.mxu1 %v1690_v15  ;;  %v1755_v62 = vsel %vm734_vm3, %v3394_v1, 0.0  ;;  %v3396_v7 = vpop.eup %3395 }
 0xe49   : > { %3173 = vmatprep.subr.bf16.mxu1 %v3446_v17  ;;  %v1874_v8 = vsel %vm734_vm3, %v3396_v7, 0.0  ;;  %v3398_v9 = vpop.eup %3397 }
 0xe4a   : > { %v1877_v10 = vsel %vm734_vm3, %v3398_v9, 0.0  ;;  %v3400_v12 = vpop.eup %3399 }
 0xe4b   : > { %v2001_v13 = vsel %vm734_vm3, %v3400_v12, 0.0 }
 0xe4d   : > { %v3402_v40 = vpop.eup %3401 }
 0xe4e   : > { %v2121_v41 = vsel %vm734_vm3, %v3402_v40, 0.0 }
 0xe58   : > { %2132 = vrot.lane.b32.xlu1 %v1690_v15, %s3450_s14 }
 0xe5c   : > { %2212 = vrot.lane.b32.xlu1 %v3816_v11, %s3452_s17  ;;  %v2119_v11 = vmul.f32 1.442695, %v2116_v5 }
 0xe5e   : > { %3403 = vpow2.f32 %v2119_v11 }
 0xe66   : > { %1753 = vadd.xlane.f32.xlu0 %v1752_v59 }
 0xe68   : > { %v3404_v19 = vpop.eup %3403 }
 0xe69   : > { %v2124_v22 = vsel %vm734_vm3, %v3404_v19, 0.0 }
 0xe6a   : > { %1756 = vadd.xlane.f32.xlu0 %v1755_v62 }
 0xe6e   : > { %1875 = vadd.xlane.f32.xlu0 %v1874_v8 }
 0xe72   : > { %1878 = vadd.xlane.f32.xlu0 %v1877_v10 }
 0xe76   : > { %2002 = vadd.xlane.f32.xlu0 %v2001_v13 }
 0xe7a   : > { %2122 = vadd.xlane.f32.xlu0 %v2121_v41 }
 0xe7e   : > { %2125 = vadd.xlane.f32.xlu0 %v2124_v22 }
 0xe94   : > { %2009 = vrot.lane.b32.xlu0 %v1690_v15, %s3449_s30 }
 0xe98   : > { %2210 = vrot.lane.b32.xlu0 %v3809_v42, %s3452_s17 }
 0xeb9   : > { %v1887_v23 = vpop.permute.xlu0 %1886 }
 0xed4   : > { %v2000_v2 = vpop.xlane.xlu1 %1999 }
 0xed8   : > { %v2133_v54 = vpop.permute.xlu1 %2132 }
 0xedc   : > { %v2213_v8 = vpop.permute.xlu1 %2212 }
 0xef3   : > { %v1754_v24 = vpop.xlane.xlu0 %1753 }
 0xef4   : > { %3405 = vrcp.f32 %v1754_v24 }
 0xef7   : > { %v1757_v26 = vpop.xlane.xlu0 %1756 }
 0xef8   : > { %3407 = vrcp.f32 %v1757_v26 }
 0xefb   : > { %v1876_v30 = vpop.xlane.xlu0 %1875 }
 0xefc   : > { %3409 = vrcp.f32 %v1876_v30 }
 0xefe   : > { %v3406_v32 = vpop.eup %3405 }
 0xeff   : > { %v1879_v0 = vpop.xlane.xlu0 %1878  ;;  %v1760_v6 = vmul.f32 %v3406_v32, %v3392_v61 }
 0xf00   : > { %3411 = vrcp.f32 %v1879_v0 }
 0xf02   : > { %v3408_v34 = vpop.eup %3407 }
 0xf03   : > { %v1761_v14 = vmul.f32 %v3408_v34, %v3394_v1  ;;  %v2003_v35 = vpop.xlane.xlu0 %2002 }
 0xf04   : > { %3413 = vrcp.f32 %v2003_v35 }
 0xf05   : > { %v1762_v20 = vpack.c.bf16 %v1761_v14, %v1760_v6  ;;  %3415 = vrcp.f32 %v2000_v2 }
 0xf06   : > { %v3410_v42 = vpop.eup %3409 }
 0xf07   : > { %v2123_v37 = vpop.xlane.xlu0 %2122  ;;  %3164 = vmatmul.mubr.msk.bf16.vlgmr.msra.gmra.mrb[32].mxu1 %vm734_vm3, %v1762_v20  ;;  %v1882_v39 = vmul.f32 %v3410_v42, %v3396_v7 }
 0xf08   : > { %3174 = vmatpush3.bf16.msra.mxu1 %v1887_v23  ;;  %3175 = vmatprep.mubr.msk.bf16.mxu1 %vm3447_vm1, %v3446_v17 }
 0xf09   : > { %3185 = vmatprep.subr.bf16.mxu1 %v3446_v17 }
 0xf0a   : > { %v3412_v38 = vpop.eup %3411 }
 0xf0b   : > { %v1883_v16 = vmul.f32 %v3412_v38, %v3398_v9  ;;  %v2126_v15 = vpop.xlane.xlu0 %2125 }
 0xf0c   : > { %3417 = vrcp.f32 %v2126_v15 }
 0xf0d   : > { %v1884_v44 = vpack.c.bf16 %v1883_v16, %v1882_v39  ;;  %3419 = vrcp.f32 %v2123_v37 }
 0xf0e   : > { %v3414_v45 = vpop.eup %3413 }
 0xf0f   : > { %v2010_v46 = vpop.permute.xlu0 %2009  ;;  %3176 = vmatmul.mubr.msk.bf16.vlgmr.msra.gmra.mrb[36].mxu1 %vm734_vm3, %v1884_v44  ;;  %v3416_v47 = vpop.eup %3415  ;;  %v2007_v48 = vmul.f32 %v3414_v45, %v3400_v12 }
 0xf10   : > { %3186 = vmatpush3.bf16.msra.mxu1 %v2010_v46  ;;  %3187 = vmatprep.mubr.msk.bf16.mxu1 %vm3447_vm1, %v3446_v17  ;;  %v2006_v49 = vmul.f32 %v3416_v47, %v3921_v33 }
 0xf11   : > { %3197 = vmatprep.subr.bf16.mxu1 %v3446_v17 }
 0xf12   : > { %v2008_v52 = vpack.c.bf16 %v2007_v48, %v2006_v49 }
 0xf13   : > { %v2211_v33 = vpop.permute.xlu0 %2210 }
 0xf14   : > { %3204 = vmatpush3.bf16.msra.mxu0 %v2211_v33 }
 0xf15   : > { %3205 = vmatprep.subr.bf16.mxu0 %v3446_v17 }
 0xf16   : > { %v3418_v53 = vpop.eup %3417 }
 0xf17   : > { %3188 = vmatmul.mubr.msk.bf16.vlgmr.msra.gmra.mrb[40].mxu1 %vm734_vm3, %v2008_v52  ;;  %v3420_v55 = vpop.eup %3419  ;;  %v2130_v56 = vmul.f32 %v3418_v53, %v3404_v19 }
 0xf18   : > { %3198 = vmatpush3.bf16.msra.mxu1 %v2133_v54  ;;  %3199 = vmatprep.mubr.msk.bf16.mxu1 %vm3447_vm1, %v3446_v17  ;;  %v2129_v58 = vmul.f32 %v3420_v55, %v3402_v40 }
 0xf19   : > { %3211 = vmatprep.subr.bf16.mxu1 %v3446_v17  ;;  %3206 = vmatpush3.bf16.msra.mxu0 %v2213_v8 }
 0xf1a   : > { %v2131_v50 = vpack.c.bf16 %v2130_v56, %v2129_v58  ;;  %3219 = vmatprep.subr.bf16.mxu0 %v3446_v17 }
 0xf1f   : > { %3200 = vmatmul.mubr.msk.bf16.vlgmr.msra.gmra.mrb[44].mxu1 %vm734_vm3, %v2131_v50 }
 0xf20   : > { %3215 = vmatprep.mubr.msk.bf16.mxu1 %vm3447_vm1, %v3446_v17 }
 0xfda   : > { %v1800_v60 = vpop.f32.mrb[32].mxu1 }
 0xfdb   : > { %v3165_v61 = vpop.f32.mrb[33].mxu1 }
 0xfdc   : > { %v1803_v29 = vpop.f32.mrb[34].mxu1  ;;  %v3333_v61 = vld [vmem:[%s4107_s6 + $0x10] sm:$0xff]  }
 0xfdd   : > { %v3166_v63 = vpop.f32.mrb[35].mxu1  ;;  %3212 = vmatpush3.bf16.msra.mxu1 %v3333_v61 }
 0xfde   : > { %3213 = vmatprep.subr.bf16.mxu1 %v3446_v17 }
 0xfe2   : > { %v1926_v18 = vpop.f32.mrb[36].mxu1 }
 0xfe3   : > { %v3177_v59 = vpop.f32.mrb[37].mxu1 }
 0xfe4   : > { %v1929_v1 = vpop.f32.mrb[38].mxu1 }
 0xfe5   : > { %v3308_v3 = vpack.i.bf16 %v1929_v1, %v1926_v18  ;;  %v3178_v5 = vpop.f32.mrb[39].mxu1 }
 0xfe7   : > { %3309 = vrot.lane.b32.xlu0 %v3308_v3, %s3453_s18 }
 0xfea   : > { %v2049_v62 = vpop.f32.mrb[40].mxu1 }
 0xfeb   : > { %v3189_v7 = vpop.f32.mrb[41].mxu1 }
 0xfec   : > { %v2052_v11 = vpop.f32.mrb[42].mxu1 }
 0xfed   : > { %v3313_v9 = vpack.i.bf16 %v2052_v11, %v2049_v62  ;;  %v3190_v10 = vpop.f32.mrb[43].mxu1  ;;  %v2294_v62 = vrot.slane %v3838_v57, %v1289_v4  ;;  %v3335_v4 = vld [vmem:[%s4109_s8 + $0x20] sm:$0xff]  }
 0xfef   : > { %3314 = vrot.lane.b32.xlu0 %v3313_v9, %s3454_s19 }
 0xff2   : > { %v2172_v12 = vpop.f32.mrb[44].mxu1 }
 0xff3   : > { %v3201_v13 = vpop.f32.mrb[45].mxu1 }
 0xff4   : > { %v2175_v40 = vpop.f32.mrb[46].mxu1 }
 0xff5   : > { %v3318_v41 = vpack.i.bf16 %v2175_v40, %v2172_v12  ;;  %v3202_v19 = vpop.f32.mrb[47].mxu1  ;;  %v2300_v12 = vrot.slane %v3838_v57, %v1295_v43  ;;  %v3337_v43 = vld [vmem:[%s4109_s8 + $0x30] sm:$0xff]   ;;  %v3338_v57 = vld [vmem:[%s4109_s8 + $0x38] sm:$0xff]  }
 0xff7   : > { %3319 = vrot.lane.b32.xlu0 %v3318_v41, %s4116_s16 }
 0xffb   : > { %2216 = vrot.lane.b32.xlu0 %v3831_v51, %s3452_s17 }
0x1059   : > { %v3310_v22 = vpop.permute.xlu0 %3309 }
0x105a   : > { %v3312_v24 = vunpack.i.h.bf16 %v3310_v22  ;;  %v3311_v26 = vunpack.i.l.bf16 %v3310_v22  ;;  %v2915_v22 = vld [vmem:[%s4108_s7 + $0x1] ss:$0 sm:$0xff] }
0x105c   : > { %v2204_v34 = vsel %vm684_vm2, %v1803_v29, %v3312_v24  ;;  %v2203_v2 = vsel %vm684_vm2, %v1800_v60, %v3311_v26  ;;  %v3334_v29 = vld [vmem:[%s4107_s6 + $0x18] sm:$0xff]  }
0x105d   : > { %3214 = vmatpush3.bf16.msra.mxu1 %v3334_v29 }
0x105e   : > { %3231 = vmatprep.subr.bf16.mxu1 %v3446_v17 }
0x1061   : > { %v3315_v23 = vpop.permute.xlu0 %3314 }
0x1062   : > { %v3317_v30 = vunpack.i.h.bf16 %v3315_v23  ;;  %v3316_v0 = vunpack.i.l.bf16 %v3315_v23 }
0x1064   : > { %v2206_v35 = vsel %vm734_vm3, %v2204_v34, %v3317_v30  ;;  %v2205_v20 = vsel %vm734_vm3, %v2203_v2, %v3316_v0 }
0x1069   : > { %v3320_v32 = vpop.permute.xlu0 %3319 }
0x106a   : > { %v3322_v6 = vunpack.i.h.bf16 %v3320_v32  ;;  %v3321_v14 = vunpack.i.l.bf16 %v3320_v32 }
0x106c   : > { %v2208_v37 = vsel %vm1202_vm4, %v2206_v35, %v3322_v6  ;;  %v2207_v51 = vsel %vm1202_vm4, %v2205_v20, %v3321_v14 }
0x106d   : > { %v2209_v42 = vpack.c.bf16 %v2208_v37, %v2207_v51  ;;  %v2217_v38 = vpop.permute.xlu0 %2216 }
0x106f   : > { %3208 = vmatmul.mubr.msk.bf16.vlgmr.msra.gmra.mrb[52].mxu0 %vm472_vm0, %v2209_v42 }
0x1070   : > { %3227 = vmatprep.mubr.msk.bf16.mxu0 %vm3447_vm1, %v3446_v17  ;;  %3220 = vmatpush3.bf16.msra.mxu0 %v3335_v4 }
0x1071   : > { %3221 = vmatprep.subr.bf16.mxu0 %v3446_v17 }
0x1074   : > { %3222 = vmatpush3.bf16.msra.mxu0 %v3336_v25 }
0x1075   : > { %3223 = vmatprep.subr.bf16.mxu0 %v3446_v17 }
0x1078   : > { %3224 = vmatpush3.bf16.msra.mxu0 %v3337_v43 }
0x1079   : > { %3225 = vmatprep.subr.bf16.mxu0 %v3446_v17 }
0x107c   : > { %3226 = vmatpush3.bf16.msra.mxu0 %v3338_v57 }
0x1142   : > { %v2256_v39 = vpop.f32.mrb[52].mxu0 }
0x1143   : > { %v2257_v16 = vadd.f32 %v2256_v39, %v2217_v38  ;;  %v3209_v15 = vpop.f32.mrb[53].mxu0 }
0x1144   : > { %v2259_v44 = vpop.f32.mrb[54].mxu0 }
0x1145   : > { %v3976_v45 = vadd.f32 %v2257_v16, %v3797_v36  ;;  %v2260_v46 = vadd.f32 %v2259_v44, %v2217_v38  ;;  %v3210_v47 = vpop.f32.mrb[55].mxu0 }
0x1147   : > { %v3979_v48 = vadd.f32 %v2260_v46, %v3800_v27  ;;  %v2265_v49 = vsel %vm472_vm0, %v3976_v45, 0.0 }
0x1148   : > { %2266 = vadd.xlane.f32.xlu1 %v2265_v49 }
0x1149   : > { %v2268_v52 = vsel %vm472_vm0, %v3979_v48, 0.0 }
0x114a   : > { %2269 = vadd.xlane.f32.xlu0 %v2268_v52 }
0x11d5   : > { %v2267_v53 = vpop.xlane.xlu1 %2266 }
0x11d6   : > { %v2271_v54 = vmul.f32 0.03125, %v2267_v53 }
0x11d7   : > { %v2270_v55 = vpop.xlane.xlu0 %2269 }
0x11d8   : > { %v2273_v56 = vsub.f32 %v3976_v45, %v2271_v54  ;;  %v2272_v36 = vmul.f32 0.03125, %v2270_v55  ;;  %v2928_v54 = vld [vmem:[%s4110_s9 + $0x1] ss:$0 sm:$0xff] }
0x11da   : > { %v2274_v58 = vsub.f32 %v3979_v48, %v2272_v36  ;;  %v2275_v50 = vmul.f32 %v2273_v56, %v2273_v56 }
0x11dc   : > { %v2277_v27 = vsel %vm472_vm0, %v2275_v50, 0.0  ;;  %v2276_v33 = vmul.f32 %v2274_v58, %v2274_v58 }
0x11dd   : > { %2278 = vadd.xlane.f32.xlu0 %v2277_v27 }
0x11de   : > { %v2280_v60 = vsel %vm472_vm0, %v2276_v33, 0.0 }
0x11df   : > { %2281 = vadd.xlane.f32.xlu1 %v2280_v60 }
0x126a   : > { %v2279_v63 = vpop.xlane.xlu0 %2278 }
0x126b   : > { %v2283_v18 = vmul.f32 0.03125, %v2279_v63 }
0x126c   : > { %v2282_v59 = vpop.xlane.xlu1 %2281 }
0x126d   : > { %v2285_v1 = vadd.f32 1e-05, %v2283_v18  ;;  %v2284_v3 = vmul.f32 0.03125, %v2282_v59 }
0x126f   : > { %3421 = vrsqrt.f32 %v2285_v1  ;;  %v2286_v5 = vadd.f32 1e-05, %v2284_v3 }
0x1271   : > { %3423 = vrsqrt.f32 %v2286_v5 }
0x1279   : > { %v3422_v7 = vpop.eup %3421 }
0x127a   : > { %v2289_v11 = vmul.f32 %v3422_v7, %v2273_v56 }
0x127b   : > { %v3424_v8 = vpop.eup %3423 }
0x127c   : > { %v2295_v9 = vmul.f32 %v2294_v62, %v2289_v11  ;;  %v2290_v10 = vmul.f32 %v3424_v8, %v2274_v58  ;;  %v3340_v8 = vld [vmem:[%s4112_s11 + $0x8] sm:$0xff]  }
0x127e   : > { %v2296_v13 = vmul.f32 %v2294_v62, %v2290_v10  ;;  %v2301_v40 = vadd.f32 %v2300_v12, %v2295_v9 }
0x1280   : > { %v2302_v41 = vadd.f32 %v2300_v12, %v2296_v13 }
0x1282   : > { %v2303_v19 = vpack.c.bf16 %v2302_v41, %v2301_v40 }
0x1284   : > { %3216 = vmatmul.mubr.msk.bf16.vlgmr.msra.gmra.mrb[48].mxu1 %vm472_vm0, %v2303_v19  ;;  %v2479_v19 = vld [vmem:[%s4111_s10] sm:$0x3] }
0x1285   : > { %3235 = vmatprep.mubr.msk.bf16.mxu1 %vm3447_vm1, %v3446_v17  ;;  %v2509_v4 = vrot.slane %v2479_v19, %v3588_v28 }
0x1357   : > { %v2366_v23 = vpop.f32.mrb[48].mxu1 }
0x1358   : > { %v2367_v24 = vadd.f32 %v2915_v22, %v2366_v23  ;;  %v3217_v26 = vpop.f32.mrb[49].mxu1 }
0x1359   : > { %v2369_v30 = vpop.f32.mrb[50].mxu1 }
0x135a   : > { %v2373_v0 = vmul.f32 %v2367_v24, %v2367_v24  ;;  %v2370_v32 = vadd.f32 %v2915_v22, %v2369_v30  ;;  %v3218_v34 = vpop.f32.mrb[51].mxu1 }
0x135c   : > { %v2375_v2 = vmul.f32 %v2373_v0, %v2367_v24  ;;  %v2374_v6 = vmul.f32 %v2370_v32, %v2370_v32 }
0x135e   : > { %v2377_v14 = vmul.f32 0.044715, %v2375_v2  ;;  %v2376_v35 = vmul.f32 %v2374_v6, %v2370_v32 }
0x1360   : > { %v2379_v20 = vadd.f32 %v2377_v14, %v2367_v24  ;;  %v2378_v37 = vmul.f32 0.044715, %v2376_v35 }
0x1362   : > { %v2381_v51 = vmul.f32 0.7978846, %v2379_v20  ;;  %v2380_v42 = vadd.f32 %v2378_v37, %v2370_v32  ;;  %v2586_v20 = vand.u32 127, %v500_v21  ;;  %v2627_v21 = vld [vmem:[%s4113_s12] sm:$0xff] }
0x1364   : > { %3425 = vtanh.f32 %v2381_v51  ;;  %v2382_v38 = vmul.f32 0.7978846, %v2380_v42 }
0x1366   : > { %3427 = vtanh.f32 %v2382_v38 }
0x136e   : > { %v3426_v39 = vpop.eup %3425 }
0x136f   : > { %v2385_v16 = vadd.f32 1.0, %v3426_v39 }
0x1370   : > { %v3428_v15 = vpop.eup %3427 }
0x1371   : > { %v2387_v44 = vmul.f32 0.5, %v2385_v16  ;;  %v2386_v46 = vadd.f32 1.0, %v3428_v15 }
0x1373   : > { %v2388_v47 = vmul.f32 0.5, %v2386_v46  ;;  %v2389_v49 = vmul.f32 %v2387_v44, %v2367_v24  ;;  %v2515_v24 = vrot.slane %v2479_v19, %v3599_v31 }
0x1375   : > { %v2390_v52 = vmul.f32 %v2388_v47, %v2370_v32  ;;  %v2628_v47 = vld [vmem:[%s4113_s12 + $0x8] sm:$0xff] }
0x1377   : > { %v2391_v53 = vpack.c.bf16 %v2390_v52, %v2389_v49  ;;  %v2629_v49 = vld [vmem:[%s4113_s12 + $0x10] sm:$0xff]  ;;  %v3258_v52 = vpack.c.bf16 %v2628_v47, %v2627_v21 }
0x1379   : > { %3228 = vmatmul.mubr.msk.bf16.vlgmr.msra.gmra.mrb[56].mxu0 %vm1425_vm5, %v2391_v53  ;;  %v2630_v53 = vld [vmem:[%s4113_s12 + $0x18] sm:$0xff] }
0x144c   : > { %v2470_v55 = vpop.f32.mrb[56].mxu0 }
0x144d   : > { %v2471_v56 = vadd.f32 %v2928_v54, %v2470_v55  ;;  %v3229_v36 = vpop.f32.mrb[57].mxu0 }
0x144e   : > { %v2473_v58 = vpop.f32.mrb[58].mxu0 }
0x144f   : > { %v2477_v50 = vadd.f32 %v2471_v56, %v3976_v45  ;;  %v2474_v27 = vadd.f32 %v2928_v54, %v2473_v58  ;;  %v3230_v33 = vpop.f32.mrb[59].mxu0  ;;  %v3262_v54 = vpack.c.bf16 %v2630_v53, %v2629_v49 }
0x1451   : > { %v2480_v60 = vsel %vm472_vm0, %v2477_v50, 0.0  ;;  %v2478_v61 = vadd.f32 %v2474_v27, %v3979_v48  ;;  %v3339_v48 = vld [vmem:[%s4112_s11] sm:$0xff]  }
0x1452   : > { %2481 = vadd.xlane.f32.xlu0 %v2480_v60  ;;  %3232 = vmatpush3.bf16.msra.mxu1 %v3339_v48 }
0x1453   : > { %v2483_v29 = vsel %vm472_vm0, %v2478_v61, 0.0  ;;  %3233 = vmatprep.subr.bf16.mxu1 %v3446_v17 }
0x1454   : > { %2484 = vadd.xlane.f32.xlu1 %v2483_v29  ;;  %v2632_v29 = vld [vmem:[%s4113_s12 + $0x28] sm:$0xff] }
0x1456   : > { %3234 = vmatpush3.bf16.msra.mxu1 %v3340_v8 }
0x1457   : > { %3259 = vmatprep.subr.bf16.mxu1 %v3258_v52 }
0x14df   : > { %v2482_v63 = vpop.xlane.xlu0 %2481 }
0x14e0   : > { %v2486_v18 = vmul.f32 0.03125, %v2482_v63 }
0x14e1   : > { %v2485_v59 = vpop.xlane.xlu1 %2484 }
0x14e2   : > { %v2488_v1 = vsub.f32 %v2477_v50, %v2486_v18  ;;  %v2487_v3 = vmul.f32 0.03125, %v2485_v59  ;;  %v2633_v18 = vld [vmem:[%s4113_s12 + $0x30] sm:$0xff]  ;;  %v2634_v59 = vld [vmem:[%s4113_s12 + $0x38] sm:$0xff] }
0x14e4   : > { %v2489_v5 = vsub.f32 %v2478_v61, %v2487_v3  ;;  %v2490_v62 = vmul.f32 %v2488_v1, %v2488_v1  ;;  %v2631_v61 = vld [vmem:[%s4113_s12 + $0x20] sm:$0xff] }
0x14e5   : > { %v3266_v63 = vpack.c.bf16 %v2632_v29, %v2631_v61 }
0x14e6   : > { %v2492_v7 = vsel %vm472_vm0, %v2490_v62, 0.0  ;;  %v2491_v45 = vmul.f32 %v2489_v5, %v2489_v5 }
0x14e7   : > { %2493 = vadd.xlane.f32.xlu0 %v2492_v7 }
0x14e8   : > { %v2495_v11 = vsel %vm472_vm0, %v2491_v45, 0.0 }
0x14e9   : > { %2496 = vadd.xlane.f32.xlu1 %v2495_v11 }
0x1574   : > { %v2494_v9 = vpop.xlane.xlu0 %2493 }
0x1575   : > { %v2498_v10 = vmul.f32 0.03125, %v2494_v9 }
0x1576   : > { %v2497_v12 = vpop.xlane.xlu1 %2496 }
0x1577   : > { %v2500_v13 = vadd.f32 1e-05, %v2498_v10  ;;  %v2499_v40 = vmul.f32 0.03125, %v2497_v12 }
0x1579   : > { %3429 = vrsqrt.f32 %v2500_v13  ;;  %v2501_v41 = vadd.f32 1e-05, %v2499_v40  ;;  %v2716_v40 = vld [vmem:[%s455_s21] sm:$0xff] }
0x157a   : > { %v2744_v19 = vsel %vm734_vm3, %v2716_v40, 0.0 }
0x157b   : > { %3431 = vrsqrt.f32 %v2501_v41  ;;  %v2717_v41 = vld [vmem:[%s455_s21 + $0x8] sm:$0xff] }
0x1583   : > { %v3430_v25 = vpop.eup %3429 }
0x1584   : > { %v2504_v43 = vmul.f32 %v3430_v25, %v2488_v1  ;;  %v3270_v1 = vpack.c.bf16 %v2634_v59, %v2633_v18 }
0x1585   : > { %v3432_v57 = vpop.eup %3431 }
0x1586   : > { %v2510_v22 = vmul.f32 %v2509_v4, %v2504_v43  ;;  %v2505_v23 = vmul.f32 %v3432_v57, %v2489_v5 }
0x1588   : > { %v2511_v26 = vmul.f32 %v2509_v4, %v2505_v23  ;;  %v2516_v30 = vadd.f32 %v2515_v24, %v2510_v22  ;;  %v2745_v4 = vsel %vm734_vm3, %v2717_v41, 0.0 }
0x1589   : > { %v2746_v25 = vadd.f32 %v2745_v4, %v2744_v19 }
0x158a   : > { %v2517_v0 = vadd.f32 %v2515_v24, %v2511_v26 }
0x158b   : > { %v2747_v43 = vrot.slane %v2746_v25, 4 }
0x158c   : > { %v2518_v32 = vpack.c.bf16 %v2517_v0, %v2516_v30 }
0x158d   : > { %v2748_v57 = vadd.f32 %v2747_v43, %v2746_v25 }
0x158e   : > { %3236 = vmatmul.mubr.msk.bf16.vlgmr.msra.gmra.mrb[52].mxu1 %vm472_vm0, %v2518_v32 }
0x158f   : > { %3261 = vmatpush3.bf16.msra.mxu1 %v3258_v52  ;;  %v2749_v22 = vrot.slane %v2748_v57, 2 }
0x1590   : > { %3263 = vmatprep.subr.bf16.mxu1 %v3262_v54 }
0x1591   : > { %v2750_v23 = vadd.f32 %v2749_v22, %v2748_v57 }
0x1593   : > { %3265 = vmatpush3.bf16.msra.mxu1 %v3262_v54  ;;  %v2751_v24 = vrot.slane %v2750_v23, 1 }
0x1594   : > { %3267 = vmatprep.subr.bf16.mxu1 %v3266_v63 }
0x1595   : > { %v2752_v26 = vadd.f32 %v2751_v24, %v2750_v23 }
0x1597   : > { %3269 = vmatpush3.bf16.msra.mxu1 %v3266_v63 }
0x1598   : > { %3271 = vmatprep.subr.bf16.mxu1 %v3270_v1 }
0x159b   : > { %3273 = vmatpush3.bf16.msra.mxu1 %v3270_v1 }
0x1661   : > { %v2572_v34 = vpop.f32.mrb[52].mxu1 }
0x1662   : > { %v3237_v2 = vpop.f32.mrb[53].mxu1  ;;  %v2579_v6 = vsel %vm1425_vm5, %v2572_v34, -inf }
0x1663   : > { %2580 = vmax.xlane.f32.xlu0 %v2579_v6  ;;  %v2575_v14 = vpop.f32.mrb[54].mxu1 }
0x1664   : > { %v3238_v28 = vpop.f32.mrb[55].mxu1  ;;  %v2582_v35 = vsel %vm1425_vm5, %v2575_v14, -inf }
0x1665   : > { %2583 = vmax.xlane.f32.xlu1 %v2582_v35 }
0x16f0   : > { %v2581_v37 = vpop.xlane.xlu0 %2580 }
0x16f1   : > { %vm2587_vm6 = vcmp.eq.f32.partialorder %v2572_v34, %v2581_v37 }
0x16f2   : > { %v2589_v31 = vsel %vm2587_vm6, %v2586_v20, 64  ;;  %v2584_v51 = vpop.xlane.xlu1 %2583 }
0x16f3   : > { %v2591_v42 = vsel %vm1425_vm5, %v2589_v31, 2147483647  ;;  %vm2588_vm7 = vcmp.eq.f32.partialorder %v2575_v14, %v2584_v51 }
0x16f4   : > { %v2593_v38 = vshra.s32 %v2591_v42, 16  ;;  %v2590_v39 = vsel %vm2588_vm7, %v2586_v20, 64  ;;  %v2592_v55 = vand.u32 65535, %v2591_v42 }
0x16f5   : > { %v2606_v16 = vsel %vm1425_vm5, %v2590_v39, 2147483647 }
0x16f6   : > { %v2595_v15 = vcvt.s32.f32 %v2593_v38  ;;  %v2608_v44 = vshra.s32 %v2606_v16, 16  ;;  %v2607_v56 = vand.u32 65535, %v2606_v16  ;;  %v2594_v58 = vcvt.s32.f32 %v2592_v55 }
0x16f8   : > { %2596 = vmin.xlane.f32.xlu0 %v2595_v15  ;;  %v2610_v46 = vcvt.s32.f32 %v2608_v44  ;;  %v2609_v33 = vcvt.s32.f32 %v2607_v56 }
0x16fa   : > { %2611 = vmin.xlane.f32.xlu1 %v2610_v46 }
0x1785   : > { %v2597_v36 = vpop.xlane.xlu0 %2596 }
0x1786   : > { %vm2598_vm8 = vcmp.eq.f32.partialorder %v2595_v15, %v2597_v36  ;;  %v2603_v3 = vcvt.f32.s32 %v2597_v36 }
0x1787   : > { %v2612_v50 = vpop.xlane.xlu1 %2611  ;;  %v2599_v27 = vsel %vm2598_vm8, %v2594_v58, inf }
0x1788   : > { %2600 = vmin.xlane.f32.xlu0 %v2599_v27  ;;  %vm2613_vm9 = vcmp.eq.f32.partialorder %v2610_v46, %v2612_v50  ;;  %v2618_v5 = vcvt.f32.s32 %v2612_v50  ;;  %v2604_v7 = vshll.u32 %v2603_v3, 16 }
0x1789   : > { %v2614_v60 = vsel %vm2613_vm9, %v2609_v33, inf }
0x178a   : > { %2615 = vmin.xlane.f32.xlu1 %v2614_v60  ;;  %v2619_v48 = vshll.u32 %v2618_v5, 16 }
0x1815   : > { %v2601_v62 = vpop.xlane.xlu0 %2600 }
0x1816   : > { %v2602_v45 = vcvt.f32.s32 %v2601_v62 }
0x1817   : > { %v2616_v11 = vpop.xlane.xlu1 %2615 }
0x1818   : > { %v2605_v8 = vadd.s32 %v2604_v7, %v2602_v45  ;;  %v2617_v9 = vcvt.f32.s32 %v2616_v11 }
0x181a   : > { %vm2621_vm10 = vcmp.eq.s32.totalorder %v2586_v20, %v2605_v8  ;;  %v2620_v10 = vadd.s32 %v2619_v48, %v2617_v9 }
0x181b   : > { %v2937_v12 = vsel %vm2621_vm10, 1.0, %v3446_v17 }
0x181c   : > { %vm2622_vm11 = vcmp.eq.s32.totalorder %v2586_v20, %v2620_v10  ;;  %3255 = vmatprep.mubr.msk.f32.mxu1 %vm1425_vm5, %v2937_v12 }
0x181d   : > { %v2938_v13 = vsel %vm2622_vm11, 1.0, %v3446_v17  ;;  %v2753_v17 = vmul.f32 0.0625, %v2752_v26 }
0x181e   : > { %3256 = vmatmul.mubr.msk.f32.vlgmr.msra.gmra.mrb[56].mxu1 %vm1425_vm5, %v2938_v13 }
0x181f   : > { %v2754_v30 = vsub.f32 %v2716_v40, %v2753_v17  ;;  %v2755_v0 = vsub.f32 %v2717_v41, %v2753_v17 }
0x1821   : > { %v2756_v32 = vmul.f32 %v2754_v30, %v2754_v30  ;;  %v2757_v34 = vmul.f32 %v2755_v0, %v2755_v0 }
0x1823   : > { %v2758_v2 = vsel %vm734_vm3, %v2756_v32, 0.0  ;;  %v2759_v6 = vsel %vm734_vm3, %v2757_v34, 0.0 }
0x1824   : > { %v2760_v14 = vadd.f32 %v2759_v6, %v2758_v2 }
0x1826   : > { %v2761_v28 = vrot.slane %v2760_v14, 4 }
0x1828   : > { %v2762_v42 = vadd.f32 %v2761_v28, %v2760_v14 }
0x182a   : > { %v2763_v16 = vrot.slane %v2762_v42, 2 }
0x182c   : > { %v2764_v46 = vadd.f32 %v2763_v16, %v2762_v42 }
0x182e   : > { %v2765_v49 = vrot.slane %v2764_v46, 1 }
0x1830   : > { %v2766_v55 = vadd.f32 %v2765_v49, %v2764_v46 }
0x1832   : > { %v2767_v27 = vmul.f32 0.06666667, %v2766_v55 }
0x1834   : > { %v2772_v61 = vadd.f32 1e-05, %v2767_v27 }
0x1836   : > { %3433 = vrsqrt.f32 %v2772_v61  ;;  %vm2775_vm12 = vcmp.eq.f32.partialorder %v2772_v61, inf  ;;  %v2778_v45 = vand.u32 2147483648, %v2772_v61  ;;  %vm2777_vm13 = vcmp.eq.f32.partialorder %v2772_v61, 0.0 }
0x1840   : > { %v3434_v62 = vpop.eup %3433 }
0x1841   : > { %v2774_v7 = vmul.f32 %v3434_v62, %v2772_v61 }
0x1843   : > { %v2776_v11 = vsel %vm2775_vm12, %v2772_v61, %v2774_v7 }
0x1844   : > { %v2779_v8 = vsel %vm2777_vm13, %v2778_v45, %v2776_v11 }
0x18f1   : > { %v3257_v35 = vpop.f32.mrb[56].mxu1 }
0x18f2   : > { %v2719_v20 = vsel %vm734_vm3, %v3257_v35, 0.0  ;;  %v2707_v37 = vpop.f32.mrb[57].mxu1 }
0x18f3   : > { %v2718_v31 = vsel %vm734_vm3, %v2707_v37, 0.0 }
0x18f4   : > { %v2720_v51 = vadd.f32 %v2719_v20, %v2718_v31 }
0x18f6   : > { %v2721_v38 = vrot.slane %v2720_v51, 4 }
0x18f8   : > { %v2722_v39 = vadd.f32 %v2721_v38, %v2720_v51 }
0x18fa   : > { %v2723_v15 = vrot.slane %v2722_v39, 2 }
0x18fc   : > { %v2724_v44 = vadd.f32 %v2723_v15, %v2722_v39 }
0x18fe   : > { %v2725_v21 = vrot.slane %v2724_v44, 1 }
0x1900   : > { %v2726_v47 = vadd.f32 %v2725_v21, %v2724_v44 }
0x1902   : > { %v2728_v52 = vmul.f32 0.0625, %v2726_v47 }
0x1904   : > { %v2729_v53 = vsub.f32 %v2707_v37, %v2728_v52  ;;  %v2730_v54 = vsub.f32 %v3257_v35, %v2728_v52 }
0x1906   : > { %v2731_v56 = vmul.f32 %v2729_v53, %v2729_v53  ;;  %v2732_v36 = vmul.f32 %v2730_v54, %v2730_v54 }
0x1908   : > { %v2733_v58 = vsel %vm734_vm3, %v2731_v56, 0.0  ;;  %v2734_v50 = vsel %vm734_vm3, %v2732_v36, 0.0 }
0x1909   : > { %v2735_v33 = vadd.f32 %v2734_v50, %v2733_v58 }
0x190b   : > { %v2736_v60 = vrot.slane %v2735_v33, 4 }
0x190d   : > { %v2737_v29 = vadd.f32 %v2736_v60, %v2735_v33 }
0x190f   : > { %v2738_v63 = vrot.slane %v2737_v29, 2 }
0x1911   : > { %v2739_v18 = vadd.f32 %v2738_v63, %v2737_v29 }
0x1913   : > { %v2740_v59 = vrot.slane %v2739_v18, 1 }
0x1915   : > { %v2741_v1 = vadd.f32 %v2740_v59, %v2739_v18 }
0x1917   : > { %v2743_v3 = vmul.f32 0.06666667, %v2741_v1 }
0x1919   : > { %v2768_v5 = vadd.f32 1e-05, %v2743_v3 }
0x191b   : > { %3435 = vrsqrt.f32 %v2768_v5 }
0x1925   : > { %v3436_v48 = vpop.eup %3435 }
0x1926   : > { %v2770_v9 = vmul.f32 %v3436_v48, %v2729_v53  ;;  %v2771_v10 = vmul.f32 %v3436_v48, %v2730_v54 }
0x1928   : > { %v2780_v12 = vmul.f32 %v2779_v8, %v2770_v9  ;;  %v2781_v13 = vmul.f32 %v2779_v8, %v2771_v10 }
0x192a   : > { %v2782_v40 = vadd.f32 %v2780_v12, %v2753_v17  ;;  %v2783_v41 = vadd.f32 %v2781_v13, %v2753_v17 }
0x192c   : > { %2784 = vst.msk [vmem:[%s460_s23] sm:$0xff] %vm734_vm3, %v2782_v40  ;;  %2785 = vst.msk [vmem:[%s460_s23 + $0x8] sm:$0xff] %vm734_vm3, %v2783_v41 }
0x192d PF: > { %s23_s25 = sadd.s32 1, %s3443_s25  }
0x192e   : > { %p20_p4 = scmp.ge.s32.totalorder %s23_s25, 4  }
0x1930   :  { %22 = sbr.rel (!%p20_p4) target bundleno = 1 (0x1), region = 112 }

// kernel: codeformer_forward.11
= control target key start
LH: loop header
LB: loop body
LE: loop exit
PB: predicated region body
PF: predicated region fallthrough
CT: control target
= control target key end

     0   :  { %s638_s12 = smov 0   ;;  %s758_s0 = inlined_call_operand.vmem [shape: f32[512,72], index: 0, kind: input, shape index: {}]   ;;  %s759_s1 = inlined_call_operand.vmem [shape: bf16[72,3], index: 1, kind: input, shape index: {}]   ;;  %s760_s2 = inlined_call_operand.vmem [shape: f32[1,3], index: 2, kind: input, shape index: {}]   ;;  %s761_s3 = inlined_call_operand.vmem [shape: f32[512,3], index: 3, kind: output, shape index: {}]  }
   0x1 LB: > { %s505_s13 = sadd.s32 4294967295, %s616_s12   ;;  %p509_p0 = scmp.ge.s32.totalorder %s616_s12, 1  ;;  %s616_s12 = sphi %s638_s12, %s13_s12  }
   0x2   : > { %p138_p1 = scmp.lt.s32.totalorder %s616_s12, 5 }
   0x4   : > { %p139_p2 = pnand %p509_p0, %p138_p1 }
   0x5   : > { %v605_v0 = vld [vmem:[%s759_s1] sm:$0xff] (!%p139_p2)   ;;  %v606_v1 = vld [vmem:[%s759_s1 + $0x8] sm:$0xff] (!%p139_p2)   ;;  %s510_s18 = sshll.u32 (!%p139_p2), %s505_s13, 4  ;;  %v607_v2 = vld [vmem:[%s759_s1 + $0x10] sm:$0xff] (!%p139_p2)   ;;  %vm242_vm0 = vcmask (!%p139_p2), 588800   ;;  %vm267_vm1 = vcmask (!%p139_p2), 1043456  }
   0x6   : > { %142 = sbr.rel (%p139_p2) target bundleno = 259 (0x103), region = 32  ;;  %559 = vmatprep.subr.bf16.mxu0 (!%p139_p2), %v605_v0  ;;  %585 = vmatprep.subr.bf16.mxu1 (!%p139_p2), %v605_v0  ;;  %p163_p3 = scmp.lt.s32.totalorder (!%p139_p2), %s510_s18, 63  ;;  %v608_v3 = vld [vmem:[%s759_s1 + $0x18] sm:$0xff] (!%p139_p2)   ;;  %v609_v10 = vld [vmem:[%s759_s1 + $0x20] ss:$0 sps:$4 sm:$0xff] (!%p139_p2)   ;;  %vm432_vm2 = vcmask (!%p139_p2), 23552  }
   0x7   : > { %560 = vmatpush3.bf16.msra.mxu0 (!%p139_p2), %v605_v0  ;;  %590 = vmatpush3.bf16.msra.mxu1 (!%p139_p2), %v605_v0  ;;  %v269_v16 = vsel (!%p139_p2), %vm267_vm1, %v609_v10, 0  ;;  %v698_v30 = vld [vmem:[%s760_s2] ss:$0 sm:$0xff] (!%p139_p2) }
   0x8   : > { %561 = vmatprep.subr.bf16.mxu0 (!%p139_p2), %v606_v1  ;;  %586 = vmatprep.subr.bf16.mxu1 (!%p139_p2), %v606_v1 }
   0xb   : > { %562 = vmatpush3.bf16.msra.mxu0 (!%p139_p2), %v606_v1  ;;  %591 = vmatpush3.bf16.msra.mxu1 (!%p139_p2), %v606_v1 }
   0xc   : > { %563 = vmatprep.subr.bf16.mxu0 (!%p139_p2), %v607_v2  ;;  %587 = vmatprep.subr.bf16.mxu1 (!%p139_p2), %v607_v2 }
   0xd   : > { %s763_s18 = smov (!%p163_p3, %s510_s18), 63 }
   0xe   : > { %s511_s21 = sshll.u32 %s763_s18, 3 }
   0xf   : > { %s666_s26 = scalar_lea.vmem %s758_s0, %s511_s21  ;;  %564 = vmatpush3.bf16.msra.mxu0 %v607_v2  ;;  %592 = vmatpush3.bf16.msra.mxu1 %v607_v2  ;;  %s713_s6 = scalar_lea.vmem %s761_s3, %s511_s21 }
  0x10   : > { %v175_v4 = vld [vmem:[%s666_s26] sm:$0xff]  ;;  %v176_v5 = vld [vmem:[%s666_s26 + $0x8] sm:$0xff]  ;;  %565 = vmatprep.subr.bf16.mxu0 %v608_v3  ;;  %588 = vmatprep.subr.bf16.mxu1 %v608_v3  ;;  %v177_v11 = vld [vmem:[%s666_s26 + $0x10] sm:$0xff] }
  0x11   : > { %v183_v6 = vld [vmem:[%s666_s26 + $0x40] sm:$0xff]  ;;  %v191_v7 = vpack.c.bf16 %v176_v5, %v175_v4  ;;  %v184_v8 = vld [vmem:[%s666_s26 + $0x48] sm:$0xff]  ;;  %v178_v12 = vld [vmem:[%s666_s26 + $0x18] sm:$0xff] }
  0x12   : > { %v195_v9 = vpack.c.bf16 %v184_v8, %v183_v6  ;;  %v185_v13 = vld [vmem:[%s666_s26 + $0x50] sm:$0xff]  ;;  %v186_v14 = vld [vmem:[%s666_s26 + $0x58] sm:$0xff]  ;;  %v179_v15 = vld [vmem:[%s666_s26 + $0x20] sm:$0xff]  ;;  %v192_v20 = vpack.c.bf16 %v178_v12, %v177_v11 }
  0x13   : > { %569 = vmatprep.mubr.msk.bf16.mxu0 %vm242_vm0, %v191_v7  ;;  %566 = vmatpush3.bf16.msra.mxu0 %v608_v3  ;;  %v180_v17 = vld [vmem:[%s666_s26 + $0x28] sm:$0xff]  ;;  %v187_v18 = vld [vmem:[%s666_s26 + $0x60] sm:$0xff]  ;;  %v196_v21 = vpack.c.bf16 %v186_v14, %v185_v13  ;;  %v181_v24 = vld [vmem:[%s666_s26 + $0x30] sm:$0xff] }
  0x14   : > { %577 = vmatprep.mubr.msk.bf16.mxu1 %vm242_vm0, %v195_v9  ;;  %593 = vmatpush3.bf16.msra.mxu1 %v608_v3  ;;  %v188_v19 = vld [vmem:[%s666_s26 + $0x68] sm:$0xff]  ;;  %v193_v22 = vpack.c.bf16 %v180_v17, %v179_v15  ;;  %v182_v25 = vld [vmem:[%s666_s26 + $0x38] sm:$0xff]  ;;  %v189_v26 = vld [vmem:[%s666_s26 + $0x70] sm:$0xff] }
  0x15   : > { %595 = vmatprep.subr.msk.bf16.mxu0 %vm267_vm1, %v609_v10  ;;  %596 = vmatprep.subr.msk.bf16.mxu1 %vm267_vm1, %v609_v10  ;;  %v197_v23 = vpack.c.bf16 %v188_v19, %v187_v18  ;;  %v190_v27 = vld [vmem:[%s666_s26 + $0x78] sm:$0xff]  ;;  %v194_v28 = vpack.c.bf16 %v182_v25, %v181_v24 }
  0x16   : > { %v198_v29 = vpack.c.bf16 %v190_v27, %v189_v26 }
  0x17   : > { %568 = vmatpush3.bf16.msra.mxu0 %v269_v16 }
  0x18   : > { %594 = vmatpush3.bf16.msra.mxu1 %v269_v16 }
  0x1a   : > { %570 = vmatmul.mubr.msk.bf16.vlgmr.msra.gmra.mrb[0].mxu0 %vm242_vm0, %v192_v20 }
  0x1b   : > { %578 = vmatmul.mubr.msk.bf16.vlgmr.msra.gmra.mrb[0].mxu1 %vm242_vm0, %v196_v21  ;;  %573 = vmatprep.mubr.msk.bf16.mxu0 %vm242_vm0, %v193_v22 }
  0x1c   : > { %581 = vmatprep.mubr.msk.bf16.mxu1 %vm242_vm0, %v197_v23 }
  0x22   : > { %574 = vmatmul.mubr.msk.bf16.gmra.mrb[4].mxu0 %vm242_vm0, %v194_v28 }
  0x23   : > { %582 = vmatmul.mubr.msk.bf16.gmra.mrb[4].mxu1 %vm242_vm0, %v198_v29 }
  0xed   : > { %v571_v31 = vpop.f32.mrb[0].mxu0 }
  0xee   : > { %v579_v32 = vpop.f32.mrb[0].mxu1  ;;  %v314_v33 = vadd.f32 %v571_v31, %v698_v30  ;;  %v305_v35 = vpop.f32.mrb[1].mxu0 }
  0xef   : > { %v346_v34 = vadd.f32 %v579_v32, %v698_v30  ;;  %v337_v36 = vpop.f32.mrb[1].mxu1  ;;  %v306_v37 = vadd.f32 %v698_v30, %v305_v35  ;;  %v572_v39 = vpop.f32.mrb[2].mxu0 }
  0xf0   : > { %v338_v38 = vadd.f32 %v698_v30, %v337_v36  ;;  %v580_v40 = vpop.f32.mrb[2].mxu1  ;;  %v530_v41 = vclamps-f32 %v314_v33, 1.0  ;;  %v317_v43 = vadd.f32 %v572_v39, %v698_v30  ;;  %v308_v45 = vpop.f32.mrb[3].mxu0 }
  0xf1   : > { %v538_v42 = vclamps-f32 %v346_v34, 1.0  ;;  %v349_v44 = vadd.f32 %v580_v40, %v698_v30  ;;  %v340_v46 = vpop.f32.mrb[3].mxu1  ;;  %v528_v47 = vclamps-f32 %v306_v37, 1.0  ;;  %v309_v49 = vadd.f32 %v698_v30, %v308_v45 }
  0xf2   : > { %v536_v48 = vclamps-f32 %v338_v38, 1.0  ;;  %v341_v50 = vadd.f32 %v698_v30, %v340_v46  ;;  %v402_v51 = vmul.f32 0.5, %v530_v41  ;;  %v531_v53 = vclamps-f32 %v317_v43, 1.0 }
  0xf3   : > { %v410_v52 = vmul.f32 0.5, %v538_v42  ;;  %v539_v54 = vclamps-f32 %v349_v44, 1.0  ;;  %v400_v55 = vmul.f32 0.5, %v528_v47  ;;  %v529_v57 = vclamps-f32 %v309_v49, 1.0 }
  0xf4   : > { %v408_v56 = vmul.f32 0.5, %v536_v48  ;;  %v537_v58 = vclamps-f32 %v341_v50, 1.0  ;;  %v418_v59 = vadd.f32 0.5, %v402_v51  ;;  %v403_v61 = vmul.f32 0.5, %v531_v53 }
  0xf5   : > { %v426_v60 = vadd.f32 0.5, %v410_v52  ;;  %v411_v62 = vmul.f32 0.5, %v539_v54  ;;  %v416_v63 = vadd.f32 0.5, %v400_v55  ;;  %v401_v1 = vmul.f32 0.5, %v529_v57  ;;  %v575_v3 = vpop.f32.mrb[4].mxu0 }
  0xf6   : > { %v424_v0 = vadd.f32 0.5, %v408_v56  ;;  %v409_v2 = vmul.f32 0.5, %v537_v58  ;;  %v583_v4 = vpop.f32.mrb[4].mxu1  ;;  %435 = vst.msk [vmem:[%s713_s6 + $0x10] sm:$0xff] %vm432_vm2, %v418_v59  ;;  %v419_v5 = vadd.f32 0.5, %v403_v61  ;;  %v330_v7 = vadd.f32 %v575_v3, %v698_v30  ;;  %v321_v9 = vpop.f32.mrb[5].mxu0 }
  0xf7   : > { %443 = vst.msk [vmem:[%s713_s6 + $0x50] sm:$0xff] %vm432_vm2, %v426_v60  ;;  %v427_v6 = vadd.f32 0.5, %v411_v62  ;;  %v362_v8 = vadd.f32 %v583_v4, %v698_v30  ;;  %v353_v10 = vpop.f32.mrb[5].mxu1  ;;  %433 = vst.msk [vmem:[%s713_s6] sm:$0xff] %vm432_vm2, %v416_v63  ;;  %v417_v11 = vadd.f32 0.5, %v401_v1  ;;  %v322_v13 = vadd.f32 %v698_v30, %v321_v9  ;;  %v576_v15 = vpop.f32.mrb[6].mxu0 }
  0xf8   : > { %441 = vst.msk [vmem:[%s713_s6 + $0x40] sm:$0xff] %vm432_vm2, %v424_v0  ;;  %v425_v12 = vadd.f32 0.5, %v409_v2  ;;  %v354_v14 = vadd.f32 %v698_v30, %v353_v10  ;;  %v584_v16 = vpop.f32.mrb[6].mxu1  ;;  %436 = vst.msk [vmem:[%s713_s6 + $0x18] sm:$0xff] %vm432_vm2, %v419_v5  ;;  %v534_v17 = vclamps-f32 %v330_v7, 1.0  ;;  %v333_v19 = vadd.f32 %v576_v15, %v698_v30  ;;  %v324_v21 = vpop.f32.mrb[7].mxu0 }
  0xf9   : > { %444 = vst.msk [vmem:[%s713_s6 + $0x58] sm:$0xff] %vm432_vm2, %v427_v6  ;;  %v542_v18 = vclamps-f32 %v362_v8, 1.0  ;;  %v365_v20 = vadd.f32 %v584_v16, %v698_v30  ;;  %v356_v22 = vpop.f32.mrb[7].mxu1  ;;  %434 = vst.msk [vmem:[%s713_s6 + $0x8] sm:$0xff] %vm432_vm2, %v417_v11  ;;  %v532_v23 = vclamps-f32 %v322_v13, 1.0  ;;  %v325_v25 = vadd.f32 %v698_v30, %v324_v21 }
  0xfa   : > { %442 = vst.msk [vmem:[%s713_s6 + $0x48] sm:$0xff] %vm432_vm2, %v425_v12  ;;  %v540_v24 = vclamps-f32 %v354_v14, 1.0  ;;  %v357_v26 = vadd.f32 %v698_v30, %v356_v22  ;;  %v406_v27 = vmul.f32 0.5, %v534_v17  ;;  %v535_v29 = vclamps-f32 %v333_v19, 1.0 }
  0xfb   : > { %v414_v28 = vmul.f32 0.5, %v542_v18  ;;  %v543_v31 = vclamps-f32 %v365_v20, 1.0  ;;  %v404_v32 = vmul.f32 0.5, %v532_v23  ;;  %v533_v34 = vclamps-f32 %v325_v25, 1.0 }
  0xfc   : > { %v412_v33 = vmul.f32 0.5, %v540_v24  ;;  %v541_v35 = vclamps-f32 %v357_v26, 1.0  ;;  %v422_v36 = vadd.f32 0.5, %v406_v27  ;;  %v407_v38 = vmul.f32 0.5, %v535_v29 }
  0xfd   : > { %v430_v37 = vadd.f32 0.5, %v414_v28  ;;  %v415_v39 = vmul.f32 0.5, %v543_v31  ;;  %v420_v30 = vadd.f32 0.5, %v404_v32  ;;  %v405_v41 = vmul.f32 0.5, %v533_v34 }
  0xfe   : > { %v428_v40 = vadd.f32 0.5, %v412_v33  ;;  %v413_v42 = vmul.f32 0.5, %v541_v35  ;;  %439 = vst.msk [vmem:[%s713_s6 + $0x30] sm:$0xff] %vm432_vm2, %v422_v36  ;;  %v423_v43 = vadd.f32 0.5, %v407_v38 }
  0xff   : > { %447 = vst.msk [vmem:[%s713_s6 + $0x70] sm:$0xff] %vm432_vm2, %v430_v37  ;;  %v431_v44 = vadd.f32 0.5, %v415_v39  ;;  %437 = vst.msk [vmem:[%s713_s6 + $0x20] sm:$0xff] %vm432_vm2, %v420_v30  ;;  %v421_v45 = vadd.f32 0.5, %v405_v41 }
 0x100   : > { %445 = vst.msk [vmem:[%s713_s6 + $0x60] sm:$0xff] %vm432_vm2, %v428_v40  ;;  %v429_v46 = vadd.f32 0.5, %v413_v42  ;;  %440 = vst.msk [vmem:[%s713_s6 + $0x38] sm:$0xff] %vm432_vm2, %v423_v43 }
 0x101   : > { %448 = vst.msk [vmem:[%s713_s6 + $0x78] sm:$0xff] %vm432_vm2, %v431_v44  ;;  %438 = vst.msk [vmem:[%s713_s6 + $0x28] sm:$0xff] %vm432_vm2, %v421_v45 }
 0x102   : > { %446 = vst.msk [vmem:[%s713_s6 + $0x68] sm:$0xff] %vm432_vm2, %v429_v46 }
 0x103 PF: > { %s13_s12 = sadd.s32 1, %s616_s12  }
 0x104   : > { %p10_p4 = scmp.ge.s32.totalorder %s13_s12, 6  }
 0x106   :  { %12 = sbr.rel (!%p10_p4) target bundleno = 1 (0x1), region = 62 }

</bundles_post_ra>
